<compile_context>
chip_gen: v5e
topology: v5e:2x2
jax: 0.10.0
libtpu: 0.0.40
codegen_flags: <defaults>
</compile_context>

<pallas_src>
import jax
import jax.numpy as jnp
from jax.experimental import pallas as pl
from jax.experimental.pallas import tpu as pltpu


_VMEM_LIMIT = 48 * 1024 * 1024   # headroom under v7x's 64 MiB physical VMEM


def _cparams(dimension_semantics):
    return pltpu.CompilerParams(dimension_semantics=dimension_semantics,
                                vmem_limit_bytes=_VMEM_LIMIT)


# ----------------------------------------------------------------------------
# Tile-size helpers (shapes are static under jit)
# ----------------------------------------------------------------------------
def _row_tile(n, max_tile=512):
    """Largest power-of-two row tile (>=8) dividing n, else the full n."""
    t = max_tile
    while t >= 8:
        if n % t == 0:
            return t
        t //= 2
    return n


def _time_tile(t, max_tile=32):
    """Timesteps processed per grid step of the recurrence."""
    tb = max_tile
    while tb > 1:
        if t % tb == 0:
            return tb
        tb //= 2
    return 1


# ----------------------------------------------------------------------------
# Kernel 1: norm1 + fused input projection for both LSTM directions
# ----------------------------------------------------------------------------
def norm_gates_kernel(x_ref, g_ref, b_ref, w_ref, bias_ref, gf_ref, gb_ref):
    x = x_ref[...]                                          # [tn, C] f32
    m = jnp.mean(x, axis=-1, keepdims=True)
    v = jnp.mean((x - m) ** 2, axis=-1, keepdims=True)
    xn = (x - m) * jax.lax.rsqrt(v + 1e-5) * g_ref[...] + b_ref[...]
    # One fused [C, 8H] matmul for both directions; bf16 operands, f32 acc.
    gates = jnp.dot(xn.astype(jnp.bfloat16), w_ref[...],
                    preferred_element_type=jnp.float32) + bias_ref[...]
    G = gf_ref.shape[-1]                                    # 4H
    gf_ref[...] = gates[:, :G].astype(jnp.bfloat16)
    gb_ref[...] = gates[:, G:].astype(jnp.bfloat16)


def norm_gates_pallas(x2d, g1, b1, wih_cat_t, bias_cat):
    N, C = x2d.shape
    G2 = wih_cat_t.shape[1]                                 # 8H
    G = G2 // 2                                             # 4H
    tn = _row_tile(N)
    grid = (N // tn,)

    row_C = pl.BlockSpec((tn, C), lambda i: (i, 0))
    row_G = pl.BlockSpec((tn, G), lambda i: (i, 0))
    const_C = pl.BlockSpec((1, C), lambda i: (0, 0))
    const_G2 = pl.BlockSpec((1, G2), lambda i: (0, 0))
    w_spec = pl.BlockSpec((C, G2), lambda i: (0, 0))

    return pl.pallas_call(
        norm_gates_kernel,
        out_shape=(jax.ShapeDtypeStruct((N, G), jnp.bfloat16),
                   jax.ShapeDtypeStruct((N, G), jnp.bfloat16)),
        grid_spec=pltpu.PrefetchScalarGridSpec(
            num_scalar_prefetch=0,
            grid=grid,
            in_specs=[row_C, const_C, const_C, w_spec, const_G2],
            out_specs=(row_G, row_G),
        ),
        compiler_params=_cparams(("parallel",)),
    )(x2d, g1.reshape(1, C), b1.reshape(1, C),
      wih_cat_t, bias_cat.reshape(1, G2))


# ----------------------------------------------------------------------------
# Kernel 2: fused bidirectional LSTM recurrence (time-blocked)
# ----------------------------------------------------------------------------
def bilstm_kernel(gf_ref, gb_ref, whf_ref, whb_ref, hf_ref, hb_ref,
                  hf_s, cf_s, hb_s, cb_s):
    @pl.when(pl.program_id(0) == 0)
    def _():
        hf_s[...] = jnp.zeros_like(hf_s)
        cf_s[...] = jnp.zeros_like(cf_s)
        hb_s[...] = jnp.zeros_like(hb_s)
        cb_s[...] = jnp.zeros_like(cb_s)

    TB = gf_ref.shape[0]
    H = hf_s.shape[1]
    whf = whf_ref[...]                                      # [H, 4H] bf16
    whb = whb_ref[...]                                      # [H, 4H] bf16

    def cell(gates, c_prev):
        # Per-gate slices; only the needed transcendental per gate (EUP is the
        # single-slot unit on the serial critical path).
        i = jax.nn.sigmoid(gates[:, 0:H])
        f = jax.nn.sigmoid(gates[:, H:2 * H])
        g = jnp.tanh(gates[:, 2 * H:3 * H])
        o = jax.nn.sigmoid(gates[:, 3 * H:4 * H])
        c = f * c_prev + i * g
        h = o * jnp.tanh(c)
        return h, c

    def step(i, carry):
        # Forward direction: natural within-block order.
        gates_f = (gf_ref[i].astype(jnp.float32)
                   + jnp.dot(hf_s[...].astype(jnp.bfloat16), whf,
                             preferred_element_type=jnp.float32))
        h, c = cell(gates_f, cf_s[...])
        hf_s[...] = h
        cf_s[...] = c
        hf_ref[i] = h.astype(jnp.bfloat16)

        # Backward direction: reversed within-block order (block index_map is
        # already reversed, so outputs land at their natural time positions).
        j = TB - 1 - i
        gates_b = (gb_ref[j].astype(jnp.float32)
                   + jnp.dot(hb_s[...].astype(jnp.bfloat16), whb,
                             preferred_element_type=jnp.float32))
        h, c = cell(gates_b, cb_s[...])
        hb_s[...] = h
        cb_s[...] = c
        hb_ref[j] = h.astype(jnp.bfloat16)
        return carry

    jax.lax.fori_loop(0, TB, step, 0, unroll=True)


def bilstm_pallas(gxf, gxb, whh_f_bf16, whh_b_bf16, time_block):
    T, B, G = gxf.shape                                     # G = 4H
    H = whh_f_bf16.shape[0]
    nb = T // time_block

    g_fwd_spec = pl.BlockSpec((time_block, B, G), lambda s: (s, 0, 0))
    g_bwd_spec = pl.BlockSpec((time_block, B, G), lambda s: (nb - 1 - s, 0, 0))
    w_spec = pl.BlockSpec((H, G), lambda s: (0, 0))
    h_fwd_spec = pl.BlockSpec((time_block, B, H), lambda s: (s, 0, 0))
    h_bwd_spec = pl.BlockSpec((time_block, B, H), lambda s: (nb - 1 - s, 0, 0))

    return pl.pallas_call(
        bilstm_kernel,
        out_shape=(jax.ShapeDtypeStruct((T, B, H), jnp.bfloat16),
                   jax.ShapeDtypeStruct((T, B, H), jnp.bfloat16)),
        grid_spec=pltpu.PrefetchScalarGridSpec(
            num_scalar_prefetch=0,
            grid=(nb,),
            in_specs=[g_fwd_spec, g_bwd_spec, w_spec, w_spec],
            out_specs=(h_fwd_spec, h_bwd_spec),
            scratch_shapes=[pltpu.VMEM((B, H), jnp.float32)] * 4,
        ),
        compiler_params=_cparams(("arbitrary",)),
    )(gxf, gxb, whh_f_bf16, whh_b_bf16)


# ----------------------------------------------------------------------------
# Kernel 3: recompute norm1 -> PReLU -> split Linear -> +res -> norm2 -> +x
# ----------------------------------------------------------------------------
def proj_norm_kernel(alpha_ref, x_ref, hf_ref, hb_ref, wf_ref, wb_ref, bp_ref,
                     g1_ref, b1_ref, g2_ref, b2_ref, o_ref):
    alpha = alpha_ref[0]                                    # scalar from SMEM
    x = x_ref[...]                                          # [tn, C] f32

    # Recompute norm1(x) (cheaper than an extra HBM slab round trip).
    m1 = jnp.mean(x, axis=-1, keepdims=True)
    v1 = jnp.mean((x - m1) ** 2, axis=-1, keepdims=True)
    xn = (x - m1) * jax.lax.rsqrt(v1 + 1e-5) * g1_ref[...] + b1_ref[...]

    # PReLU in f32 (v5e VPU has no bf16), matmul operands in bf16.
    hf = hf_ref[...].astype(jnp.float32)
    hb = hb_ref[...].astype(jnp.float32)
    yf = jnp.where(hf > 0, hf, alpha * hf).astype(jnp.bfloat16)
    yb = jnp.where(hb > 0, hb, alpha * hb).astype(jnp.bfloat16)

    z = (jnp.dot(yf, wf_ref[...], preferred_element_type=jnp.float32)
         + jnp.dot(yb, wb_ref[...], preferred_element_type=jnp.float32)
         + bp_ref[...] + xn)

    m2 = jnp.mean(z, axis=-1, keepdims=True)
    v2 = jnp.mean((z - m2) ** 2, axis=-1, keepdims=True)
    o_ref[...] = ((z - m2) * jax.lax.rsqrt(v2 + 1e-5) * g2_ref[...]
                  + b2_ref[...] + x)                        # fused +x residual


def proj_norm_pallas(alpha, x2d, hf2d, hb2d, wf_t, wb_t, bproj, g1, b1, g2, b2):
    N, C = x2d.shape
    H = hf2d.shape[1]
    tn = _row_tile(N)
    grid = (N // tn,)

    row_H = pl.BlockSpec((tn, H), lambda i: (i, 0))
    row_C = pl.BlockSpec((tn, C), lambda i: (i, 0))
    const_C = pl.BlockSpec((1, C), lambda i: (0, 0))
    w_spec = pl.BlockSpec((H, C), lambda i: (0, 0))
    smem_spec = pl.BlockSpec(memory_space=pltpu.MemorySpace.SMEM)

    return pl.pallas_call(
        proj_norm_kernel,
        out_shape=jax.ShapeDtypeStruct((N, C), jnp.float32),
        grid_spec=pltpu.PrefetchScalarGridSpec(
            num_scalar_prefetch=0,
            grid=grid,
            in_specs=[smem_spec, row_C, row_H, row_H, w_spec, w_spec, const_C,
                      const_C, const_C, const_C, const_C],
            out_specs=row_C,
        ),
        compiler_params=_cparams(("parallel",)),
    )(alpha, x2d, hf2d, hb2d, wf_t, wb_t, bproj.reshape(1, C),
      g1.reshape(1, C), b1.reshape(1, C), g2.reshape(1, C), b2.reshape(1, C))


# ----------------------------------------------------------------------------
# Full forward pass (layout glue in plain JAX, hot paths in Pallas)
# ----------------------------------------------------------------------------
@jax.jit
def rnn_projection_forward(x, params):
    # x: [B, C, T]
    B, C, T = x.shape
    H = params["whh_f_t"].shape[0]

    # Time-major 2-D layout shared by kernels 1 and 3: [B,C,T] -> [T*B, C].
    # (Folding this transpose into kernel 1 via an in-kernel XLU transpose is a
    #  further option; kept as a single XLA transpose for lowering safety.)
    x2d = jnp.transpose(x, (2, 0, 1)).reshape(T * B, C)

    # Fused input-projection weight/bias for both directions (bf16 operands).
    wih_cat = jnp.concatenate(
        [params["wih_f_t"], params["wih_b_t"]], axis=1).astype(jnp.bfloat16)
    bias_cat = jnp.concatenate([params["bias_f"], params["bias_b"]])

    gxf2d, gxb2d = norm_gates_pallas(x2d, params["g1"], params["b1"],
                                     wih_cat, bias_cat)
    gxf = gxf2d.reshape(T, B, 4 * H)                        # free reshapes
    gxb = gxb2d.reshape(T, B, 4 * H)

    # Fused bidirectional LSTM recurrence (no flips; reversed index_map).
    tb = _time_tile(T)
    h_f, h_b = bilstm_pallas(gxf, gxb,
                             params["whh_f_t"].astype(jnp.bfloat16),
                             params["whh_b_t"].astype(jnp.bfloat16), tb)

    # PReLU -> Linear (split by direction) -> +norm1(x) -> norm2 -> +x.
    wproj_t = params["wproj_t"].astype(jnp.bfloat16)        # [2H, C]
    y2d = proj_norm_pallas(params["alpha"], x2d,
                           h_f.reshape(T * B, H), h_b.reshape(T * B, H),
                           wproj_t[:H], wproj_t[H:],
                           params["bproj"],
                           params["g1"], params["b1"],
                           params["g2"], params["b2"])

    return jnp.transpose(y2d.reshape(T, B, C), (1, 2, 0))   # [B, C, T]


# ----------------------------------------------------------------------------
# Pure-JAX f32 reference (for correctness check)
# ----------------------------------------------------------------------------
def _layernorm_ref(x, g, b, eps=1e-5):
    m = jnp.mean(x, axis=-1, keepdims=True)
    v = jnp.mean((x - m) ** 2, axis=-1, keepdims=True)
    return (x - m) * jax.lax.rsqrt(v + eps) * g + b


def _lstm_dir_ref(xs, wih_t, whh_t, bias):
    # xs: [T, B, C]; wih_t: [C, 4H]; whh_t: [H, 4H]; bias: [4H]
    T, B, _ = xs.shape
    H = whh_t.shape[0]

    def step(carry, xt):
        h, c = carry
        gates = xt @ wih_t + h @ whh_t + bias
        i = jax.nn.sigmoid(gates[:, :H])
        f = jax.nn.sigmoid(gates[:, H:2 * H])
        g = jnp.tanh(gates[:, 2 * H:3 * H])
        o = jax.nn.sigmoid(gates[:, 3 * H:])
        c = f * c + i * g
        h = o * jnp.tanh(c)
        return (h, c), h

    init = (jnp.zeros((B, H)), jnp.zeros((B, H)))
    _, hs = jax.lax.scan(step, init, xs)
    return hs


def rnn_projection_ref(x, p):
    B, C, T = x.shape
    res = x
    xt = jnp.transpose(x, (0, 2, 1))
    xn = _layernorm_ref(xt, p["g1"], p["b1"])
    residual = xn
    x_tm = jnp.transpose(xn, (1, 0, 2))
    h_f = _lstm_dir_ref(x_tm, p["wih_f_t"], p["whh_f_t"], p["bias_f"])
    h_b = jnp.flip(_lstm_dir_ref(jnp.flip(x_tm, 0),
                                 p["wih_b_t"], p["whh_b_t"], p["bias_b"]), 0)
    h = jnp.transpose(jnp.concatenate([h_f, h_b], -1), (1, 0, 2))  # [B, T, 2H]
    y = jnp.where(h > 0, h, p["alpha"][0] * h)
    z = y @ p["wproj_t"] + p["bproj"]
    z = _layernorm_ref(z + residual, p["g2"], p["b2"])
    return jnp.transpose(z, (0, 2, 1)) + res


# ----------------------------------------------------------------------------
# Deterministic parameter construction
# ----------------------------------------------------------------------------
def make_params(key, input_size, hidden_size):
    C, H = input_size, hidden_size
    k = 1.0 / jnp.sqrt(H)
    keys = jax.random.split(key, 12)

    def u(kk, shape):
        return jax.random.uniform(kk, shape, jnp.float32, -k, k)

    return {
        "g1": jnp.ones((C,), jnp.float32),
        "b1": jnp.zeros((C,), jnp.float32),
        # forward-direction LSTM weights (stored pre-transposed: x @ W^T form)
        "wih_f_t": u(keys[0], (4 * H, C)).T,
        "whh_f_t": u(keys[1], (4 * H, H)).T,
        "bias_f": u(keys[2], (4 * H,)) + u(keys[3], (4 * H,)),   # b_ih + b_hh
        # backward-direction LSTM weights
        "wih_b_t": u(keys[4], (4 * H, C)).T,
        "whh_b_t": u(keys[5], (4 * H, H)).T,
        "bias_b": u(keys[6], (4 * H,)) + u(keys[7], (4 * H,)),
        # PReLU (single parameter, PyTorch default init 0.25)
        "alpha": jnp.full((1,), 0.25, jnp.float32),
        # Linear(2H -> C): weight [C, 2H] stored transposed -> [2H, C]
        "wproj_t": jax.random.uniform(keys[8], (C, 2 * H), jnp.float32,
                                      -1.0 / jnp.sqrt(2 * H),
                                      1.0 / jnp.sqrt(2 * H)).T,
        "bproj": jax.random.uniform(keys[9], (C,), jnp.float32,
                                    -1.0 / jnp.sqrt(2 * H),
                                    1.0 / jnp.sqrt(2 * H)),
        # norm2 with non-trivial affine to exercise the full path
        "g2": 1.0 + 0.1 * jax.random.normal(keys[10], (C,), jnp.float32),
        "b2": 0.1 * jax.random.normal(keys[11], (C,), jnp.float32),
    }


# ----------------------------------------------------------------------------
if __name__ == "__main__":
    B, C, T, H = 2, 32, 8, 32     # batch, input_size (channels), seq len, hidden

    key = jax.random.PRNGKey(0)
    kx, kp = jax.random.split(key)
    x = jax.random.normal(kx, (B, C, T), jnp.float32)
    params = make_params(kp, C, H)

    out = rnn_projection_forward(x, params)
    out = jax.block_until_ready(out)

    ref = rnn_projection_ref(x, params)
    assert out.shape == (B, C, T)
    # bf16 MXU operands / bf16 inter-kernel slabs -> loosened parity vs the
    # pure-f32 reference (structure verified at 1e-4 in the f32 variant).
    assert jnp.allclose(out, ref, atol=1e-1, rtol=1e-1), \
        f"max err {jnp.max(jnp.abs(out - ref))}"

    print("KERNEL_OK")
</pallas_src>

<mosaic_0001>
module attributes {stable_mosaic.version = 11 : i64} {
  func.func @proj_norm_kernel(%arg0: i32, %arg1: memref<1xf32, #tpu.memory_space<smem>>, %arg2: memref<16x32xf32, #tpu.memory_space<vmem>>, %arg3: memref<16x32xbf16, #tpu.memory_space<vmem>>, %arg4: memref<16x32xbf16, #tpu.memory_space<vmem>>, %arg5: memref<32x32xbf16, #tpu.memory_space<vmem>>, %arg6: memref<32x32xbf16, #tpu.memory_space<vmem>>, %arg7: memref<1x32xf32, #tpu.memory_space<vmem>>, %arg8: memref<1x32xf32, #tpu.memory_space<vmem>>, %arg9: memref<1x32xf32, #tpu.memory_space<vmem>>, %arg10: memref<1x32xf32, #tpu.memory_space<vmem>>, %arg11: memref<1x32xf32, #tpu.memory_space<vmem>>, %arg12: memref<16x32xf32, #tpu.memory_space<vmem>>) attributes {dimension_semantics = [#tpu.dimension_semantics<parallel>], iteration_bounds = array<i64: 1>, scalar_prefetch = 0 : i64, scratch_operands = 0 : i64, tpu.core_type = #tpu.core_type<tc>, window_params = [{transform_indices = @transform_0, window_bounds = array<i64: 1>}, {transform_indices = @transform_1, window_bounds = array<i64: 16, 32>}, {transform_indices = @transform_2, window_bounds = array<i64: 16, 32>}, {transform_indices = @transform_3, window_bounds = array<i64: 16, 32>}, {pipeline_mode = #tpu.pipeline_mode<synchronous>, transform_indices = @transform_4, window_bounds = array<i64: 32, 32>}, {pipeline_mode = #tpu.pipeline_mode<synchronous>, transform_indices = @transform_5, window_bounds = array<i64: 32, 32>}, {pipeline_mode = #tpu.pipeline_mode<synchronous>, transform_indices = @transform_6, window_bounds = array<i64: 1, 32>}, {pipeline_mode = #tpu.pipeline_mode<synchronous>, transform_indices = @transform_7, window_bounds = array<i64: 1, 32>}, {pipeline_mode = #tpu.pipeline_mode<synchronous>, transform_indices = @transform_8, window_bounds = array<i64: 1, 32>}, {pipeline_mode = #tpu.pipeline_mode<synchronous>, transform_indices = @transform_9, window_bounds = array<i64: 1, 32>}, {pipeline_mode = #tpu.pipeline_mode<synchronous>, transform_indices = @transform_10, window_bounds = array<i64: 1, 32>}, {transform_indices = @transform_11, window_bounds = array<i64: 16, 32>}]} {
    %c0 = arith.constant 0 : index
    %0 = memref.load %arg1[%c0] : memref<1xf32, #tpu.memory_space<smem>>
    %c0_0 = arith.constant 0 : index
    %c0_1 = arith.constant 0 : index
    %1 = vector.load %arg2[%c0_0, %c0_1] : memref<16x32xf32, #tpu.memory_space<vmem>>, vector<16x32xf32>
    %cst = arith.constant dense<0.000000e+00> : vector<16xf32>
    %2 = vector.multi_reduction <add>, %1, %cst [1] : vector<16x32xf32> to vector<16xf32>
    %3 = vector.shape_cast %2 : vector<16xf32> to vector<16x1xf32>
    %cst_2 = arith.constant 3.200000e+01 : f32
    %4 = vector.broadcast %cst_2 : f32 to vector<16x1xf32>
    %5 = arith.divf %3, %4 : vector<16x1xf32>
    %6 = vector.broadcast %5 : vector<16x1xf32> to vector<16x32xf32>
    %7 = arith.subf %1, %6 : vector<16x32xf32>
    %8 = arith.mulf %7, %7 : vector<16x32xf32>
    %cst_3 = arith.constant dense<0.000000e+00> : vector<16xf32>
    %9 = vector.multi_reduction <add>, %8, %cst_3 [1] : vector<16x32xf32> to vector<16xf32>
    %10 = vector.shape_cast %9 : vector<16xf32> to vector<16x1xf32>
    %cst_4 = arith.constant 3.200000e+01 : f32
    %11 = vector.broadcast %cst_4 : f32 to vector<16x1xf32>
    %12 = arith.divf %10, %11 : vector<16x1xf32>
    %13 = vector.broadcast %5 : vector<16x1xf32> to vector<16x32xf32>
    %14 = arith.subf %1, %13 : vector<16x32xf32>
    %cst_5 = arith.constant 9.99999974E-6 : f32
    %15 = vector.broadcast %cst_5 : f32 to vector<16x1xf32>
    %16 = arith.addf %12, %15 : vector<16x1xf32>
    %17 = math.rsqrt %16 : vector<16x1xf32>
    %18 = vector.broadcast %17 : vector<16x1xf32> to vector<16x32xf32>
    %19 = arith.mulf %14, %18 : vector<16x32xf32>
    %c0_6 = arith.constant 0 : index
    %c0_7 = arith.constant 0 : index
    %20 = vector.load %arg8[%c0_6, %c0_7] : memref<1x32xf32, #tpu.memory_space<vmem>>, vector<1x32xf32>
    %21 = vector.broadcast %20 : vector<1x32xf32> to vector<16x32xf32>
    %22 = arith.mulf %19, %21 : vector<16x32xf32>
    %c0_8 = arith.constant 0 : index
    %c0_9 = arith.constant 0 : index
    %23 = vector.load %arg9[%c0_8, %c0_9] : memref<1x32xf32, #tpu.memory_space<vmem>>, vector<1x32xf32>
    %24 = vector.broadcast %23 : vector<1x32xf32> to vector<16x32xf32>
    %25 = arith.addf %22, %24 : vector<16x32xf32>
    %c0_10 = arith.constant 0 : index
    %c0_11 = arith.constant 0 : index
    %26 = vector.load %arg3[%c0_10, %c0_11] : memref<16x32xbf16, #tpu.memory_space<vmem>>, vector<16x32xbf16>
    %27 = arith.extf %26 : vector<16x32xbf16> to vector<16x32xf32>
    %c0_12 = arith.constant 0 : index
    %c0_13 = arith.constant 0 : index
    %28 = vector.load %arg4[%c0_12, %c0_13] : memref<16x32xbf16, #tpu.memory_space<vmem>>, vector<16x32xbf16>
    %29 = arith.extf %28 : vector<16x32xbf16> to vector<16x32xf32>
    %cst_14 = arith.constant 0.000000e+00 : f32
    %30 = vector.broadcast %cst_14 : f32 to vector<16x32xf32>
    %31 = arith.cmpf ogt, %27, %30 : vector<16x32xf32>
    %32 = vector.broadcast %0 : f32 to vector<16x32xf32>
    %33 = arith.mulf %32, %27 : vector<16x32xf32>
    %34 = arith.select %31, %27, %33 : vector<16x32xi1>, vector<16x32xf32>
    %35 = arith.truncf %34 : vector<16x32xf32> to vector<16x32xbf16>
    %cst_15 = arith.constant 0.000000e+00 : f32
    %36 = vector.broadcast %cst_15 : f32 to vector<16x32xf32>
    %37 = arith.cmpf ogt, %29, %36 : vector<16x32xf32>
    %38 = vector.broadcast %0 : f32 to vector<16x32xf32>
    %39 = arith.mulf %38, %29 : vector<16x32xf32>
    %40 = arith.select %37, %29, %39 : vector<16x32xi1>, vector<16x32xf32>
    %41 = arith.truncf %40 : vector<16x32xf32> to vector<16x32xbf16>
    %c0_16 = arith.constant 0 : index
    %c0_17 = arith.constant 0 : index
    %42 = vector.load %arg5[%c0_16, %c0_17] : memref<32x32xbf16, #tpu.memory_space<vmem>>, vector<32x32xbf16>
    %cst_18 = arith.constant dense<0.000000e+00> : vector<16x32xf32>
    %43 = tpu.matmul %35, %42, %cst_18 {dimension_numbers = #tpu.dot_dimension_numbers<[1], [0], [0], [1], [0, 0, 1, 1], [], []>} : vector<16x32xbf16>, vector<32x32xbf16>, vector<16x32xf32> -> vector<16x32xf32>
    %c0_19 = arith.constant 0 : index
    %c0_20 = arith.constant 0 : index
    %44 = vector.load %arg6[%c0_19, %c0_20] : memref<32x32xbf16, #tpu.memory_space<vmem>>, vector<32x32xbf16>
    %cst_21 = arith.constant dense<0.000000e+00> : vector<16x32xf32>
    %45 = tpu.matmul %41, %44, %cst_21 {dimension_numbers = #tpu.dot_dimension_numbers<[1], [0], [0], [1], [0, 0, 1, 1], [], []>} : vector<16x32xbf16>, vector<32x32xbf16>, vector<16x32xf32> -> vector<16x32xf32>
    %46 = arith.addf %43, %45 : vector<16x32xf32>
    %c0_22 = arith.constant 0 : index
    %c0_23 = arith.constant 0 : index
    %47 = vector.load %arg7[%c0_22, %c0_23] : memref<1x32xf32, #tpu.memory_space<vmem>>, vector<1x32xf32>
    %48 = vector.broadcast %47 : vector<1x32xf32> to vector<16x32xf32>
    %49 = arith.addf %46, %48 : vector<16x32xf32>
    %50 = arith.addf %49, %25 : vector<16x32xf32>
    %cst_24 = arith.constant dense<0.000000e+00> : vector<16xf32>
    %51 = vector.multi_reduction <add>, %50, %cst_24 [1] : vector<16x32xf32> to vector<16xf32>
    %52 = vector.shape_cast %51 : vector<16xf32> to vector<16x1xf32>
    %cst_25 = arith.constant 3.200000e+01 : f32
    %53 = vector.broadcast %cst_25 : f32 to vector<16x1xf32>
    %54 = arith.divf %52, %53 : vector<16x1xf32>
    %55 = vector.broadcast %54 : vector<16x1xf32> to vector<16x32xf32>
    %56 = arith.subf %50, %55 : vector<16x32xf32>
    %57 = arith.mulf %56, %56 : vector<16x32xf32>
    %cst_26 = arith.constant dense<0.000000e+00> : vector<16xf32>
    %58 = vector.multi_reduction <add>, %57, %cst_26 [1] : vector<16x32xf32> to vector<16xf32>
    %59 = vector.shape_cast %58 : vector<16xf32> to vector<16x1xf32>
    %cst_27 = arith.constant 3.200000e+01 : f32
    %60 = vector.broadcast %cst_27 : f32 to vector<16x1xf32>
    %61 = arith.divf %59, %60 : vector<16x1xf32>
    %62 = vector.broadcast %54 : vector<16x1xf32> to vector<16x32xf32>
    %63 = arith.subf %50, %62 : vector<16x32xf32>
    %cst_28 = arith.constant 9.99999974E-6 : f32
    %64 = vector.broadcast %cst_28 : f32 to vector<16x1xf32>
    %65 = arith.addf %61, %64 : vector<16x1xf32>
    %66 = math.rsqrt %65 : vector<16x1xf32>
    %67 = vector.broadcast %66 : vector<16x1xf32> to vector<16x32xf32>
    %68 = arith.mulf %63, %67 : vector<16x32xf32>
    %c0_29 = arith.constant 0 : index
    %c0_30 = arith.constant 0 : index
    %69 = vector.load %arg10[%c0_29, %c0_30] : memref<1x32xf32, #tpu.memory_space<vmem>>, vector<1x32xf32>
    %70 = vector.broadcast %69 : vector<1x32xf32> to vector<16x32xf32>
    %71 = arith.mulf %68, %70 : vector<16x32xf32>
    %c0_31 = arith.constant 0 : index
    %c0_32 = arith.constant 0 : index
    %72 = vector.load %arg11[%c0_31, %c0_32] : memref<1x32xf32, #tpu.memory_space<vmem>>, vector<1x32xf32>
    %73 = vector.broadcast %72 : vector<1x32xf32> to vector<16x32xf32>
    %74 = arith.addf %71, %73 : vector<16x32xf32>
    %75 = arith.addf %74, %1 : vector<16x32xf32>
    %c0_33 = arith.constant 0 : index
    %c0_34 = arith.constant 0 : index
    %76 = vector.load %arg12[%c0_33, %c0_34] : memref<16x32xf32, #tpu.memory_space<vmem>>, vector<16x32xf32>
    tpu.vector_store %arg12[%c0_33, %c0_34], %75 {strides = array<i32>} : memref<16x32xf32, #tpu.memory_space<vmem>>, vector<16x32xf32>,
    return
  }
  func.func @transform_0(%arg0: i32) -> i32 {
    %c0_i32 = arith.constant 0 : i32
    %c0_i32_0 = arith.constant 0 : i32
    return %c0_i32 : i32
  }
  func.func @transform_1(%arg0: i32) -> (i32, i32) {
    %c0_i32 = arith.constant 0 : i32
    %c0_i32_0 = arith.constant 0 : i32
    return %arg0, %c0_i32 : i32, i32
  }
  func.func @transform_2(%arg0: i32) -> (i32, i32) {
    %c0_i32 = arith.constant 0 : i32
    %c0_i32_0 = arith.constant 0 : i32
    return %arg0, %c0_i32 : i32, i32
  }
  func.func @transform_3(%arg0: i32) -> (i32, i32) {
    %c0_i32 = arith.constant 0 : i32
    %c0_i32_0 = arith.constant 0 : i32
    return %arg0, %c0_i32 : i32, i32
  }
  func.func @transform_4(%arg0: i32) -> (i32, i32) {
    %c0_i32 = arith.constant 0 : i32
    %c0_i32_0 = arith.constant 0 : i32
    %c0_i32_1 = arith.constant 0 : i32
    return %c0_i32, %c0_i32_0 : i32, i32
  }
  func.func @transform_5(%arg0: i32) -> (i32, i32) {
    %c0_i32 = arith.constant 0 : i32
    %c0_i32_0 = arith.constant 0 : i32
    %c0_i32_1 = arith.constant 0 : i32
    return %c0_i32, %c0_i32_0 : i32, i32
  }
  func.func @transform_6(%arg0: i32) -> (i32, i32) {
    %c0_i32 = arith.constant 0 : i32
    %c0_i32_0 = arith.constant 0 : i32
    %c0_i32_1 = arith.constant 0 : i32
    return %c0_i32, %c0_i32_0 : i32, i32
  }
  func.func @transform_7(%arg0: i32) -> (i32, i32) {
    %c0_i32 = arith.constant 0 : i32
    %c0_i32_0 = arith.constant 0 : i32
    %c0_i32_1 = arith.constant 0 : i32
    return %c0_i32, %c0_i32_0 : i32, i32
  }
  func.func @transform_8(%arg0: i32) -> (i32, i32) {
    %c0_i32 = arith.constant 0 : i32
    %c0_i32_0 = arith.constant 0 : i32
    %c0_i32_1 = arith.constant 0 : i32
    return %c0_i32, %c0_i32_0 : i32, i32
  }
  func.func @transform_9(%arg0: i32) -> (i32, i32) {
    %c0_i32 = arith.constant 0 : i32
    %c0_i32_0 = arith.constant 0 : i32
    %c0_i32_1 = arith.constant 0 : i32
    return %c0_i32, %c0_i32_0 : i32, i32
  }
  func.func @transform_10(%arg0: i32) -> (i32, i32) {
    %c0_i32 = arith.constant 0 : i32
    %c0_i32_0 = arith.constant 0 : i32
    %c0_i32_1 = arith.constant 0 : i32
    return %c0_i32, %c0_i32_0 : i32, i32
  }
  func.func @transform_11(%arg0: i32) -> (i32, i32) {
    %c0_i32 = arith.constant 0 : i32
    %c0_i32_0 = arith.constant 0 : i32
    return %arg0, %c0_i32 : i32, i32
  }
}

module attributes {stable_mosaic.version = 11 : i64} {
  func.func @norm_gates_kernel(%arg0: i32, %arg1: memref<16x32xf32, #tpu.memory_space<vmem>>, %arg2: memref<1x32xf32, #tpu.memory_space<vmem>>, %arg3: memref<1x32xf32, #tpu.memory_space<vmem>>, %arg4: memref<32x256xbf16, #tpu.memory_space<vmem>>, %arg5: memref<1x256xf32, #tpu.memory_space<vmem>>, %arg6: memref<16x128xbf16, #tpu.memory_space<vmem>>, %arg7: memref<16x128xbf16, #tpu.memory_space<vmem>>) attributes {dimension_semantics = [#tpu.dimension_semantics<parallel>], iteration_bounds = array<i64: 1>, scalar_prefetch = 0 : i64, scratch_operands = 0 : i64, tpu.core_type = #tpu.core_type<tc>, window_params = [{transform_indices = @transform_0, window_bounds = array<i64: 16, 32>}, {pipeline_mode = #tpu.pipeline_mode<synchronous>, transform_indices = @transform_1, window_bounds = array<i64: 1, 32>}, {pipeline_mode = #tpu.pipeline_mode<synchronous>, transform_indices = @transform_2, window_bounds = array<i64: 1, 32>}, {pipeline_mode = #tpu.pipeline_mode<synchronous>, transform_indices = @transform_3, window_bounds = array<i64: 32, 256>}, {pipeline_mode = #tpu.pipeline_mode<synchronous>, transform_indices = @transform_4, window_bounds = array<i64: 1, 256>}, {transform_indices = @transform_5, window_bounds = array<i64: 16, 128>}, {transform_indices = @transform_6, window_bounds = array<i64: 16, 128>}]} {
    %c0 = arith.constant 0 : index
    %c0_0 = arith.constant 0 : index
    %0 = vector.load %arg1[%c0, %c0_0] : memref<16x32xf32, #tpu.memory_space<vmem>>, vector<16x32xf32>
    %cst = arith.constant dense<0.000000e+00> : vector<16xf32>
    %1 = vector.multi_reduction <add>, %0, %cst [1] : vector<16x32xf32> to vector<16xf32>
    %2 = vector.shape_cast %1 : vector<16xf32> to vector<16x1xf32>
    %cst_1 = arith.constant 3.200000e+01 : f32
    %3 = vector.broadcast %cst_1 : f32 to vector<16x1xf32>
    %4 = arith.divf %2, %3 : vector<16x1xf32>
    %5 = vector.broadcast %4 : vector<16x1xf32> to vector<16x32xf32>
    %6 = arith.subf %0, %5 : vector<16x32xf32>
    %7 = arith.mulf %6, %6 : vector<16x32xf32>
    %cst_2 = arith.constant dense<0.000000e+00> : vector<16xf32>
    %8 = vector.multi_reduction <add>, %7, %cst_2 [1] : vector<16x32xf32> to vector<16xf32>
    %9 = vector.shape_cast %8 : vector<16xf32> to vector<16x1xf32>
    %cst_3 = arith.constant 3.200000e+01 : f32
    %10 = vector.broadcast %cst_3 : f32 to vector<16x1xf32>
    %11 = arith.divf %9, %10 : vector<16x1xf32>
    %12 = vector.broadcast %4 : vector<16x1xf32> to vector<16x32xf32>
    %13 = arith.subf %0, %12 : vector<16x32xf32>
    %cst_4 = arith.constant 9.99999974E-6 : f32
    %14 = vector.broadcast %cst_4 : f32 to vector<16x1xf32>
    %15 = arith.addf %11, %14 : vector<16x1xf32>
    %16 = math.rsqrt %15 : vector<16x1xf32>
    %17 = vector.broadcast %16 : vector<16x1xf32> to vector<16x32xf32>
    %18 = arith.mulf %13, %17 : vector<16x32xf32>
    %c0_5 = arith.constant 0 : index
    %c0_6 = arith.constant 0 : index
    %19 = vector.load %arg2[%c0_5, %c0_6] : memref<1x32xf32, #tpu.memory_space<vmem>>, vector<1x32xf32>
    %20 = vector.broadcast %19 : vector<1x32xf32> to vector<16x32xf32>
    %21 = arith.mulf %18, %20 : vector<16x32xf32>
    %c0_7 = arith.constant 0 : index
    %c0_8 = arith.constant 0 : index
    %22 = vector.load %arg3[%c0_7, %c0_8] : memref<1x32xf32, #tpu.memory_space<vmem>>, vector<1x32xf32>
    %23 = vector.broadcast %22 : vector<1x32xf32> to vector<16x32xf32>
    %24 = arith.addf %21, %23 : vector<16x32xf32>
    %25 = arith.truncf %24 : vector<16x32xf32> to vector<16x32xbf16>
    %c0_9 = arith.constant 0 : index
    %c0_10 = arith.constant 0 : index
    %26 = vector.load %arg4[%c0_9, %c0_10] : memref<32x256xbf16, #tpu.memory_space<vmem>>, vector<32x256xbf16>
    %cst_11 = arith.constant dense<0.000000e+00> : vector<16x256xf32>
    %27 = tpu.matmul %25, %26, %cst_11 {dimension_numbers = #tpu.dot_dimension_numbers<[1], [0], [0], [1], [0, 0, 1, 1], [], []>} : vector<16x32xbf16>, vector<32x256xbf16>, vector<16x256xf32> -> vector<16x256xf32>
    %c0_12 = arith.constant 0 : index
    %c0_13 = arith.constant 0 : index
    %28 = vector.load %arg5[%c0_12, %c0_13] : memref<1x256xf32, #tpu.memory_space<vmem>>, vector<1x256xf32>
    %29 = vector.broadcast %28 : vector<1x256xf32> to vector<16x256xf32>
    %30 = arith.addf %27, %29 : vector<16x256xf32>
    %31 = vector.extract_strided_slice %30 {offsets = [0, 0], sizes = [16, 128], strides = [1, 1]} : vector<16x256xf32> to vector<16x128xf32>
    %32 = arith.truncf %31 : vector<16x128xf32> to vector<16x128xbf16>
    %c0_14 = arith.constant 0 : index
    %c0_15 = arith.constant 0 : index
    %33 = vector.load %arg6[%c0_14, %c0_15] : memref<16x128xbf16, #tpu.memory_space<vmem>>, vector<16x128xbf16>
    tpu.vector_store %arg6[%c0_14, %c0_15], %32 {strides = array<i32>} : memref<16x128xbf16, #tpu.memory_space<vmem>>, vector<16x128xbf16>,
    %34 = vector.extract_strided_slice %30 {offsets = [0, 128], sizes = [16, 128], strides = [1, 1]} : vector<16x256xf32> to vector<16x128xf32>
    %35 = arith.truncf %34 : vector<16x128xf32> to vector<16x128xbf16>
    %c0_16 = arith.constant 0 : index
    %c0_17 = arith.constant 0 : index
    %36 = vector.load %arg7[%c0_16, %c0_17] : memref<16x128xbf16, #tpu.memory_space<vmem>>, vector<16x128xbf16>
    tpu.vector_store %arg7[%c0_16, %c0_17], %35 {strides = array<i32>} : memref<16x128xbf16, #tpu.memory_space<vmem>>, vector<16x128xbf16>,
    return
  }
  func.func @transform_0(%arg0: i32) -> (i32, i32) {
    %c0_i32 = arith.constant 0 : i32
    %c0_i32_0 = arith.constant 0 : i32
    return %arg0, %c0_i32 : i32, i32
  }
  func.func @transform_1(%arg0: i32) -> (i32, i32) {
    %c0_i32 = arith.constant 0 : i32
    %c0_i32_0 = arith.constant 0 : i32
    %c0_i32_1 = arith.constant 0 : i32
    return %c0_i32, %c0_i32_0 : i32, i32
  }
  func.func @transform_2(%arg0: i32) -> (i32, i32) {
    %c0_i32 = arith.constant 0 : i32
    %c0_i32_0 = arith.constant 0 : i32
    %c0_i32_1 = arith.constant 0 : i32
    return %c0_i32, %c0_i32_0 : i32, i32
  }
  func.func @transform_3(%arg0: i32) -> (i32, i32) {
    %c0_i32 = arith.constant 0 : i32
    %c0_i32_0 = arith.constant 0 : i32
    %c0_i32_1 = arith.constant 0 : i32
    return %c0_i32, %c0_i32_0 : i32, i32
  }
  func.func @transform_4(%arg0: i32) -> (i32, i32) {
    %c0_i32 = arith.constant 0 : i32
    %c0_i32_0 = arith.constant 0 : i32
    %c0_i32_1 = arith.constant 0 : i32
    return %c0_i32, %c0_i32_0 : i32, i32
  }
  func.func @transform_5(%arg0: i32) -> (i32, i32) {
    %c0_i32 = arith.constant 0 : i32
    %c0_i32_0 = arith.constant 0 : i32
    return %arg0, %c0_i32 : i32, i32
  }
  func.func @transform_6(%arg0: i32) -> (i32, i32) {
    %c0_i32 = arith.constant 0 : i32
    %c0_i32_0 = arith.constant 0 : i32
    return %arg0, %c0_i32 : i32, i32
  }
}

module attributes {stable_mosaic.version = 11 : i64} {
  func.func @bilstm_kernel(%arg0: i32, %arg1: memref<8x2x128xbf16, #tpu.memory_space<vmem>>, %arg2: memref<8x2x128xbf16, #tpu.memory_space<vmem>>, %arg3: memref<32x128xbf16, #tpu.memory_space<vmem>>, %arg4: memref<32x128xbf16, #tpu.memory_space<vmem>>, %arg5: memref<8x2x32xbf16, #tpu.memory_space<vmem>>, %arg6: memref<8x2x32xbf16, #tpu.memory_space<vmem>>, %arg7: memref<2x32xf32, #tpu.memory_space<vmem>>, %arg8: memref<2x32xf32, #tpu.memory_space<vmem>>, %arg9: memref<2x32xf32, #tpu.memory_space<vmem>>, %arg10: memref<2x32xf32, #tpu.memory_space<vmem>>) attributes {dimension_semantics = [#tpu.dimension_semantics<arbitrary>], iteration_bounds = array<i64: 1>, scalar_prefetch = 0 : i64, scratch_operands = 4 : i64, tpu.core_type = #tpu.core_type<tc>, window_params = [{transform_indices = @transform_0, window_bounds = array<i64: 8, 2, 128>}, {transform_indices = @transform_1, window_bounds = array<i64: 8, 2, 128>}, {pipeline_mode = #tpu.pipeline_mode<synchronous>, transform_indices = @transform_2, window_bounds = array<i64: 32, 128>}, {pipeline_mode = #tpu.pipeline_mode<synchronous>, transform_indices = @transform_3, window_bounds = array<i64: 32, 128>}, {transform_indices = @transform_4, window_bounds = array<i64: 8, 2, 32>}, {transform_indices = @transform_5, window_bounds = array<i64: 8, 2, 32>}]} {
    %c0_i32 = arith.constant 0 : i32
    %0 = arith.cmpi eq, %arg0, %c0_i32 : i32
    %1 = arith.extui %0 : i1 to i32
    %c0_i32_0 = arith.constant 0 : i32
    %2 = arith.cmpi ne, %1, %c0_i32_0 : i32
    scf.if %2 {
      %cst_268 = arith.constant 0.000000e+00 : f32
      %669 = vector.broadcast %cst_268 : f32 to vector<2x32xf32>
      %c0_269 = arith.constant 0 : index
      %c0_270 = arith.constant 0 : index
      %670 = vector.load %arg7[%c0_269, %c0_270] : memref<2x32xf32, #tpu.memory_space<vmem>>, vector<2x32xf32>
      tpu.vector_store %arg7[%c0_269, %c0_270], %669 {strides = array<i32>} : memref<2x32xf32, #tpu.memory_space<vmem>>, vector<2x32xf32>,
      %cst_271 = arith.constant 0.000000e+00 : f32
      %671 = vector.broadcast %cst_271 : f32 to vector<2x32xf32>
      %c0_272 = arith.constant 0 : index
      %c0_273 = arith.constant 0 : index
      %672 = vector.load %arg8[%c0_272, %c0_273] : memref<2x32xf32, #tpu.memory_space<vmem>>, vector<2x32xf32>
      tpu.vector_store %arg8[%c0_272, %c0_273], %671 {strides = array<i32>} : memref<2x32xf32, #tpu.memory_space<vmem>>, vector<2x32xf32>,
      %cst_274 = arith.constant 0.000000e+00 : f32
      %673 = vector.broadcast %cst_274 : f32 to vector<2x32xf32>
      %c0_275 = arith.constant 0 : index
      %c0_276 = arith.constant 0 : index
      %674 = vector.load %arg9[%c0_275, %c0_276] : memref<2x32xf32, #tpu.memory_space<vmem>>, vector<2x32xf32>
      tpu.vector_store %arg9[%c0_275, %c0_276], %673 {strides = array<i32>} : memref<2x32xf32, #tpu.memory_space<vmem>>, vector<2x32xf32>,
      %cst_277 = arith.constant 0.000000e+00 : f32
      %675 = vector.broadcast %cst_277 : f32 to vector<2x32xf32>
      %c0_278 = arith.constant 0 : index
      %c0_279 = arith.constant 0 : index
      %676 = vector.load %arg10[%c0_278, %c0_279] : memref<2x32xf32, #tpu.memory_space<vmem>>, vector<2x32xf32>
      tpu.vector_store %arg10[%c0_278, %c0_279], %675 {strides = array<i32>} : memref<2x32xf32, #tpu.memory_space<vmem>>, vector<2x32xf32>,
    } else {
    }
    %c0 = arith.constant 0 : index
    %c0_1 = arith.constant 0 : index
    %3 = vector.load %arg3[%c0, %c0_1] : memref<32x128xbf16, #tpu.memory_space<vmem>>, vector<32x128xbf16>
    %c0_2 = arith.constant 0 : index
    %c0_3 = arith.constant 0 : index
    %4 = vector.load %arg4[%c0_2, %c0_3] : memref<32x128xbf16, #tpu.memory_space<vmem>>, vector<32x128xbf16>
    %c0_i32_4 = arith.constant 0 : i32
    %5 = arith.index_cast %c0_i32_4 : i32 to index
    %c0_5 = arith.constant 0 : index
    %c0_6 = arith.constant 0 : index
    %6 = vector.load %arg1[%5, %c0_5, %c0_6] : memref<8x2x128xbf16, #tpu.memory_space<vmem>>, vector<1x2x128xbf16>
    %7 = vector.shape_cast %6 : vector<1x2x128xbf16> to vector<2x128xbf16>
    %8 = arith.extf %7 : vector<2x128xbf16> to vector<2x128xf32>
    %c0_7 = arith.constant 0 : index
    %c0_8 = arith.constant 0 : index
    %9 = vector.load %arg7[%c0_7, %c0_8] : memref<2x32xf32, #tpu.memory_space<vmem>>, vector<2x32xf32>
    %10 = arith.truncf %9 : vector<2x32xf32> to vector<2x32xbf16>
    %cst = arith.constant dense<0.000000e+00> : vector<2x128xf32>
    %11 = tpu.matmul %10, %3, %cst {dimension_numbers = #tpu.dot_dimension_numbers<[1], [0], [0], [1], [0, 0, 1, 1], [], []>} : vector<2x32xbf16>, vector<32x128xbf16>, vector<2x128xf32> -> vector<2x128xf32>
    %12 = arith.addf %8, %11 : vector<2x128xf32>
    %c0_9 = arith.constant 0 : index
    %c0_10 = arith.constant 0 : index
    %13 = vector.load %arg8[%c0_9, %c0_10] : memref<2x32xf32, #tpu.memory_space<vmem>>, vector<2x32xf32>
    %14 = vector.extract_strided_slice %12 {offsets = [0, 0], sizes = [2, 32], strides = [1, 1]} : vector<2x128xf32> to vector<2x32xf32>
    %15 = arith.negf %14 : vector<2x32xf32>
    %16 = math.exp %15 : vector<2x32xf32>
    %cst_11 = arith.constant 1.000000e+00 : f32
    %17 = vector.broadcast %cst_11 : f32 to vector<2x32xf32>
    %18 = arith.addf %17, %16 : vector<2x32xf32>
    %19 = arith.divf %17, %18 : vector<2x32xf32>
    %20 = vector.extract_strided_slice %12 {offsets = [0, 32], sizes = [2, 32], strides = [1, 1]} : vector<2x128xf32> to vector<2x32xf32>
    %21 = arith.negf %20 : vector<2x32xf32>
    %22 = math.exp %21 : vector<2x32xf32>
    %cst_12 = arith.constant 1.000000e+00 : f32
    %23 = vector.broadcast %cst_12 : f32 to vector<2x32xf32>
    %24 = arith.addf %23, %22 : vector<2x32xf32>
    %25 = arith.divf %23, %24 : vector<2x32xf32>
    %26 = vector.extract_strided_slice %12 {offsets = [0, 64], sizes = [2, 32], strides = [1, 1]} : vector<2x128xf32> to vector<2x32xf32>
    %27 = math.tanh %26 : vector<2x32xf32>
    %28 = vector.extract_strided_slice %12 {offsets = [0, 96], sizes = [2, 32], strides = [1, 1]} : vector<2x128xf32> to vector<2x32xf32>
    %29 = arith.negf %28 : vector<2x32xf32>
    %30 = math.exp %29 : vector<2x32xf32>
    %cst_13 = arith.constant 1.000000e+00 : f32
    %31 = vector.broadcast %cst_13 : f32 to vector<2x32xf32>
    %32 = arith.addf %31, %30 : vector<2x32xf32>
    %33 = arith.divf %31, %32 : vector<2x32xf32>
    %34 = arith.mulf %25, %13 : vector<2x32xf32>
    %35 = arith.mulf %19, %27 : vector<2x32xf32>
    %36 = arith.addf %34, %35 : vector<2x32xf32>
    %37 = math.tanh %36 : vector<2x32xf32>
    %38 = arith.mulf %33, %37 : vector<2x32xf32>
    %c0_14 = arith.constant 0 : index
    %c0_15 = arith.constant 0 : index
    %39 = vector.load %arg7[%c0_14, %c0_15] : memref<2x32xf32, #tpu.memory_space<vmem>>, vector<2x32xf32>
    tpu.vector_store %arg7[%c0_14, %c0_15], %38 {strides = array<i32>} : memref<2x32xf32, #tpu.memory_space<vmem>>, vector<2x32xf32>,
    %c0_16 = arith.constant 0 : index
    %c0_17 = arith.constant 0 : index
    %40 = vector.load %arg8[%c0_16, %c0_17] : memref<2x32xf32, #tpu.memory_space<vmem>>, vector<2x32xf32>
    tpu.vector_store %arg8[%c0_16, %c0_17], %36 {strides = array<i32>} : memref<2x32xf32, #tpu.memory_space<vmem>>, vector<2x32xf32>,
    %41 = arith.truncf %38 : vector<2x32xf32> to vector<2x32xbf16>
    %42 = arith.index_cast %c0_i32_4 : i32 to index
    %c0_18 = arith.constant 0 : index
    %c0_19 = arith.constant 0 : index
    %43 = vector.load %arg5[%42, %c0_18, %c0_19] : memref<8x2x32xbf16, #tpu.memory_space<vmem>>, vector<1x2x32xbf16>
    %44 = vector.shape_cast %43 : vector<1x2x32xbf16> to vector<2x32xbf16>
    %45 = vector.shape_cast %41 : vector<2x32xbf16> to vector<1x2x32xbf16>
    tpu.vector_store %arg5[%42, %c0_18, %c0_19], %45 {strides = array<i32>} : memref<8x2x32xbf16, #tpu.memory_space<vmem>>, vector<1x2x32xbf16>,
    %c7_i32 = arith.constant 7 : i32
    %46 = arith.subi %c7_i32, %c0_i32_4 : i32
    %47 = arith.index_cast %46 : i32 to index
    %c0_20 = arith.constant 0 : index
    %c0_21 = arith.constant 0 : index
    %48 = vector.load %arg2[%47, %c0_20, %c0_21] : memref<8x2x128xbf16, #tpu.memory_space<vmem>>, vector<1x2x128xbf16>
    %49 = vector.shape_cast %48 : vector<1x2x128xbf16> to vector<2x128xbf16>
    %50 = arith.extf %49 : vector<2x128xbf16> to vector<2x128xf32>
    %c0_22 = arith.constant 0 : index
    %c0_23 = arith.constant 0 : index
    %51 = vector.load %arg9[%c0_22, %c0_23] : memref<2x32xf32, #tpu.memory_space<vmem>>, vector<2x32xf32>
    %52 = arith.truncf %51 : vector<2x32xf32> to vector<2x32xbf16>
    %cst_24 = arith.constant dense<0.000000e+00> : vector<2x128xf32>
    %53 = tpu.matmul %52, %4, %cst_24 {dimension_numbers = #tpu.dot_dimension_numbers<[1], [0], [0], [1], [0, 0, 1, 1], [], []>} : vector<2x32xbf16>, vector<32x128xbf16>, vector<2x128xf32> -> vector<2x128xf32>
    %54 = arith.addf %50, %53 : vector<2x128xf32>
    %c0_25 = arith.constant 0 : index
    %c0_26 = arith.constant 0 : index
    %55 = vector.load %arg10[%c0_25, %c0_26] : memref<2x32xf32, #tpu.memory_space<vmem>>, vector<2x32xf32>
    %56 = vector.extract_strided_slice %54 {offsets = [0, 0], sizes = [2, 32], strides = [1, 1]} : vector<2x128xf32> to vector<2x32xf32>
    %57 = arith.negf %56 : vector<2x32xf32>
    %58 = math.exp %57 : vector<2x32xf32>
    %cst_27 = arith.constant 1.000000e+00 : f32
    %59 = vector.broadcast %cst_27 : f32 to vector<2x32xf32>
    %60 = arith.addf %59, %58 : vector<2x32xf32>
    %61 = arith.divf %59, %60 : vector<2x32xf32>
    %62 = vector.extract_strided_slice %54 {offsets = [0, 32], sizes = [2, 32], strides = [1, 1]} : vector<2x128xf32> to vector<2x32xf32>
    %63 = arith.negf %62 : vector<2x32xf32>
    %64 = math.exp %63 : vector<2x32xf32>
    %cst_28 = arith.constant 1.000000e+00 : f32
    %65 = vector.broadcast %cst_28 : f32 to vector<2x32xf32>
    %66 = arith.addf %65, %64 : vector<2x32xf32>
    %67 = arith.divf %65, %66 : vector<2x32xf32>
    %68 = vector.extract_strided_slice %54 {offsets = [0, 64], sizes = [2, 32], strides = [1, 1]} : vector<2x128xf32> to vector<2x32xf32>
    %69 = math.tanh %68 : vector<2x32xf32>
    %70 = vector.extract_strided_slice %54 {offsets = [0, 96], sizes = [2, 32], strides = [1, 1]} : vector<2x128xf32> to vector<2x32xf32>
    %71 = arith.negf %70 : vector<2x32xf32>
    %72 = math.exp %71 : vector<2x32xf32>
    %cst_29 = arith.constant 1.000000e+00 : f32
    %73 = vector.broadcast %cst_29 : f32 to vector<2x32xf32>
    %74 = arith.addf %73, %72 : vector<2x32xf32>
    %75 = arith.divf %73, %74 : vector<2x32xf32>
    %76 = arith.mulf %67, %55 : vector<2x32xf32>
    %77 = arith.mulf %61, %69 : vector<2x32xf32>
    %78 = arith.addf %76, %77 : vector<2x32xf32>
    %79 = math.tanh %78 : vector<2x32xf32>
    %80 = arith.mulf %75, %79 : vector<2x32xf32>
    %c0_30 = arith.constant 0 : index
    %c0_31 = arith.constant 0 : index
    %81 = vector.load %arg9[%c0_30, %c0_31] : memref<2x32xf32, #tpu.memory_space<vmem>>, vector<2x32xf32>
    tpu.vector_store %arg9[%c0_30, %c0_31], %80 {strides = array<i32>} : memref<2x32xf32, #tpu.memory_space<vmem>>, vector<2x32xf32>,
    %c0_32 = arith.constant 0 : index
    %c0_33 = arith.constant 0 : index
    %82 = vector.load %arg10[%c0_32, %c0_33] : memref<2x32xf32, #tpu.memory_space<vmem>>, vector<2x32xf32>
    tpu.vector_store %arg10[%c0_32, %c0_33], %78 {strides = array<i32>} : memref<2x32xf32, #tpu.memory_space<vmem>>, vector<2x32xf32>,
    %83 = arith.truncf %80 : vector<2x32xf32> to vector<2x32xbf16>
    %84 = arith.index_cast %46 : i32 to index
    %c0_34 = arith.constant 0 : index
    %c0_35 = arith.constant 0 : index
    %85 = vector.load %arg6[%84, %c0_34, %c0_35] : memref<8x2x32xbf16, #tpu.memory_space<vmem>>, vector<1x2x32xbf16>
    %86 = vector.shape_cast %85 : vector<1x2x32xbf16> to vector<2x32xbf16>
    %87 = vector.shape_cast %83 : vector<2x32xbf16> to vector<1x2x32xbf16>
    tpu.vector_store %arg6[%84, %c0_34, %c0_35], %87 {strides = array<i32>} : memref<8x2x32xbf16, #tpu.memory_space<vmem>>, vector<1x2x32xbf16>,
    %c1_i32 = arith.constant 1 : i32
    %88 = arith.index_cast %c1_i32 : i32 to index
    %c0_36 = arith.constant 0 : index
    %c0_37 = arith.constant 0 : index
    %89 = vector.load %arg1[%88, %c0_36, %c0_37] : memref<8x2x128xbf16, #tpu.memory_space<vmem>>, vector<1x2x128xbf16>
    %90 = vector.shape_cast %89 : vector<1x2x128xbf16> to vector<2x128xbf16>
    %91 = arith.extf %90 : vector<2x128xbf16> to vector<2x128xf32>
    %c0_38 = arith.constant 0 : index
    %c0_39 = arith.constant 0 : index
    %92 = vector.load %arg7[%c0_38, %c0_39] : memref<2x32xf32, #tpu.memory_space<vmem>>, vector<2x32xf32>
    %93 = arith.truncf %92 : vector<2x32xf32> to vector<2x32xbf16>
    %cst_40 = arith.constant dense<0.000000e+00> : vector<2x128xf32>
    %94 = tpu.matmul %93, %3, %cst_40 {dimension_numbers = #tpu.dot_dimension_numbers<[1], [0], [0], [1], [0, 0, 1, 1], [], []>} : vector<2x32xbf16>, vector<32x128xbf16>, vector<2x128xf32> -> vector<2x128xf32>
    %95 = arith.addf %91, %94 : vector<2x128xf32>
    %c0_41 = arith.constant 0 : index
    %c0_42 = arith.constant 0 : index
    %96 = vector.load %arg8[%c0_41, %c0_42] : memref<2x32xf32, #tpu.memory_space<vmem>>, vector<2x32xf32>
    %97 = vector.extract_strided_slice %95 {offsets = [0, 0], sizes = [2, 32], strides = [1, 1]} : vector<2x128xf32> to vector<2x32xf32>
    %98 = arith.negf %97 : vector<2x32xf32>
    %99 = math.exp %98 : vector<2x32xf32>
    %cst_43 = arith.constant 1.000000e+00 : f32
    %100 = vector.broadcast %cst_43 : f32 to vector<2x32xf32>
    %101 = arith.addf %100, %99 : vector<2x32xf32>
    %102 = arith.divf %100, %101 : vector<2x32xf32>
    %103 = vector.extract_strided_slice %95 {offsets = [0, 32], sizes = [2, 32], strides = [1, 1]} : vector<2x128xf32> to vector<2x32xf32>
    %104 = arith.negf %103 : vector<2x32xf32>
    %105 = math.exp %104 : vector<2x32xf32>
    %cst_44 = arith.constant 1.000000e+00 : f32
    %106 = vector.broadcast %cst_44 : f32 to vector<2x32xf32>
    %107 = arith.addf %106, %105 : vector<2x32xf32>
    %108 = arith.divf %106, %107 : vector<2x32xf32>
    %109 = vector.extract_strided_slice %95 {offsets = [0, 64], sizes = [2, 32], strides = [1, 1]} : vector<2x128xf32> to vector<2x32xf32>
    %110 = math.tanh %109 : vector<2x32xf32>
    %111 = vector.extract_strided_slice %95 {offsets = [0, 96], sizes = [2, 32], strides = [1, 1]} : vector<2x128xf32> to vector<2x32xf32>
    %112 = arith.negf %111 : vector<2x32xf32>
    %113 = math.exp %112 : vector<2x32xf32>
    %cst_45 = arith.constant 1.000000e+00 : f32
    %114 = vector.broadcast %cst_45 : f32 to vector<2x32xf32>
    %115 = arith.addf %114, %113 : vector<2x32xf32>
    %116 = arith.divf %114, %115 : vector<2x32xf32>
    %117 = arith.mulf %108, %96 : vector<2x32xf32>
    %118 = arith.mulf %102, %110 : vector<2x32xf32>
    %119 = arith.addf %117, %118 : vector<2x32xf32>
    %120 = math.tanh %119 : vector<2x32xf32>
    %121 = arith.mulf %116, %120 : vector<2x32xf32>
    %c0_46 = arith.constant 0 : index
    %c0_47 = arith.constant 0 : index
    %122 = vector.load %arg7[%c0_46, %c0_47] : memref<2x32xf32, #tpu.memory_space<vmem>>, vector<2x32xf32>
    tpu.vector_store %arg7[%c0_46, %c0_47], %121 {strides = array<i32>} : memref<2x32xf32, #tpu.memory_space<vmem>>, vector<2x32xf32>,
    %c0_48 = arith.constant 0 : index
    %c0_49 = arith.constant 0 : index
    %123 = vector.load %arg8[%c0_48, %c0_49] : memref<2x32xf32, #tpu.memory_space<vmem>>, vector<2x32xf32>
    tpu.vector_store %arg8[%c0_48, %c0_49], %119 {strides = array<i32>} : memref<2x32xf32, #tpu.memory_space<vmem>>, vector<2x32xf32>,
    %124 = arith.truncf %121 : vector<2x32xf32> to vector<2x32xbf16>
    %125 = arith.index_cast %c1_i32 : i32 to index
    %c0_50 = arith.constant 0 : index
    %c0_51 = arith.constant 0 : index
    %126 = vector.load %arg5[%125, %c0_50, %c0_51] : memref<8x2x32xbf16, #tpu.memory_space<vmem>>, vector<1x2x32xbf16>
    %127 = vector.shape_cast %126 : vector<1x2x32xbf16> to vector<2x32xbf16>
    %128 = vector.shape_cast %124 : vector<2x32xbf16> to vector<1x2x32xbf16>
    tpu.vector_store %arg5[%125, %c0_50, %c0_51], %128 {strides = array<i32>} : memref<8x2x32xbf16, #tpu.memory_space<vmem>>, vector<1x2x32xbf16>,
    %c7_i32_52 = arith.constant 7 : i32
    %129 = arith.subi %c7_i32_52, %c1_i32 : i32
    %130 = arith.index_cast %129 : i32 to index
    %c0_53 = arith.constant 0 : index
    %c0_54 = arith.constant 0 : index
    %131 = vector.load %arg2[%130, %c0_53, %c0_54] : memref<8x2x128xbf16, #tpu.memory_space<vmem>>, vector<1x2x128xbf16>
    %132 = vector.shape_cast %131 : vector<1x2x128xbf16> to vector<2x128xbf16>
    %133 = arith.extf %132 : vector<2x128xbf16> to vector<2x128xf32>
    %c0_55 = arith.constant 0 : index
    %c0_56 = arith.constant 0 : index
    %134 = vector.load %arg9[%c0_55, %c0_56] : memref<2x32xf32, #tpu.memory_space<vmem>>, vector<2x32xf32>
    %135 = arith.truncf %134 : vector<2x32xf32> to vector<2x32xbf16>
    %cst_57 = arith.constant dense<0.000000e+00> : vector<2x128xf32>
    %136 = tpu.matmul %135, %4, %cst_57 {dimension_numbers = #tpu.dot_dimension_numbers<[1], [0], [0], [1], [0, 0, 1, 1], [], []>} : vector<2x32xbf16>, vector<32x128xbf16>, vector<2x128xf32> -> vector<2x128xf32>
    %137 = arith.addf %133, %136 : vector<2x128xf32>
    %c0_58 = arith.constant 0 : index
    %c0_59 = arith.constant 0 : index
    %138 = vector.load %arg10[%c0_58, %c0_59] : memref<2x32xf32, #tpu.memory_space<vmem>>, vector<2x32xf32>
    %139 = vector.extract_strided_slice %137 {offsets = [0, 0], sizes = [2, 32], strides = [1, 1]} : vector<2x128xf32> to vector<2x32xf32>
    %140 = arith.negf %139 : vector<2x32xf32>
    %141 = math.exp %140 : vector<2x32xf32>
    %cst_60 = arith.constant 1.000000e+00 : f32
    %142 = vector.broadcast %cst_60 : f32 to vector<2x32xf32>
    %143 = arith.addf %142, %141 : vector<2x32xf32>
    %144 = arith.divf %142, %143 : vector<2x32xf32>
    %145 = vector.extract_strided_slice %137 {offsets = [0, 32], sizes = [2, 32], strides = [1, 1]} : vector<2x128xf32> to vector<2x32xf32>
    %146 = arith.negf %145 : vector<2x32xf32>
    %147 = math.exp %146 : vector<2x32xf32>
    %cst_61 = arith.constant 1.000000e+00 : f32
    %148 = vector.broadcast %cst_61 : f32 to vector<2x32xf32>
    %149 = arith.addf %148, %147 : vector<2x32xf32>
    %150 = arith.divf %148, %149 : vector<2x32xf32>
    %151 = vector.extract_strided_slice %137 {offsets = [0, 64], sizes = [2, 32], strides = [1, 1]} : vector<2x128xf32> to vector<2x32xf32>
    %152 = math.tanh %151 : vector<2x32xf32>
    %153 = vector.extract_strided_slice %137 {offsets = [0, 96], sizes = [2, 32], strides = [1, 1]} : vector<2x128xf32> to vector<2x32xf32>
    %154 = arith.negf %153 : vector<2x32xf32>
    %155 = math.exp %154 : vector<2x32xf32>
    %cst_62 = arith.constant 1.000000e+00 : f32
    %156 = vector.broadcast %cst_62 : f32 to vector<2x32xf32>
    %157 = arith.addf %156, %155 : vector<2x32xf32>
    %158 = arith.divf %156, %157 : vector<2x32xf32>
    %159 = arith.mulf %150, %138 : vector<2x32xf32>
    %160 = arith.mulf %144, %152 : vector<2x32xf32>
    %161 = arith.addf %159, %160 : vector<2x32xf32>
    %162 = math.tanh %161 : vector<2x32xf32>
    %163 = arith.mulf %158, %162 : vector<2x32xf32>
    %c0_63 = arith.constant 0 : index
    %c0_64 = arith.constant 0 : index
    %164 = vector.load %arg9[%c0_63, %c0_64] : memref<2x32xf32, #tpu.memory_space<vmem>>, vector<2x32xf32>
    tpu.vector_store %arg9[%c0_63, %c0_64], %163 {strides = array<i32>} : memref<2x32xf32, #tpu.memory_space<vmem>>, vector<2x32xf32>,
    %c0_65 = arith.constant 0 : index
    %c0_66 = arith.constant 0 : index
    %165 = vector.load %arg10[%c0_65, %c0_66] : memref<2x32xf32, #tpu.memory_space<vmem>>, vector<2x32xf32>
    tpu.vector_store %arg10[%c0_65, %c0_66], %161 {strides = array<i32>} : memref<2x32xf32, #tpu.memory_space<vmem>>, vector<2x32xf32>,
    %166 = arith.truncf %163 : vector<2x32xf32> to vector<2x32xbf16>
    %167 = arith.index_cast %129 : i32 to index
    %c0_67 = arith.constant 0 : index
    %c0_68 = arith.constant 0 : index
    %168 = vector.load %arg6[%167, %c0_67, %c0_68] : memref<8x2x32xbf16, #tpu.memory_space<vmem>>, vector<1x2x32xbf16>
    %169 = vector.shape_cast %168 : vector<1x2x32xbf16> to vector<2x32xbf16>
    %170 = vector.shape_cast %166 : vector<2x32xbf16> to vector<1x2x32xbf16>
    tpu.vector_store %arg6[%167, %c0_67, %c0_68], %170 {strides = array<i32>} : memref<8x2x32xbf16, #tpu.memory_space<vmem>>, vector<1x2x32xbf16>,
    %c2_i32 = arith.constant 2 : i32
    %171 = arith.index_cast %c2_i32 : i32 to index
    %c0_69 = arith.constant 0 : index
    %c0_70 = arith.constant 0 : index
    %172 = vector.load %arg1[%171, %c0_69, %c0_70] : memref<8x2x128xbf16, #tpu.memory_space<vmem>>, vector<1x2x128xbf16>
    %173 = vector.shape_cast %172 : vector<1x2x128xbf16> to vector<2x128xbf16>
    %174 = arith.extf %173 : vector<2x128xbf16> to vector<2x128xf32>
    %c0_71 = arith.constant 0 : index
    %c0_72 = arith.constant 0 : index
    %175 = vector.load %arg7[%c0_71, %c0_72] : memref<2x32xf32, #tpu.memory_space<vmem>>, vector<2x32xf32>
    %176 = arith.truncf %175 : vector<2x32xf32> to vector<2x32xbf16>
    %cst_73 = arith.constant dense<0.000000e+00> : vector<2x128xf32>
    %177 = tpu.matmul %176, %3, %cst_73 {dimension_numbers = #tpu.dot_dimension_numbers<[1], [0], [0], [1], [0, 0, 1, 1], [], []>} : vector<2x32xbf16>, vector<32x128xbf16>, vector<2x128xf32> -> vector<2x128xf32>
    %178 = arith.addf %174, %177 : vector<2x128xf32>
    %c0_74 = arith.constant 0 : index
    %c0_75 = arith.constant 0 : index
    %179 = vector.load %arg8[%c0_74, %c0_75] : memref<2x32xf32, #tpu.memory_space<vmem>>, vector<2x32xf32>
    %180 = vector.extract_strided_slice %178 {offsets = [0, 0], sizes = [2, 32], strides = [1, 1]} : vector<2x128xf32> to vector<2x32xf32>
    %181 = arith.negf %180 : vector<2x32xf32>
    %182 = math.exp %181 : vector<2x32xf32>
    %cst_76 = arith.constant 1.000000e+00 : f32
    %183 = vector.broadcast %cst_76 : f32 to vector<2x32xf32>
    %184 = arith.addf %183, %182 : vector<2x32xf32>
    %185 = arith.divf %183, %184 : vector<2x32xf32>
    %186 = vector.extract_strided_slice %178 {offsets = [0, 32], sizes = [2, 32], strides = [1, 1]} : vector<2x128xf32> to vector<2x32xf32>
    %187 = arith.negf %186 : vector<2x32xf32>
    %188 = math.exp %187 : vector<2x32xf32>
    %cst_77 = arith.constant 1.000000e+00 : f32
    %189 = vector.broadcast %cst_77 : f32 to vector<2x32xf32>
    %190 = arith.addf %189, %188 : vector<2x32xf32>
    %191 = arith.divf %189, %190 : vector<2x32xf32>
    %192 = vector.extract_strided_slice %178 {offsets = [0, 64], sizes = [2, 32], strides = [1, 1]} : vector<2x128xf32> to vector<2x32xf32>
    %193 = math.tanh %192 : vector<2x32xf32>
    %194 = vector.extract_strided_slice %178 {offsets = [0, 96], sizes = [2, 32], strides = [1, 1]} : vector<2x128xf32> to vector<2x32xf32>
    %195 = arith.negf %194 : vector<2x32xf32>
    %196 = math.exp %195 : vector<2x32xf32>
    %cst_78 = arith.constant 1.000000e+00 : f32
    %197 = vector.broadcast %cst_78 : f32 to vector<2x32xf32>
    %198 = arith.addf %197, %196 : vector<2x32xf32>
    %199 = arith.divf %197, %198 : vector<2x32xf32>
    %200 = arith.mulf %191, %179 : vector<2x32xf32>
    %201 = arith.mulf %185, %193 : vector<2x32xf32>
    %202 = arith.addf %200, %201 : vector<2x32xf32>
    %203 = math.tanh %202 : vector<2x32xf32>
    %204 = arith.mulf %199, %203 : vector<2x32xf32>
    %c0_79 = arith.constant 0 : index
    %c0_80 = arith.constant 0 : index
    %205 = vector.load %arg7[%c0_79, %c0_80] : memref<2x32xf32, #tpu.memory_space<vmem>>, vector<2x32xf32>
    tpu.vector_store %arg7[%c0_79, %c0_80], %204 {strides = array<i32>} : memref<2x32xf32, #tpu.memory_space<vmem>>, vector<2x32xf32>,
    %c0_81 = arith.constant 0 : index
    %c0_82 = arith.constant 0 : index
    %206 = vector.load %arg8[%c0_81, %c0_82] : memref<2x32xf32, #tpu.memory_space<vmem>>, vector<2x32xf32>
    tpu.vector_store %arg8[%c0_81, %c0_82], %202 {strides = array<i32>} : memref<2x32xf32, #tpu.memory_space<vmem>>, vector<2x32xf32>,
    %207 = arith.truncf %204 : vector<2x32xf32> to vector<2x32xbf16>
    %208 = arith.index_cast %c2_i32 : i32 to index
    %c0_83 = arith.constant 0 : index
    %c0_84 = arith.constant 0 : index
    %209 = vector.load %arg5[%208, %c0_83, %c0_84] : memref<8x2x32xbf16, #tpu.memory_space<vmem>>, vector<1x2x32xbf16>
    %210 = vector.shape_cast %209 : vector<1x2x32xbf16> to vector<2x32xbf16>
    %211 = vector.shape_cast %207 : vector<2x32xbf16> to vector<1x2x32xbf16>
    tpu.vector_store %arg5[%208, %c0_83, %c0_84], %211 {strides = array<i32>} : memref<8x2x32xbf16, #tpu.memory_space<vmem>>, vector<1x2x32xbf16>,
    %c7_i32_85 = arith.constant 7 : i32
    %212 = arith.subi %c7_i32_85, %c2_i32 : i32
    %213 = arith.index_cast %212 : i32 to index
    %c0_86 = arith.constant 0 : index
    %c0_87 = arith.constant 0 : index
    %214 = vector.load %arg2[%213, %c0_86, %c0_87] : memref<8x2x128xbf16, #tpu.memory_space<vmem>>, vector<1x2x128xbf16>
    %215 = vector.shape_cast %214 : vector<1x2x128xbf16> to vector<2x128xbf16>
    %216 = arith.extf %215 : vector<2x128xbf16> to vector<2x128xf32>
    %c0_88 = arith.constant 0 : index
    %c0_89 = arith.constant 0 : index
    %217 = vector.load %arg9[%c0_88, %c0_89] : memref<2x32xf32, #tpu.memory_space<vmem>>, vector<2x32xf32>
    %218 = arith.truncf %217 : vector<2x32xf32> to vector<2x32xbf16>
    %cst_90 = arith.constant dense<0.000000e+00> : vector<2x128xf32>
    %219 = tpu.matmul %218, %4, %cst_90 {dimension_numbers = #tpu.dot_dimension_numbers<[1], [0], [0], [1], [0, 0, 1, 1], [], []>} : vector<2x32xbf16>, vector<32x128xbf16>, vector<2x128xf32> -> vector<2x128xf32>
    %220 = arith.addf %216, %219 : vector<2x128xf32>
    %c0_91 = arith.constant 0 : index
    %c0_92 = arith.constant 0 : index
    %221 = vector.load %arg10[%c0_91, %c0_92] : memref<2x32xf32, #tpu.memory_space<vmem>>, vector<2x32xf32>
    %222 = vector.extract_strided_slice %220 {offsets = [0, 0], sizes = [2, 32], strides = [1, 1]} : vector<2x128xf32> to vector<2x32xf32>
    %223 = arith.negf %222 : vector<2x32xf32>
    %224 = math.exp %223 : vector<2x32xf32>
    %cst_93 = arith.constant 1.000000e+00 : f32
    %225 = vector.broadcast %cst_93 : f32 to vector<2x32xf32>
    %226 = arith.addf %225, %224 : vector<2x32xf32>
    %227 = arith.divf %225, %226 : vector<2x32xf32>
    %228 = vector.extract_strided_slice %220 {offsets = [0, 32], sizes = [2, 32], strides = [1, 1]} : vector<2x128xf32> to vector<2x32xf32>
    %229 = arith.negf %228 : vector<2x32xf32>
    %230 = math.exp %229 : vector<2x32xf32>
    %cst_94 = arith.constant 1.000000e+00 : f32
    %231 = vector.broadcast %cst_94 : f32 to vector<2x32xf32>
    %232 = arith.addf %231, %230 : vector<2x32xf32>
    %233 = arith.divf %231, %232 : vector<2x32xf32>
    %234 = vector.extract_strided_slice %220 {offsets = [0, 64], sizes = [2, 32], strides = [1, 1]} : vector<2x128xf32> to vector<2x32xf32>
    %235 = math.tanh %234 : vector<2x32xf32>
    %236 = vector.extract_strided_slice %220 {offsets = [0, 96], sizes = [2, 32], strides = [1, 1]} : vector<2x128xf32> to vector<2x32xf32>
    %237 = arith.negf %236 : vector<2x32xf32>
    %238 = math.exp %237 : vector<2x32xf32>
    %cst_95 = arith.constant 1.000000e+00 : f32
    %239 = vector.broadcast %cst_95 : f32 to vector<2x32xf32>
    %240 = arith.addf %239, %238 : vector<2x32xf32>
    %241 = arith.divf %239, %240 : vector<2x32xf32>
    %242 = arith.mulf %233, %221 : vector<2x32xf32>
    %243 = arith.mulf %227, %235 : vector<2x32xf32>
    %244 = arith.addf %242, %243 : vector<2x32xf32>
    %245 = math.tanh %244 : vector<2x32xf32>
    %246 = arith.mulf %241, %245 : vector<2x32xf32>
    %c0_96 = arith.constant 0 : index
    %c0_97 = arith.constant 0 : index
    %247 = vector.load %arg9[%c0_96, %c0_97] : memref<2x32xf32, #tpu.memory_space<vmem>>, vector<2x32xf32>
    tpu.vector_store %arg9[%c0_96, %c0_97], %246 {strides = array<i32>} : memref<2x32xf32, #tpu.memory_space<vmem>>, vector<2x32xf32>,
    %c0_98 = arith.constant 0 : index
    %c0_99 = arith.constant 0 : index
    %248 = vector.load %arg10[%c0_98, %c0_99] : memref<2x32xf32, #tpu.memory_space<vmem>>, vector<2x32xf32>
    tpu.vector_store %arg10[%c0_98, %c0_99], %244 {strides = array<i32>} : memref<2x32xf32, #tpu.memory_space<vmem>>, vector<2x32xf32>,
    %249 = arith.truncf %246 : vector<2x32xf32> to vector<2x32xbf16>
    %250 = arith.index_cast %212 : i32 to index
    %c0_100 = arith.constant 0 : index
    %c0_101 = arith.constant 0 : index
    %251 = vector.load %arg6[%250, %c0_100, %c0_101] : memref<8x2x32xbf16, #tpu.memory_space<vmem>>, vector<1x2x32xbf16>
    %252 = vector.shape_cast %251 : vector<1x2x32xbf16> to vector<2x32xbf16>
    %253 = vector.shape_cast %249 : vector<2x32xbf16> to vector<1x2x32xbf16>
    tpu.vector_store %arg6[%250, %c0_100, %c0_101], %253 {strides = array<i32>} : memref<8x2x32xbf16, #tpu.memory_space<vmem>>, vector<1x2x32xbf16>,
    %c3_i32 = arith.constant 3 : i32
    %254 = arith.index_cast %c3_i32 : i32 to index
    %c0_102 = arith.constant 0 : index
    %c0_103 = arith.constant 0 : index
    %255 = vector.load %arg1[%254, %c0_102, %c0_103] : memref<8x2x128xbf16, #tpu.memory_space<vmem>>, vector<1x2x128xbf16>
    %256 = vector.shape_cast %255 : vector<1x2x128xbf16> to vector<2x128xbf16>
    %257 = arith.extf %256 : vector<2x128xbf16> to vector<2x128xf32>
    %c0_104 = arith.constant 0 : index
    %c0_105 = arith.constant 0 : index
    %258 = vector.load %arg7[%c0_104, %c0_105] : memref<2x32xf32, #tpu.memory_space<vmem>>, vector<2x32xf32>
    %259 = arith.truncf %258 : vector<2x32xf32> to vector<2x32xbf16>
    %cst_106 = arith.constant dense<0.000000e+00> : vector<2x128xf32>
    %260 = tpu.matmul %259, %3, %cst_106 {dimension_numbers = #tpu.dot_dimension_numbers<[1], [0], [0], [1], [0, 0, 1, 1], [], []>} : vector<2x32xbf16>, vector<32x128xbf16>, vector<2x128xf32> -> vector<2x128xf32>
    %261 = arith.addf %257, %260 : vector<2x128xf32>
    %c0_107 = arith.constant 0 : index
    %c0_108 = arith.constant 0 : index
    %262 = vector.load %arg8[%c0_107, %c0_108] : memref<2x32xf32, #tpu.memory_space<vmem>>, vector<2x32xf32>
    %263 = vector.extract_strided_slice %261 {offsets = [0, 0], sizes = [2, 32], strides = [1, 1]} : vector<2x128xf32> to vector<2x32xf32>
    %264 = arith.negf %263 : vector<2x32xf32>
    %265 = math.exp %264 : vector<2x32xf32>
    %cst_109 = arith.constant 1.000000e+00 : f32
    %266 = vector.broadcast %cst_109 : f32 to vector<2x32xf32>
    %267 = arith.addf %266, %265 : vector<2x32xf32>
    %268 = arith.divf %266, %267 : vector<2x32xf32>
    %269 = vector.extract_strided_slice %261 {offsets = [0, 32], sizes = [2, 32], strides = [1, 1]} : vector<2x128xf32> to vector<2x32xf32>
    %270 = arith.negf %269 : vector<2x32xf32>
    %271 = math.exp %270 : vector<2x32xf32>
    %cst_110 = arith.constant 1.000000e+00 : f32
    %272 = vector.broadcast %cst_110 : f32 to vector<2x32xf32>
    %273 = arith.addf %272, %271 : vector<2x32xf32>
    %274 = arith.divf %272, %273 : vector<2x32xf32>
    %275 = vector.extract_strided_slice %261 {offsets = [0, 64], sizes = [2, 32], strides = [1, 1]} : vector<2x128xf32> to vector<2x32xf32>
    %276 = math.tanh %275 : vector<2x32xf32>
    %277 = vector.extract_strided_slice %261 {offsets = [0, 96], sizes = [2, 32], strides = [1, 1]} : vector<2x128xf32> to vector<2x32xf32>
    %278 = arith.negf %277 : vector<2x32xf32>
    %279 = math.exp %278 : vector<2x32xf32>
    %cst_111 = arith.constant 1.000000e+00 : f32
    %280 = vector.broadcast %cst_111 : f32 to vector<2x32xf32>
    %281 = arith.addf %280, %279 : vector<2x32xf32>
    %282 = arith.divf %280, %281 : vector<2x32xf32>
    %283 = arith.mulf %274, %262 : vector<2x32xf32>
    %284 = arith.mulf %268, %276 : vector<2x32xf32>
    %285 = arith.addf %283, %284 : vector<2x32xf32>
    %286 = math.tanh %285 : vector<2x32xf32>
    %287 = arith.mulf %282, %286 : vector<2x32xf32>
    %c0_112 = arith.constant 0 : index
    %c0_113 = arith.constant 0 : index
    %288 = vector.load %arg7[%c0_112, %c0_113] : memref<2x32xf32, #tpu.memory_space<vmem>>, vector<2x32xf32>
    tpu.vector_store %arg7[%c0_112, %c0_113], %287 {strides = array<i32>} : memref<2x32xf32, #tpu.memory_space<vmem>>, vector<2x32xf32>,
    %c0_114 = arith.constant 0 : index
    %c0_115 = arith.constant 0 : index
    %289 = vector.load %arg8[%c0_114, %c0_115] : memref<2x32xf32, #tpu.memory_space<vmem>>, vector<2x32xf32>
    tpu.vector_store %arg8[%c0_114, %c0_115], %285 {strides = array<i32>} : memref<2x32xf32, #tpu.memory_space<vmem>>, vector<2x32xf32>,
    %290 = arith.truncf %287 : vector<2x32xf32> to vector<2x32xbf16>
    %291 = arith.index_cast %c3_i32 : i32 to index
    %c0_116 = arith.constant 0 : index
    %c0_117 = arith.constant 0 : index
    %292 = vector.load %arg5[%291, %c0_116, %c0_117] : memref<8x2x32xbf16, #tpu.memory_space<vmem>>, vector<1x2x32xbf16>
    %293 = vector.shape_cast %292 : vector<1x2x32xbf16> to vector<2x32xbf16>
    %294 = vector.shape_cast %290 : vector<2x32xbf16> to vector<1x2x32xbf16>
    tpu.vector_store %arg5[%291, %c0_116, %c0_117], %294 {strides = array<i32>} : memref<8x2x32xbf16, #tpu.memory_space<vmem>>, vector<1x2x32xbf16>,
    %c7_i32_118 = arith.constant 7 : i32
    %295 = arith.subi %c7_i32_118, %c3_i32 : i32
    %296 = arith.index_cast %295 : i32 to index
    %c0_119 = arith.constant 0 : index
    %c0_120 = arith.constant 0 : index
    %297 = vector.load %arg2[%296, %c0_119, %c0_120] : memref<8x2x128xbf16, #tpu.memory_space<vmem>>, vector<1x2x128xbf16>
    %298 = vector.shape_cast %297 : vector<1x2x128xbf16> to vector<2x128xbf16>
    %299 = arith.extf %298 : vector<2x128xbf16> to vector<2x128xf32>
    %c0_121 = arith.constant 0 : index
    %c0_122 = arith.constant 0 : index
    %300 = vector.load %arg9[%c0_121, %c0_122] : memref<2x32xf32, #tpu.memory_space<vmem>>, vector<2x32xf32>
    %301 = arith.truncf %300 : vector<2x32xf32> to vector<2x32xbf16>
    %cst_123 = arith.constant dense<0.000000e+00> : vector<2x128xf32>
    %302 = tpu.matmul %301, %4, %cst_123 {dimension_numbers = #tpu.dot_dimension_numbers<[1], [0], [0], [1], [0, 0, 1, 1], [], []>} : vector<2x32xbf16>, vector<32x128xbf16>, vector<2x128xf32> -> vector<2x128xf32>
    %303 = arith.addf %299, %302 : vector<2x128xf32>
    %c0_124 = arith.constant 0 : index
    %c0_125 = arith.constant 0 : index
    %304 = vector.load %arg10[%c0_124, %c0_125] : memref<2x32xf32, #tpu.memory_space<vmem>>, vector<2x32xf32>
    %305 = vector.extract_strided_slice %303 {offsets = [0, 0], sizes = [2, 32], strides = [1, 1]} : vector<2x128xf32> to vector<2x32xf32>
    %306 = arith.negf %305 : vector<2x32xf32>
    %307 = math.exp %306 : vector<2x32xf32>
    %cst_126 = arith.constant 1.000000e+00 : f32
    %308 = vector.broadcast %cst_126 : f32 to vector<2x32xf32>
    %309 = arith.addf %308, %307 : vector<2x32xf32>
    %310 = arith.divf %308, %309 : vector<2x32xf32>
    %311 = vector.extract_strided_slice %303 {offsets = [0, 32], sizes = [2, 32], strides = [1, 1]} : vector<2x128xf32> to vector<2x32xf32>
    %312 = arith.negf %311 : vector<2x32xf32>
    %313 = math.exp %312 : vector<2x32xf32>
    %cst_127 = arith.constant 1.000000e+00 : f32
    %314 = vector.broadcast %cst_127 : f32 to vector<2x32xf32>
    %315 = arith.addf %314, %313 : vector<2x32xf32>
    %316 = arith.divf %314, %315 : vector<2x32xf32>
    %317 = vector.extract_strided_slice %303 {offsets = [0, 64], sizes = [2, 32], strides = [1, 1]} : vector<2x128xf32> to vector<2x32xf32>
    %318 = math.tanh %317 : vector<2x32xf32>
    %319 = vector.extract_strided_slice %303 {offsets = [0, 96], sizes = [2, 32], strides = [1, 1]} : vector<2x128xf32> to vector<2x32xf32>
    %320 = arith.negf %319 : vector<2x32xf32>
    %321 = math.exp %320 : vector<2x32xf32>
    %cst_128 = arith.constant 1.000000e+00 : f32
    %322 = vector.broadcast %cst_128 : f32 to vector<2x32xf32>
    %323 = arith.addf %322, %321 : vector<2x32xf32>
    %324 = arith.divf %322, %323 : vector<2x32xf32>
    %325 = arith.mulf %316, %304 : vector<2x32xf32>
    %326 = arith.mulf %310, %318 : vector<2x32xf32>
    %327 = arith.addf %325, %326 : vector<2x32xf32>
    %328 = math.tanh %327 : vector<2x32xf32>
    %329 = arith.mulf %324, %328 : vector<2x32xf32>
    %c0_129 = arith.constant 0 : index
    %c0_130 = arith.constant 0 : index
    %330 = vector.load %arg9[%c0_129, %c0_130] : memref<2x32xf32, #tpu.memory_space<vmem>>, vector<2x32xf32>
    tpu.vector_store %arg9[%c0_129, %c0_130], %329 {strides = array<i32>} : memref<2x32xf32, #tpu.memory_space<vmem>>, vector<2x32xf32>,
    %c0_131 = arith.constant 0 : index
    %c0_132 = arith.constant 0 : index
    %331 = vector.load %arg10[%c0_131, %c0_132] : memref<2x32xf32, #tpu.memory_space<vmem>>, vector<2x32xf32>
    tpu.vector_store %arg10[%c0_131, %c0_132], %327 {strides = array<i32>} : memref<2x32xf32, #tpu.memory_space<vmem>>, vector<2x32xf32>,
    %332 = arith.truncf %329 : vector<2x32xf32> to vector<2x32xbf16>
    %333 = arith.index_cast %295 : i32 to index
    %c0_133 = arith.constant 0 : index
    %c0_134 = arith.constant 0 : index
    %334 = vector.load %arg6[%333, %c0_133, %c0_134] : memref<8x2x32xbf16, #tpu.memory_space<vmem>>, vector<1x2x32xbf16>
    %335 = vector.shape_cast %334 : vector<1x2x32xbf16> to vector<2x32xbf16>
    %336 = vector.shape_cast %332 : vector<2x32xbf16> to vector<1x2x32xbf16>
    tpu.vector_store %arg6[%333, %c0_133, %c0_134], %336 {strides = array<i32>} : memref<8x2x32xbf16, #tpu.memory_space<vmem>>, vector<1x2x32xbf16>,
    %c4_i32 = arith.constant 4 : i32
    %337 = arith.index_cast %c4_i32 : i32 to index
    %c0_135 = arith.constant 0 : index
    %c0_136 = arith.constant 0 : index
    %338 = vector.load %arg1[%337, %c0_135, %c0_136] : memref<8x2x128xbf16, #tpu.memory_space<vmem>>, vector<1x2x128xbf16>
    %339 = vector.shape_cast %338 : vector<1x2x128xbf16> to vector<2x128xbf16>
    %340 = arith.extf %339 : vector<2x128xbf16> to vector<2x128xf32>
    %c0_137 = arith.constant 0 : index
    %c0_138 = arith.constant 0 : index
    %341 = vector.load %arg7[%c0_137, %c0_138] : memref<2x32xf32, #tpu.memory_space<vmem>>, vector<2x32xf32>
    %342 = arith.truncf %341 : vector<2x32xf32> to vector<2x32xbf16>
    %cst_139 = arith.constant dense<0.000000e+00> : vector<2x128xf32>
    %343 = tpu.matmul %342, %3, %cst_139 {dimension_numbers = #tpu.dot_dimension_numbers<[1], [0], [0], [1], [0, 0, 1, 1], [], []>} : vector<2x32xbf16>, vector<32x128xbf16>, vector<2x128xf32> -> vector<2x128xf32>
    %344 = arith.addf %340, %343 : vector<2x128xf32>
    %c0_140 = arith.constant 0 : index
    %c0_141 = arith.constant 0 : index
    %345 = vector.load %arg8[%c0_140, %c0_141] : memref<2x32xf32, #tpu.memory_space<vmem>>, vector<2x32xf32>
    %346 = vector.extract_strided_slice %344 {offsets = [0, 0], sizes = [2, 32], strides = [1, 1]} : vector<2x128xf32> to vector<2x32xf32>
    %347 = arith.negf %346 : vector<2x32xf32>
    %348 = math.exp %347 : vector<2x32xf32>
    %cst_142 = arith.constant 1.000000e+00 : f32
    %349 = vector.broadcast %cst_142 : f32 to vector<2x32xf32>
    %350 = arith.addf %349, %348 : vector<2x32xf32>
    %351 = arith.divf %349, %350 : vector<2x32xf32>
    %352 = vector.extract_strided_slice %344 {offsets = [0, 32], sizes = [2, 32], strides = [1, 1]} : vector<2x128xf32> to vector<2x32xf32>
    %353 = arith.negf %352 : vector<2x32xf32>
    %354 = math.exp %353 : vector<2x32xf32>
    %cst_143 = arith.constant 1.000000e+00 : f32
    %355 = vector.broadcast %cst_143 : f32 to vector<2x32xf32>
    %356 = arith.addf %355, %354 : vector<2x32xf32>
    %357 = arith.divf %355, %356 : vector<2x32xf32>
    %358 = vector.extract_strided_slice %344 {offsets = [0, 64], sizes = [2, 32], strides = [1, 1]} : vector<2x128xf32> to vector<2x32xf32>
    %359 = math.tanh %358 : vector<2x32xf32>
    %360 = vector.extract_strided_slice %344 {offsets = [0, 96], sizes = [2, 32], strides = [1, 1]} : vector<2x128xf32> to vector<2x32xf32>
    %361 = arith.negf %360 : vector<2x32xf32>
    %362 = math.exp %361 : vector<2x32xf32>
    %cst_144 = arith.constant 1.000000e+00 : f32
    %363 = vector.broadcast %cst_144 : f32 to vector<2x32xf32>
    %364 = arith.addf %363, %362 : vector<2x32xf32>
    %365 = arith.divf %363, %364 : vector<2x32xf32>
    %366 = arith.mulf %357, %345 : vector<2x32xf32>
    %367 = arith.mulf %351, %359 : vector<2x32xf32>
    %368 = arith.addf %366, %367 : vector<2x32xf32>
    %369 = math.tanh %368 : vector<2x32xf32>
    %370 = arith.mulf %365, %369 : vector<2x32xf32>
    %c0_145 = arith.constant 0 : index
    %c0_146 = arith.constant 0 : index
    %371 = vector.load %arg7[%c0_145, %c0_146] : memref<2x32xf32, #tpu.memory_space<vmem>>, vector<2x32xf32>
    tpu.vector_store %arg7[%c0_145, %c0_146], %370 {strides = array<i32>} : memref<2x32xf32, #tpu.memory_space<vmem>>, vector<2x32xf32>,
    %c0_147 = arith.constant 0 : index
    %c0_148 = arith.constant 0 : index
    %372 = vector.load %arg8[%c0_147, %c0_148] : memref<2x32xf32, #tpu.memory_space<vmem>>, vector<2x32xf32>
    tpu.vector_store %arg8[%c0_147, %c0_148], %368 {strides = array<i32>} : memref<2x32xf32, #tpu.memory_space<vmem>>, vector<2x32xf32>,
    %373 = arith.truncf %370 : vector<2x32xf32> to vector<2x32xbf16>
    %374 = arith.index_cast %c4_i32 : i32 to index
    %c0_149 = arith.constant 0 : index
    %c0_150 = arith.constant 0 : index
    %375 = vector.load %arg5[%374, %c0_149, %c0_150] : memref<8x2x32xbf16, #tpu.memory_space<vmem>>, vector<1x2x32xbf16>
    %376 = vector.shape_cast %375 : vector<1x2x32xbf16> to vector<2x32xbf16>
    %377 = vector.shape_cast %373 : vector<2x32xbf16> to vector<1x2x32xbf16>
    tpu.vector_store %arg5[%374, %c0_149, %c0_150], %377 {strides = array<i32>} : memref<8x2x32xbf16, #tpu.memory_space<vmem>>, vector<1x2x32xbf16>,
    %c7_i32_151 = arith.constant 7 : i32
    %378 = arith.subi %c7_i32_151, %c4_i32 : i32
    %379 = arith.index_cast %378 : i32 to index
    %c0_152 = arith.constant 0 : index
    %c0_153 = arith.constant 0 : index
    %380 = vector.load %arg2[%379, %c0_152, %c0_153] : memref<8x2x128xbf16, #tpu.memory_space<vmem>>, vector<1x2x128xbf16>
    %381 = vector.shape_cast %380 : vector<1x2x128xbf16> to vector<2x128xbf16>
    %382 = arith.extf %381 : vector<2x128xbf16> to vector<2x128xf32>
    %c0_154 = arith.constant 0 : index
    %c0_155 = arith.constant 0 : index
    %383 = vector.load %arg9[%c0_154, %c0_155] : memref<2x32xf32, #tpu.memory_space<vmem>>, vector<2x32xf32>
    %384 = arith.truncf %383 : vector<2x32xf32> to vector<2x32xbf16>
    %cst_156 = arith.constant dense<0.000000e+00> : vector<2x128xf32>
    %385 = tpu.matmul %384, %4, %cst_156 {dimension_numbers = #tpu.dot_dimension_numbers<[1], [0], [0], [1], [0, 0, 1, 1], [], []>} : vector<2x32xbf16>, vector<32x128xbf16>, vector<2x128xf32> -> vector<2x128xf32>
    %386 = arith.addf %382, %385 : vector<2x128xf32>
    %c0_157 = arith.constant 0 : index
    %c0_158 = arith.constant 0 : index
    %387 = vector.load %arg10[%c0_157, %c0_158] : memref<2x32xf32, #tpu.memory_space<vmem>>, vector<2x32xf32>
    %388 = vector.extract_strided_slice %386 {offsets = [0, 0], sizes = [2, 32], strides = [1, 1]} : vector<2x128xf32> to vector<2x32xf32>
    %389 = arith.negf %388 : vector<2x32xf32>
    %390 = math.exp %389 : vector<2x32xf32>
    %cst_159 = arith.constant 1.000000e+00 : f32
    %391 = vector.broadcast %cst_159 : f32 to vector<2x32xf32>
    %392 = arith.addf %391, %390 : vector<2x32xf32>
    %393 = arith.divf %391, %392 : vector<2x32xf32>
    %394 = vector.extract_strided_slice %386 {offsets = [0, 32], sizes = [2, 32], strides = [1, 1]} : vector<2x128xf32> to vector<2x32xf32>
    %395 = arith.negf %394 : vector<2x32xf32>
    %396 = math.exp %395 : vector<2x32xf32>
    %cst_160 = arith.constant 1.000000e+00 : f32
    %397 = vector.broadcast %cst_160 : f32 to vector<2x32xf32>
    %398 = arith.addf %397, %396 : vector<2x32xf32>
    %399 = arith.divf %397, %398 : vector<2x32xf32>
    %400 = vector.extract_strided_slice %386 {offsets = [0, 64], sizes = [2, 32], strides = [1, 1]} : vector<2x128xf32> to vector<2x32xf32>
    %401 = math.tanh %400 : vector<2x32xf32>
    %402 = vector.extract_strided_slice %386 {offsets = [0, 96], sizes = [2, 32], strides = [1, 1]} : vector<2x128xf32> to vector<2x32xf32>
    %403 = arith.negf %402 : vector<2x32xf32>
    %404 = math.exp %403 : vector<2x32xf32>
    %cst_161 = arith.constant 1.000000e+00 : f32
    %405 = vector.broadcast %cst_161 : f32 to vector<2x32xf32>
    %406 = arith.addf %405, %404 : vector<2x32xf32>
    %407 = arith.divf %405, %406 : vector<2x32xf32>
    %408 = arith.mulf %399, %387 : vector<2x32xf32>
    %409 = arith.mulf %393, %401 : vector<2x32xf32>
    %410 = arith.addf %408, %409 : vector<2x32xf32>
    %411 = math.tanh %410 : vector<2x32xf32>
    %412 = arith.mulf %407, %411 : vector<2x32xf32>
    %c0_162 = arith.constant 0 : index
    %c0_163 = arith.constant 0 : index
    %413 = vector.load %arg9[%c0_162, %c0_163] : memref<2x32xf32, #tpu.memory_space<vmem>>, vector<2x32xf32>
    tpu.vector_store %arg9[%c0_162, %c0_163], %412 {strides = array<i32>} : memref<2x32xf32, #tpu.memory_space<vmem>>, vector<2x32xf32>,
    %c0_164 = arith.constant 0 : index
    %c0_165 = arith.constant 0 : index
    %414 = vector.load %arg10[%c0_164, %c0_165] : memref<2x32xf32, #tpu.memory_space<vmem>>, vector<2x32xf32>
    tpu.vector_store %arg10[%c0_164, %c0_165], %410 {strides = array<i32>} : memref<2x32xf32, #tpu.memory_space<vmem>>, vector<2x32xf32>,
    %415 = arith.truncf %412 : vector<2x32xf32> to vector<2x32xbf16>
    %416 = arith.index_cast %378 : i32 to index
    %c0_166 = arith.constant 0 : index
    %c0_167 = arith.constant 0 : index
    %417 = vector.load %arg6[%416, %c0_166, %c0_167] : memref<8x2x32xbf16, #tpu.memory_space<vmem>>, vector<1x2x32xbf16>
    %418 = vector.shape_cast %417 : vector<1x2x32xbf16> to vector<2x32xbf16>
    %419 = vector.shape_cast %415 : vector<2x32xbf16> to vector<1x2x32xbf16>
    tpu.vector_store %arg6[%416, %c0_166, %c0_167], %419 {strides = array<i32>} : memref<8x2x32xbf16, #tpu.memory_space<vmem>>, vector<1x2x32xbf16>,
    %c5_i32 = arith.constant 5 : i32
    %420 = arith.index_cast %c5_i32 : i32 to index
    %c0_168 = arith.constant 0 : index
    %c0_169 = arith.constant 0 : index
    %421 = vector.load %arg1[%420, %c0_168, %c0_169] : memref<8x2x128xbf16, #tpu.memory_space<vmem>>, vector<1x2x128xbf16>
    %422 = vector.shape_cast %421 : vector<1x2x128xbf16> to vector<2x128xbf16>
    %423 = arith.extf %422 : vector<2x128xbf16> to vector<2x128xf32>
    %c0_170 = arith.constant 0 : index
    %c0_171 = arith.constant 0 : index
    %424 = vector.load %arg7[%c0_170, %c0_171] : memref<2x32xf32, #tpu.memory_space<vmem>>, vector<2x32xf32>
    %425 = arith.truncf %424 : vector<2x32xf32> to vector<2x32xbf16>
    %cst_172 = arith.constant dense<0.000000e+00> : vector<2x128xf32>
    %426 = tpu.matmul %425, %3, %cst_172 {dimension_numbers = #tpu.dot_dimension_numbers<[1], [0], [0], [1], [0, 0, 1, 1], [], []>} : vector<2x32xbf16>, vector<32x128xbf16>, vector<2x128xf32> -> vector<2x128xf32>
    %427 = arith.addf %423, %426 : vector<2x128xf32>
    %c0_173 = arith.constant 0 : index
    %c0_174 = arith.constant 0 : index
    %428 = vector.load %arg8[%c0_173, %c0_174] : memref<2x32xf32, #tpu.memory_space<vmem>>, vector<2x32xf32>
    %429 = vector.extract_strided_slice %427 {offsets = [0, 0], sizes = [2, 32], strides = [1, 1]} : vector<2x128xf32> to vector<2x32xf32>
    %430 = arith.negf %429 : vector<2x32xf32>
    %431 = math.exp %430 : vector<2x32xf32>
    %cst_175 = arith.constant 1.000000e+00 : f32
    %432 = vector.broadcast %cst_175 : f32 to vector<2x32xf32>
    %433 = arith.addf %432, %431 : vector<2x32xf32>
    %434 = arith.divf %432, %433 : vector<2x32xf32>
    %435 = vector.extract_strided_slice %427 {offsets = [0, 32], sizes = [2, 32], strides = [1, 1]} : vector<2x128xf32> to vector<2x32xf32>
    %436 = arith.negf %435 : vector<2x32xf32>
    %437 = math.exp %436 : vector<2x32xf32>
    %cst_176 = arith.constant 1.000000e+00 : f32
    %438 = vector.broadcast %cst_176 : f32 to vector<2x32xf32>
    %439 = arith.addf %438, %437 : vector<2x32xf32>
    %440 = arith.divf %438, %439 : vector<2x32xf32>
    %441 = vector.extract_strided_slice %427 {offsets = [0, 64], sizes = [2, 32], strides = [1, 1]} : vector<2x128xf32> to vector<2x32xf32>
    %442 = math.tanh %441 : vector<2x32xf32>
    %443 = vector.extract_strided_slice %427 {offsets = [0, 96], sizes = [2, 32], strides = [1, 1]} : vector<2x128xf32> to vector<2x32xf32>
    %444 = arith.negf %443 : vector<2x32xf32>
    %445 = math.exp %444 : vector<2x32xf32>
    %cst_177 = arith.constant 1.000000e+00 : f32
    %446 = vector.broadcast %cst_177 : f32 to vector<2x32xf32>
    %447 = arith.addf %446, %445 : vector<2x32xf32>
    %448 = arith.divf %446, %447 : vector<2x32xf32>
    %449 = arith.mulf %440, %428 : vector<2x32xf32>
    %450 = arith.mulf %434, %442 : vector<2x32xf32>
    %451 = arith.addf %449, %450 : vector<2x32xf32>
    %452 = math.tanh %451 : vector<2x32xf32>
    %453 = arith.mulf %448, %452 : vector<2x32xf32>
    %c0_178 = arith.constant 0 : index
    %c0_179 = arith.constant 0 : index
    %454 = vector.load %arg7[%c0_178, %c0_179] : memref<2x32xf32, #tpu.memory_space<vmem>>, vector<2x32xf32>
    tpu.vector_store %arg7[%c0_178, %c0_179], %453 {strides = array<i32>} : memref<2x32xf32, #tpu.memory_space<vmem>>, vector<2x32xf32>,
    %c0_180 = arith.constant 0 : index
    %c0_181 = arith.constant 0 : index
    %455 = vector.load %arg8[%c0_180, %c0_181] : memref<2x32xf32, #tpu.memory_space<vmem>>, vector<2x32xf32>
    tpu.vector_store %arg8[%c0_180, %c0_181], %451 {strides = array<i32>} : memref<2x32xf32, #tpu.memory_space<vmem>>, vector<2x32xf32>,
    %456 = arith.truncf %453 : vector<2x32xf32> to vector<2x32xbf16>
    %457 = arith.index_cast %c5_i32 : i32 to index
    %c0_182 = arith.constant 0 : index
    %c0_183 = arith.constant 0 : index
    %458 = vector.load %arg5[%457, %c0_182, %c0_183] : memref<8x2x32xbf16, #tpu.memory_space<vmem>>, vector<1x2x32xbf16>
    %459 = vector.shape_cast %458 : vector<1x2x32xbf16> to vector<2x32xbf16>
    %460 = vector.shape_cast %456 : vector<2x32xbf16> to vector<1x2x32xbf16>
    tpu.vector_store %arg5[%457, %c0_182, %c0_183], %460 {strides = array<i32>} : memref<8x2x32xbf16, #tpu.memory_space<vmem>>, vector<1x2x32xbf16>,
    %c7_i32_184 = arith.constant 7 : i32
    %461 = arith.subi %c7_i32_184, %c5_i32 : i32
    %462 = arith.index_cast %461 : i32 to index
    %c0_185 = arith.constant 0 : index
    %c0_186 = arith.constant 0 : index
    %463 = vector.load %arg2[%462, %c0_185, %c0_186] : memref<8x2x128xbf16, #tpu.memory_space<vmem>>, vector<1x2x128xbf16>
    %464 = vector.shape_cast %463 : vector<1x2x128xbf16> to vector<2x128xbf16>
    %465 = arith.extf %464 : vector<2x128xbf16> to vector<2x128xf32>
    %c0_187 = arith.constant 0 : index
    %c0_188 = arith.constant 0 : index
    %466 = vector.load %arg9[%c0_187, %c0_188] : memref<2x32xf32, #tpu.memory_space<vmem>>, vector<2x32xf32>
    %467 = arith.truncf %466 : vector<2x32xf32> to vector<2x32xbf16>
    %cst_189 = arith.constant dense<0.000000e+00> : vector<2x128xf32>
    %468 = tpu.matmul %467, %4, %cst_189 {dimension_numbers = #tpu.dot_dimension_numbers<[1], [0], [0], [1], [0, 0, 1, 1], [], []>} : vector<2x32xbf16>, vector<32x128xbf16>, vector<2x128xf32> -> vector<2x128xf32>
    %469 = arith.addf %465, %468 : vector<2x128xf32>
    %c0_190 = arith.constant 0 : index
    %c0_191 = arith.constant 0 : index
    %470 = vector.load %arg10[%c0_190, %c0_191] : memref<2x32xf32, #tpu.memory_space<vmem>>, vector<2x32xf32>
    %471 = vector.extract_strided_slice %469 {offsets = [0, 0], sizes = [2, 32], strides = [1, 1]} : vector<2x128xf32> to vector<2x32xf32>
    %472 = arith.negf %471 : vector<2x32xf32>
    %473 = math.exp %472 : vector<2x32xf32>
    %cst_192 = arith.constant 1.000000e+00 : f32
    %474 = vector.broadcast %cst_192 : f32 to vector<2x32xf32>
    %475 = arith.addf %474, %473 : vector<2x32xf32>
    %476 = arith.divf %474, %475 : vector<2x32xf32>
    %477 = vector.extract_strided_slice %469 {offsets = [0, 32], sizes = [2, 32], strides = [1, 1]} : vector<2x128xf32> to vector<2x32xf32>
    %478 = arith.negf %477 : vector<2x32xf32>
    %479 = math.exp %478 : vector<2x32xf32>
    %cst_193 = arith.constant 1.000000e+00 : f32
    %480 = vector.broadcast %cst_193 : f32 to vector<2x32xf32>
    %481 = arith.addf %480, %479 : vector<2x32xf32>
    %482 = arith.divf %480, %481 : vector<2x32xf32>
    %483 = vector.extract_strided_slice %469 {offsets = [0, 64], sizes = [2, 32], strides = [1, 1]} : vector<2x128xf32> to vector<2x32xf32>
    %484 = math.tanh %483 : vector<2x32xf32>
    %485 = vector.extract_strided_slice %469 {offsets = [0, 96], sizes = [2, 32], strides = [1, 1]} : vector<2x128xf32> to vector<2x32xf32>
    %486 = arith.negf %485 : vector<2x32xf32>
    %487 = math.exp %486 : vector<2x32xf32>
    %cst_194 = arith.constant 1.000000e+00 : f32
    %488 = vector.broadcast %cst_194 : f32 to vector<2x32xf32>
    %489 = arith.addf %488, %487 : vector<2x32xf32>
    %490 = arith.divf %488, %489 : vector<2x32xf32>
    %491 = arith.mulf %482, %470 : vector<2x32xf32>
    %492 = arith.mulf %476, %484 : vector<2x32xf32>
    %493 = arith.addf %491, %492 : vector<2x32xf32>
    %494 = math.tanh %493 : vector<2x32xf32>
    %495 = arith.mulf %490, %494 : vector<2x32xf32>
    %c0_195 = arith.constant 0 : index
    %c0_196 = arith.constant 0 : index
    %496 = vector.load %arg9[%c0_195, %c0_196] : memref<2x32xf32, #tpu.memory_space<vmem>>, vector<2x32xf32>
    tpu.vector_store %arg9[%c0_195, %c0_196], %495 {strides = array<i32>} : memref<2x32xf32, #tpu.memory_space<vmem>>, vector<2x32xf32>,
    %c0_197 = arith.constant 0 : index
    %c0_198 = arith.constant 0 : index
    %497 = vector.load %arg10[%c0_197, %c0_198] : memref<2x32xf32, #tpu.memory_space<vmem>>, vector<2x32xf32>
    tpu.vector_store %arg10[%c0_197, %c0_198], %493 {strides = array<i32>} : memref<2x32xf32, #tpu.memory_space<vmem>>, vector<2x32xf32>,
    %498 = arith.truncf %495 : vector<2x32xf32> to vector<2x32xbf16>
    %499 = arith.index_cast %461 : i32 to index
    %c0_199 = arith.constant 0 : index
    %c0_200 = arith.constant 0 : index
    %500 = vector.load %arg6[%499, %c0_199, %c0_200] : memref<8x2x32xbf16, #tpu.memory_space<vmem>>, vector<1x2x32xbf16>
    %501 = vector.shape_cast %500 : vector<1x2x32xbf16> to vector<2x32xbf16>
    %502 = vector.shape_cast %498 : vector<2x32xbf16> to vector<1x2x32xbf16>
    tpu.vector_store %arg6[%499, %c0_199, %c0_200], %502 {strides = array<i32>} : memref<8x2x32xbf16, #tpu.memory_space<vmem>>, vector<1x2x32xbf16>,
    %c6_i32 = arith.constant 6 : i32
    %503 = arith.index_cast %c6_i32 : i32 to index
    %c0_201 = arith.constant 0 : index
    %c0_202 = arith.constant 0 : index
    %504 = vector.load %arg1[%503, %c0_201, %c0_202] : memref<8x2x128xbf16, #tpu.memory_space<vmem>>, vector<1x2x128xbf16>
    %505 = vector.shape_cast %504 : vector<1x2x128xbf16> to vector<2x128xbf16>
    %506 = arith.extf %505 : vector<2x128xbf16> to vector<2x128xf32>
    %c0_203 = arith.constant 0 : index
    %c0_204 = arith.constant 0 : index
    %507 = vector.load %arg7[%c0_203, %c0_204] : memref<2x32xf32, #tpu.memory_space<vmem>>, vector<2x32xf32>
    %508 = arith.truncf %507 : vector<2x32xf32> to vector<2x32xbf16>
    %cst_205 = arith.constant dense<0.000000e+00> : vector<2x128xf32>
    %509 = tpu.matmul %508, %3, %cst_205 {dimension_numbers = #tpu.dot_dimension_numbers<[1], [0], [0], [1], [0, 0, 1, 1], [], []>} : vector<2x32xbf16>, vector<32x128xbf16>, vector<2x128xf32> -> vector<2x128xf32>
    %510 = arith.addf %506, %509 : vector<2x128xf32>
    %c0_206 = arith.constant 0 : index
    %c0_207 = arith.constant 0 : index
    %511 = vector.load %arg8[%c0_206, %c0_207] : memref<2x32xf32, #tpu.memory_space<vmem>>, vector<2x32xf32>
    %512 = vector.extract_strided_slice %510 {offsets = [0, 0], sizes = [2, 32], strides = [1, 1]} : vector<2x128xf32> to vector<2x32xf32>
    %513 = arith.negf %512 : vector<2x32xf32>
    %514 = math.exp %513 : vector<2x32xf32>
    %cst_208 = arith.constant 1.000000e+00 : f32
    %515 = vector.broadcast %cst_208 : f32 to vector<2x32xf32>
    %516 = arith.addf %515, %514 : vector<2x32xf32>
    %517 = arith.divf %515, %516 : vector<2x32xf32>
    %518 = vector.extract_strided_slice %510 {offsets = [0, 32], sizes = [2, 32], strides = [1, 1]} : vector<2x128xf32> to vector<2x32xf32>
    %519 = arith.negf %518 : vector<2x32xf32>
    %520 = math.exp %519 : vector<2x32xf32>
    %cst_209 = arith.constant 1.000000e+00 : f32
    %521 = vector.broadcast %cst_209 : f32 to vector<2x32xf32>
    %522 = arith.addf %521, %520 : vector<2x32xf32>
    %523 = arith.divf %521, %522 : vector<2x32xf32>
    %524 = vector.extract_strided_slice %510 {offsets = [0, 64], sizes = [2, 32], strides = [1, 1]} : vector<2x128xf32> to vector<2x32xf32>
    %525 = math.tanh %524 : vector<2x32xf32>
    %526 = vector.extract_strided_slice %510 {offsets = [0, 96], sizes = [2, 32], strides = [1, 1]} : vector<2x128xf32> to vector<2x32xf32>
    %527 = arith.negf %526 : vector<2x32xf32>
    %528 = math.exp %527 : vector<2x32xf32>
    %cst_210 = arith.constant 1.000000e+00 : f32
    %529 = vector.broadcast %cst_210 : f32 to vector<2x32xf32>
    %530 = arith.addf %529, %528 : vector<2x32xf32>
    %531 = arith.divf %529, %530 : vector<2x32xf32>
    %532 = arith.mulf %523, %511 : vector<2x32xf32>
    %533 = arith.mulf %517, %525 : vector<2x32xf32>
    %534 = arith.addf %532, %533 : vector<2x32xf32>
    %535 = math.tanh %534 : vector<2x32xf32>
    %536 = arith.mulf %531, %535 : vector<2x32xf32>
    %c0_211 = arith.constant 0 : index
    %c0_212 = arith.constant 0 : index
    %537 = vector.load %arg7[%c0_211, %c0_212] : memref<2x32xf32, #tpu.memory_space<vmem>>, vector<2x32xf32>
    tpu.vector_store %arg7[%c0_211, %c0_212], %536 {strides = array<i32>} : memref<2x32xf32, #tpu.memory_space<vmem>>, vector<2x32xf32>,
    %c0_213 = arith.constant 0 : index
    %c0_214 = arith.constant 0 : index
    %538 = vector.load %arg8[%c0_213, %c0_214] : memref<2x32xf32, #tpu.memory_space<vmem>>, vector<2x32xf32>
    tpu.vector_store %arg8[%c0_213, %c0_214], %534 {strides = array<i32>} : memref<2x32xf32, #tpu.memory_space<vmem>>, vector<2x32xf32>,
    %539 = arith.truncf %536 : vector<2x32xf32> to vector<2x32xbf16>
    %540 = arith.index_cast %c6_i32 : i32 to index
    %c0_215 = arith.constant 0 : index
    %c0_216 = arith.constant 0 : index
    %541 = vector.load %arg5[%540, %c0_215, %c0_216] : memref<8x2x32xbf16, #tpu.memory_space<vmem>>, vector<1x2x32xbf16>
    %542 = vector.shape_cast %541 : vector<1x2x32xbf16> to vector<2x32xbf16>
    %543 = vector.shape_cast %539 : vector<2x32xbf16> to vector<1x2x32xbf16>
    tpu.vector_store %arg5[%540, %c0_215, %c0_216], %543 {strides = array<i32>} : memref<8x2x32xbf16, #tpu.memory_space<vmem>>, vector<1x2x32xbf16>,
    %c7_i32_217 = arith.constant 7 : i32
    %544 = arith.subi %c7_i32_217, %c6_i32 : i32
    %545 = arith.index_cast %544 : i32 to index
    %c0_218 = arith.constant 0 : index
    %c0_219 = arith.constant 0 : index
    %546 = vector.load %arg2[%545, %c0_218, %c0_219] : memref<8x2x128xbf16, #tpu.memory_space<vmem>>, vector<1x2x128xbf16>
    %547 = vector.shape_cast %546 : vector<1x2x128xbf16> to vector<2x128xbf16>
    %548 = arith.extf %547 : vector<2x128xbf16> to vector<2x128xf32>
    %c0_220 = arith.constant 0 : index
    %c0_221 = arith.constant 0 : index
    %549 = vector.load %arg9[%c0_220, %c0_221] : memref<2x32xf32, #tpu.memory_space<vmem>>, vector<2x32xf32>
    %550 = arith.truncf %549 : vector<2x32xf32> to vector<2x32xbf16>
    %cst_222 = arith.constant dense<0.000000e+00> : vector<2x128xf32>
    %551 = tpu.matmul %550, %4, %cst_222 {dimension_numbers = #tpu.dot_dimension_numbers<[1], [0], [0], [1], [0, 0, 1, 1], [], []>} : vector<2x32xbf16>, vector<32x128xbf16>, vector<2x128xf32> -> vector<2x128xf32>
    %552 = arith.addf %548, %551 : vector<2x128xf32>
    %c0_223 = arith.constant 0 : index
    %c0_224 = arith.constant 0 : index
    %553 = vector.load %arg10[%c0_223, %c0_224] : memref<2x32xf32, #tpu.memory_space<vmem>>, vector<2x32xf32>
    %554 = vector.extract_strided_slice %552 {offsets = [0, 0], sizes = [2, 32], strides = [1, 1]} : vector<2x128xf32> to vector<2x32xf32>
    %555 = arith.negf %554 : vector<2x32xf32>
    %556 = math.exp %555 : vector<2x32xf32>
    %cst_225 = arith.constant 1.000000e+00 : f32
    %557 = vector.broadcast %cst_225 : f32 to vector<2x32xf32>
    %558 = arith.addf %557, %556 : vector<2x32xf32>
    %559 = arith.divf %557, %558 : vector<2x32xf32>
    %560 = vector.extract_strided_slice %552 {offsets = [0, 32], sizes = [2, 32], strides = [1, 1]} : vector<2x128xf32> to vector<2x32xf32>
    %561 = arith.negf %560 : vector<2x32xf32>
    %562 = math.exp %561 : vector<2x32xf32>
    %cst_226 = arith.constant 1.000000e+00 : f32
    %563 = vector.broadcast %cst_226 : f32 to vector<2x32xf32>
    %564 = arith.addf %563, %562 : vector<2x32xf32>
    %565 = arith.divf %563, %564 : vector<2x32xf32>
    %566 = vector.extract_strided_slice %552 {offsets = [0, 64], sizes = [2, 32], strides = [1, 1]} : vector<2x128xf32> to vector<2x32xf32>
    %567 = math.tanh %566 : vector<2x32xf32>
    %568 = vector.extract_strided_slice %552 {offsets = [0, 96], sizes = [2, 32], strides = [1, 1]} : vector<2x128xf32> to vector<2x32xf32>
    %569 = arith.negf %568 : vector<2x32xf32>
    %570 = math.exp %569 : vector<2x32xf32>
    %cst_227 = arith.constant 1.000000e+00 : f32
    %571 = vector.broadcast %cst_227 : f32 to vector<2x32xf32>
    %572 = arith.addf %571, %570 : vector<2x32xf32>
    %573 = arith.divf %571, %572 : vector<2x32xf32>
    %574 = arith.mulf %565, %553 : vector<2x32xf32>
    %575 = arith.mulf %559, %567 : vector<2x32xf32>
    %576 = arith.addf %574, %575 : vector<2x32xf32>
    %577 = math.tanh %576 : vector<2x32xf32>
    %578 = arith.mulf %573, %577 : vector<2x32xf32>
    %c0_228 = arith.constant 0 : index
    %c0_229 = arith.constant 0 : index
    %579 = vector.load %arg9[%c0_228, %c0_229] : memref<2x32xf32, #tpu.memory_space<vmem>>, vector<2x32xf32>
    tpu.vector_store %arg9[%c0_228, %c0_229], %578 {strides = array<i32>} : memref<2x32xf32, #tpu.memory_space<vmem>>, vector<2x32xf32>,
    %c0_230 = arith.constant 0 : index
    %c0_231 = arith.constant 0 : index
    %580 = vector.load %arg10[%c0_230, %c0_231] : memref<2x32xf32, #tpu.memory_space<vmem>>, vector<2x32xf32>
    tpu.vector_store %arg10[%c0_230, %c0_231], %576 {strides = array<i32>} : memref<2x32xf32, #tpu.memory_space<vmem>>, vector<2x32xf32>,
    %581 = arith.truncf %578 : vector<2x32xf32> to vector<2x32xbf16>
    %582 = arith.index_cast %544 : i32 to index
    %c0_232 = arith.constant 0 : index
    %c0_233 = arith.constant 0 : index
    %583 = vector.load %arg6[%582, %c0_232, %c0_233] : memref<8x2x32xbf16, #tpu.memory_space<vmem>>, vector<1x2x32xbf16>
    %584 = vector.shape_cast %583 : vector<1x2x32xbf16> to vector<2x32xbf16>
    %585 = vector.shape_cast %581 : vector<2x32xbf16> to vector<1x2x32xbf16>
    tpu.vector_store %arg6[%582, %c0_232, %c0_233], %585 {strides = array<i32>} : memref<8x2x32xbf16, #tpu.memory_space<vmem>>, vector<1x2x32xbf16>,
    %c7_i32_234 = arith.constant 7 : i32
    %586 = arith.index_cast %c7_i32_234 : i32 to index
    %c0_235 = arith.constant 0 : index
    %c0_236 = arith.constant 0 : index
    %587 = vector.load %arg1[%586, %c0_235, %c0_236] : memref<8x2x128xbf16, #tpu.memory_space<vmem>>, vector<1x2x128xbf16>
    %588 = vector.shape_cast %587 : vector<1x2x128xbf16> to vector<2x128xbf16>
    %589 = arith.extf %588 : vector<2x128xbf16> to vector<2x128xf32>
    %c0_237 = arith.constant 0 : index
    %c0_238 = arith.constant 0 : index
    %590 = vector.load %arg7[%c0_237, %c0_238] : memref<2x32xf32, #tpu.memory_space<vmem>>, vector<2x32xf32>
    %591 = arith.truncf %590 : vector<2x32xf32> to vector<2x32xbf16>
    %cst_239 = arith.constant dense<0.000000e+00> : vector<2x128xf32>
    %592 = tpu.matmul %591, %3, %cst_239 {dimension_numbers = #tpu.dot_dimension_numbers<[1], [0], [0], [1], [0, 0, 1, 1], [], []>} : vector<2x32xbf16>, vector<32x128xbf16>, vector<2x128xf32> -> vector<2x128xf32>
    %593 = arith.addf %589, %592 : vector<2x128xf32>
    %c0_240 = arith.constant 0 : index
    %c0_241 = arith.constant 0 : index
    %594 = vector.load %arg8[%c0_240, %c0_241] : memref<2x32xf32, #tpu.memory_space<vmem>>, vector<2x32xf32>
    %595 = vector.extract_strided_slice %593 {offsets = [0, 0], sizes = [2, 32], strides = [1, 1]} : vector<2x128xf32> to vector<2x32xf32>
    %596 = arith.negf %595 : vector<2x32xf32>
    %597 = math.exp %596 : vector<2x32xf32>
    %cst_242 = arith.constant 1.000000e+00 : f32
    %598 = vector.broadcast %cst_242 : f32 to vector<2x32xf32>
    %599 = arith.addf %598, %597 : vector<2x32xf32>
    %600 = arith.divf %598, %599 : vector<2x32xf32>
    %601 = vector.extract_strided_slice %593 {offsets = [0, 32], sizes = [2, 32], strides = [1, 1]} : vector<2x128xf32> to vector<2x32xf32>
    %602 = arith.negf %601 : vector<2x32xf32>
    %603 = math.exp %602 : vector<2x32xf32>
    %cst_243 = arith.constant 1.000000e+00 : f32
    %604 = vector.broadcast %cst_243 : f32 to vector<2x32xf32>
    %605 = arith.addf %604, %603 : vector<2x32xf32>
    %606 = arith.divf %604, %605 : vector<2x32xf32>
    %607 = vector.extract_strided_slice %593 {offsets = [0, 64], sizes = [2, 32], strides = [1, 1]} : vector<2x128xf32> to vector<2x32xf32>
    %608 = math.tanh %607 : vector<2x32xf32>
    %609 = vector.extract_strided_slice %593 {offsets = [0, 96], sizes = [2, 32], strides = [1, 1]} : vector<2x128xf32> to vector<2x32xf32>
    %610 = arith.negf %609 : vector<2x32xf32>
    %611 = math.exp %610 : vector<2x32xf32>
    %cst_244 = arith.constant 1.000000e+00 : f32
    %612 = vector.broadcast %cst_244 : f32 to vector<2x32xf32>
    %613 = arith.addf %612, %611 : vector<2x32xf32>
    %614 = arith.divf %612, %613 : vector<2x32xf32>
    %615 = arith.mulf %606, %594 : vector<2x32xf32>
    %616 = arith.mulf %600, %608 : vector<2x32xf32>
    %617 = arith.addf %615, %616 : vector<2x32xf32>
    %618 = math.tanh %617 : vector<2x32xf32>
    %619 = arith.mulf %614, %618 : vector<2x32xf32>
    %c0_245 = arith.constant 0 : index
    %c0_246 = arith.constant 0 : index
    %620 = vector.load %arg7[%c0_245, %c0_246] : memref<2x32xf32, #tpu.memory_space<vmem>>, vector<2x32xf32>
    tpu.vector_store %arg7[%c0_245, %c0_246], %619 {strides = array<i32>} : memref<2x32xf32, #tpu.memory_space<vmem>>, vector<2x32xf32>,
    %c0_247 = arith.constant 0 : index
    %c0_248 = arith.constant 0 : index
    %621 = vector.load %arg8[%c0_247, %c0_248] : memref<2x32xf32, #tpu.memory_space<vmem>>, vector<2x32xf32>
    tpu.vector_store %arg8[%c0_247, %c0_248], %617 {strides = array<i32>} : memref<2x32xf32, #tpu.memory_space<vmem>>, vector<2x32xf32>,
    %622 = arith.truncf %619 : vector<2x32xf32> to vector<2x32xbf16>
    %623 = arith.index_cast %c7_i32_234 : i32 to index
    %c0_249 = arith.constant 0 : index
    %c0_250 = arith.constant 0 : index
    %624 = vector.load %arg5[%623, %c0_249, %c0_250] : memref<8x2x32xbf16, #tpu.memory_space<vmem>>, vector<1x2x32xbf16>
    %625 = vector.shape_cast %624 : vector<1x2x32xbf16> to vector<2x32xbf16>
    %626 = vector.shape_cast %622 : vector<2x32xbf16> to vector<1x2x32xbf16>
    tpu.vector_store %arg5[%623, %c0_249, %c0_250], %626 {strides = array<i32>} : memref<8x2x32xbf16, #tpu.memory_space<vmem>>, vector<1x2x32xbf16>,
    %c7_i32_251 = arith.constant 7 : i32
    %627 = arith.subi %c7_i32_251, %c7_i32_234 : i32
    %628 = arith.index_cast %627 : i32 to index
    %c0_252 = arith.constant 0 : index
    %c0_253 = arith.constant 0 : index
    %629 = vector.load %arg2[%628, %c0_252, %c0_253] : memref<8x2x128xbf16, #tpu.memory_space<vmem>>, vector<1x2x128xbf16>
    %630 = vector.shape_cast %629 : vector<1x2x128xbf16> to vector<2x128xbf16>
    %631 = arith.extf %630 : vector<2x128xbf16> to vector<2x128xf32>
    %c0_254 = arith.constant 0 : index
    %c0_255 = arith.constant 0 : index
    %632 = vector.load %arg9[%c0_254, %c0_255] : memref<2x32xf32, #tpu.memory_space<vmem>>, vector<2x32xf32>
    %633 = arith.truncf %632 : vector<2x32xf32> to vector<2x32xbf16>
    %cst_256 = arith.constant dense<0.000000e+00> : vector<2x128xf32>
    %634 = tpu.matmul %633, %4, %cst_256 {dimension_numbers = #tpu.dot_dimension_numbers<[1], [0], [0], [1], [0, 0, 1, 1], [], []>} : vector<2x32xbf16>, vector<32x128xbf16>, vector<2x128xf32> -> vector<2x128xf32>
    %635 = arith.addf %631, %634 : vector<2x128xf32>
    %c0_257 = arith.constant 0 : index
    %c0_258 = arith.constant 0 : index
    %636 = vector.load %arg10[%c0_257, %c0_258] : memref<2x32xf32, #tpu.memory_space<vmem>>, vector<2x32xf32>
    %637 = vector.extract_strided_slice %635 {offsets = [0, 0], sizes = [2, 32], strides = [1, 1]} : vector<2x128xf32> to vector<2x32xf32>
    %638 = arith.negf %637 : vector<2x32xf32>
    %639 = math.exp %638 : vector<2x32xf32>
    %cst_259 = arith.constant 1.000000e+00 : f32
    %640 = vector.broadcast %cst_259 : f32 to vector<2x32xf32>
    %641 = arith.addf %640, %639 : vector<2x32xf32>
    %642 = arith.divf %640, %641 : vector<2x32xf32>
    %643 = vector.extract_strided_slice %635 {offsets = [0, 32], sizes = [2, 32], strides = [1, 1]} : vector<2x128xf32> to vector<2x32xf32>
    %644 = arith.negf %643 : vector<2x32xf32>
    %645 = math.exp %644 : vector<2x32xf32>
    %cst_260 = arith.constant 1.000000e+00 : f32
    %646 = vector.broadcast %cst_260 : f32 to vector<2x32xf32>
    %647 = arith.addf %646, %645 : vector<2x32xf32>
    %648 = arith.divf %646, %647 : vector<2x32xf32>
    %649 = vector.extract_strided_slice %635 {offsets = [0, 64], sizes = [2, 32], strides = [1, 1]} : vector<2x128xf32> to vector<2x32xf32>
    %650 = math.tanh %649 : vector<2x32xf32>
    %651 = vector.extract_strided_slice %635 {offsets = [0, 96], sizes = [2, 32], strides = [1, 1]} : vector<2x128xf32> to vector<2x32xf32>
    %652 = arith.negf %651 : vector<2x32xf32>
    %653 = math.exp %652 : vector<2x32xf32>
    %cst_261 = arith.constant 1.000000e+00 : f32
    %654 = vector.broadcast %cst_261 : f32 to vector<2x32xf32>
    %655 = arith.addf %654, %653 : vector<2x32xf32>
    %656 = arith.divf %654, %655 : vector<2x32xf32>
    %657 = arith.mulf %648, %636 : vector<2x32xf32>
    %658 = arith.mulf %642, %650 : vector<2x32xf32>
    %659 = arith.addf %657, %658 : vector<2x32xf32>
    %660 = math.tanh %659 : vector<2x32xf32>
    %661 = arith.mulf %656, %660 : vector<2x32xf32>
    %c0_262 = arith.constant 0 : index
    %c0_263 = arith.constant 0 : index
    %662 = vector.load %arg9[%c0_262, %c0_263] : memref<2x32xf32, #tpu.memory_space<vmem>>, vector<2x32xf32>
    tpu.vector_store %arg9[%c0_262, %c0_263], %661 {strides = array<i32>} : memref<2x32xf32, #tpu.memory_space<vmem>>, vector<2x32xf32>,
    %c0_264 = arith.constant 0 : index
    %c0_265 = arith.constant 0 : index
    %663 = vector.load %arg10[%c0_264, %c0_265] : memref<2x32xf32, #tpu.memory_space<vmem>>, vector<2x32xf32>
    tpu.vector_store %arg10[%c0_264, %c0_265], %659 {strides = array<i32>} : memref<2x32xf32, #tpu.memory_space<vmem>>, vector<2x32xf32>,
    %664 = arith.truncf %661 : vector<2x32xf32> to vector<2x32xbf16>
    %665 = arith.index_cast %627 : i32 to index
    %c0_266 = arith.constant 0 : index
    %c0_267 = arith.constant 0 : index
    %666 = vector.load %arg6[%665, %c0_266, %c0_267] : memref<8x2x32xbf16, #tpu.memory_space<vmem>>, vector<1x2x32xbf16>
    %667 = vector.shape_cast %666 : vector<1x2x32xbf16> to vector<2x32xbf16>
    %668 = vector.shape_cast %664 : vector<2x32xbf16> to vector<1x2x32xbf16>
    tpu.vector_store %arg6[%665, %c0_266, %c0_267], %668 {strides = array<i32>} : memref<8x2x32xbf16, #tpu.memory_space<vmem>>, vector<1x2x32xbf16>,
    %c8_i32 = arith.constant 8 : i32
    return
  }
  func.func @transform_0(%arg0: i32) -> (i32, i32, i32) {
    %c0_i32 = arith.constant 0 : i32
    %c0_i32_0 = arith.constant 0 : i32
    %c0_i32_1 = arith.constant 0 : i32
    return %arg0, %c0_i32, %c0_i32_0 : i32, i32, i32
  }
  func.func @transform_1(%arg0: i32) -> (i32, i32, i32) {
    %c0_i32 = arith.constant 0 : i32
    %0 = arith.subi %c0_i32, %arg0 : i32
    %c0_i32_0 = arith.constant 0 : i32
    %c0_i32_1 = arith.constant 0 : i32
    %c0_i32_2 = arith.constant 0 : i32
    return %0, %c0_i32_0, %c0_i32_1 : i32, i32, i32
  }
  func.func @transform_2(%arg0: i32) -> (i32, i32) {
    %c0_i32 = arith.constant 0 : i32
    %c0_i32_0 = arith.constant 0 : i32
    %c0_i32_1 = arith.constant 0 : i32
    return %c0_i32, %c0_i32_0 : i32, i32
  }
  func.func @transform_3(%arg0: i32) -> (i32, i32) {
    %c0_i32 = arith.constant 0 : i32
    %c0_i32_0 = arith.constant 0 : i32
    %c0_i32_1 = arith.constant 0 : i32
    return %c0_i32, %c0_i32_0 : i32, i32
  }
  func.func @transform_4(%arg0: i32) -> (i32, i32, i32) {
    %c0_i32 = arith.constant 0 : i32
    %c0_i32_0 = arith.constant 0 : i32
    %c0_i32_1 = arith.constant 0 : i32
    return %arg0, %c0_i32, %c0_i32_0 : i32, i32, i32
  }
  func.func @transform_5(%arg0: i32) -> (i32, i32, i32) {
    %c0_i32 = arith.constant 0 : i32
    %0 = arith.subi %c0_i32, %arg0 : i32
    %c0_i32_0 = arith.constant 0 : i32
    %c0_i32_1 = arith.constant 0 : i32
    %c0_i32_2 = arith.constant 0 : i32
    return %0, %c0_i32_0, %c0_i32_1 : i32, i32, i32
  }
}

</mosaic_0001>

<bundles_post_ra>
// kernel: rnn_projection_forward.3
= control target key start
LH: loop header
LB: loop body
LE: loop exit
PB: predicated region body
PF: predicated region fallthrough
CT: control target
= control target key end

     0   :  { %vm25_vm0 = vcmask 261120   ;;  %v208_v4 = vmov 32.0   ;;  %s295_s0 = inlined_call_operand.vmem [shape: f32[16,32], index: 0, kind: input, shape index: {}]   ;;  %s296_s1 = inlined_call_operand.vmem [shape: f32[1,32], index: 1, kind: input, shape index: {}]   ;;  %s297_s2 = inlined_call_operand.vmem [shape: f32[1,32], index: 2, kind: input, shape index: {}]   ;;  %s298_s3 = inlined_call_operand.vmem [shape: bf16[32,256], index: 3, kind: input, shape index: {}]   ;;  %s299_s4 = inlined_call_operand.vmem [shape: f32[1,256], index: 4, kind: input, shape index: {}]   ;;  %s300_s5 = inlined_call_operand.vmem [shape: bf16[16,128], index: 5, kind: output, shape index: {0}]   ;;  %s301_s6 = inlined_call_operand.vmem [shape: bf16[16,128], index: 6, kind: output, shape index: {1}]  }
   0x1   :  { %v23_v0 = vld [vmem:[%s295_s0] sm:$0xff]  ;;  %v24_v2 = vld [vmem:[%s295_s0 + $0x8] sm:$0xff]  ;;  %202 = vrcp.f32 %v208_v4  ;;  %v177_v21 = vld [vmem:[%s298_s3 + $0x10] sm:$0xf] }
   0x2   :  { %v26_v1 = vsel %vm25_vm0, %v23_v0, 0.0  ;;  %v29_v3 = vsel %vm25_vm0, %v24_v2, 0.0  ;;  %v188_v22 = vld [vmem:[%s298_s3 + $0x14] sm:$0xf0]  ;;  %v187_v23 = vld [vmem:[%s298_s3 + $0x14] sm:$0xf] }
   0x3   :  { %27 = vadd.xlane.f32.xlu0 %v26_v1  ;;  %v178_v24 = vor.u32 %v188_v22, %v177_v21  ;;  %v179_v25 = vld [vmem:[%s298_s3 + $0x18] sm:$0xf0]  ;;  %v169_v27 = vld [vmem:[%s298_s3] sm:$0xf]  ;;  %v186_v28 = vld [vmem:[%s298_s3 + $0x4] sm:$0xf0] }
   0x4   :  { %v182_v26 = vor.u32 %v187_v23, %v179_v25  ;;  %v185_v29 = vld [vmem:[%s298_s3 + $0x4] sm:$0xf]  ;;  %v170_v31 = vor.u32 %v186_v28, %v169_v27  ;;  %v171_v32 = vld [vmem:[%s298_s3 + $0x8] sm:$0xf0]  ;;  %v200_v52 = vld [vmem:[%s296_s1] ss:$0 sm:$0xff] }
   0x5   :  { %129 = vmatpush.bf16.msra.mxu0 %v178_v24  ;;  %v174_v34 = vor.u32 %v185_v29, %v171_v32  ;;  %v201_v57 = vld [vmem:[%s297_s2] ss:$0 sm:$0xff] }
   0x6   :  { %143 = vmatpush.bf16.msra.mxu1 %v182_v26 }
   0x7   :  { %v203_v5 = vpop.eup %202 }
   0x8   :  { %v33_v6 = vmul.f32 32.0, %v203_v5  ;;  %vm37_vm1 = vweird.f32 %v203_v5 }
   0x9   :  { %130 = vmatpush.bf16.msra.mxu0 %v170_v31 }
   0xa   :  { %v34_v7 = vsub.f32 1.0, %v33_v6  ;;  %144 = vmatpush.bf16.msra.mxu1 %v174_v34 }
   0xb   :  { %30 = vadd.xlane.f32.xlu0 %v29_v3 }
   0xc   :  { %v35_v8 = vmul.f32 %v203_v5, %v34_v7 }
   0xe   :  { %v36_v9 = vadd.f32 %v203_v5, %v35_v8 }
  0x10   :  { %v38_v10 = vsel %vm37_vm1, %v203_v5, %v36_v9 }
  0x76   :  { %v28_v11 = vpop.xlane.xlu0 %27 }
  0x77   :  { %v39_v12 = vmul.f32 %v38_v10, %v28_v11 }
  0x79   :  { %v41_v13 = vsub.f32 %v23_v0, %v39_v12  ;;  %v94_v0 = vld [vmem:[%s299_s4] sm:$0x3] }
  0x7a   :  { %v96_v1 = vperm.slane %v94_v0, 0 }
  0x7b   :  { %v43_v14 = vmul.f32 %v41_v13, %v41_v13 }
  0x7d   :  { %v45_v15 = vsel %vm25_vm0, %v43_v14, 0.0 }
  0x7e   :  { %46 = vadd.xlane.f32.xlu1 %v45_v15  ;;  %v31_v16 = vpop.xlane.xlu0 %30 }
  0x7f   :  { %v40_v17 = vmul.f32 %v38_v10, %v31_v16 }
  0x81   :  { %v42_v18 = vsub.f32 %v24_v2, %v40_v17  ;;  %v97_v2 = vperm.slane %v94_v0, 1 }
  0x83   :  { %v44_v19 = vmul.f32 %v42_v18, %v42_v18 }
  0x85   :  { %v48_v20 = vsel %vm25_vm0, %v44_v19, 0.0 }
  0x86   :  { %49 = vadd.xlane.f32.xlu1 %v48_v20 }
  0xf1   :  { %v47_v30 = vpop.xlane.xlu1 %46 }
  0xf2   :  { %v51_v33 = vmul.f32 %v47_v30, %v38_v10 }
  0xf4   :  { %v53_v35 = vadd.f32 1e-05, %v51_v33 }
  0xf6   :  { %204 = vrsqrt.f32 %v53_v35  ;;  %vm61_vm3 = vweird.f32 %v53_v35 }
  0xf9   :  { %v50_v36 = vpop.xlane.xlu1 %49 }
  0xfa   :  { %v52_v37 = vmul.f32 %v50_v36, %v38_v10 }
  0xfc   :  { %v205_v38 = vpop.eup %204  ;;  %v54_v39 = vadd.f32 1e-05, %v52_v37 }
  0xfd   :  { %v56_v40 = vmul.f32 %v205_v38, %v53_v35  ;;  %vm62_vm2 = vweird.f32 %v205_v38 }
  0xfe   :  { %206 = vrsqrt.f32 %v54_v39  ;;  %vm63_vm4 = vmor %vm61_vm3, %vm62_vm2  ;;  %vm71_vm6 = vweird.f32 %v54_v39 }
  0xff   :  { %v57_v41 = vmul.f32 %v205_v38, %v56_v40 }
 0x101   :  { %v58_v42 = vmul.f32 0.5, %v57_v41 }
 0x103   :  { %v59_v43 = vsub.f32 1.5, %v58_v42 }
 0x104   :  { %v207_v44 = vpop.eup %206 }
 0x105   :  { %v60_v45 = vmul.f32 %v205_v38, %v59_v43  ;;  %v66_v46 = vmul.f32 %v207_v44, %v54_v39  ;;  %vm72_vm5 = vweird.f32 %v207_v44 }
 0x106   :  { %vm73_vm7 = vmor %vm71_vm6, %vm72_vm5 }
 0x107   :  { %v67_v47 = vmul.f32 %v207_v44, %v66_v46  ;;  %v64_v48 = vsel %vm63_vm4, %v205_v38, %v60_v45 }
 0x108   :  { %v75_v51 = vmul.f32 %v64_v48, %v41_v13 }
 0x109   :  { %v68_v49 = vmul.f32 0.5, %v67_v47 }
 0x10a   :  { %v81_v56 = vmul.f32 %v200_v52, %v75_v51 }
 0x10b   :  { %v69_v50 = vsub.f32 1.5, %v68_v49 }
 0x10c   :  { %v87_v59 = vadd.f32 %v201_v57, %v81_v56 }
 0x10d   :  { %v70_v53 = vmul.f32 %v207_v44, %v69_v50 }
 0x10f   :  { %v74_v54 = vsel %vm73_vm7, %v207_v44, %v70_v53 }
 0x110   :  { %v76_v55 = vmul.f32 %v74_v54, %v42_v18 }
 0x112   :  { %v82_v58 = vmul.f32 %v200_v52, %v76_v55 }
 0x114   :  { %v88_v60 = vadd.f32 %v201_v57, %v82_v58 }
 0x116   :  { %v89_v61 = vpack.c.bf16 %v88_v60, %v87_v59 }
 0x118   :  { %183 = vmatmul.msk.bf16.vlgmr.msra.gmra.mxu0 %vm25_vm0, %v89_v61  ;;  %184 = vmatmul.msk.bf16.vlgmr.msra.gmra.mxu1 %vm25_vm0, %v89_v61 }
 0x195   :  { %v132_v62 = vpop.f32.mrf.mxu0  ;;  %v146_v63 = vpop.f32.mrf.mxu1 }
 0x196   :  { %v133_v5 = vadd.f32 %v132_v62, %v96_v1  ;;  %v147_v6 = vadd.f32 %v146_v63, %v97_v2 }
 0x19d   :  { %v134_v3 = vpop.f32.mrf.mxu0  ;;  %v148_v4 = vpop.f32.mrf.mxu1 }
 0x19e   :  { %v135_v7 = vadd.f32 %v134_v3, %v96_v1  ;;  %v149_v8 = vadd.f32 %v148_v4, %v97_v2 }
 0x1a0   :  { %v192_v9 = vpack.c.bf16 %v135_v7, %v133_v5  ;;  %v197_v10 = vpack.c.bf16 %v149_v8, %v147_v6 }
 0x1a2   :  { %193 = vst [vmem:[%s300_s5] sm:$0xff] %v192_v9  }
 0x1a3   :  { %198 = vst [vmem:[%s301_s6] sm:$0xff] %v197_v10  }

// kernel: rnn_projection_forward.5
= control target key start
LH: loop header
LB: loop body
LE: loop exit
PB: predicated region body
PF: predicated region fallthrough
CT: control target
= control target key end

     0   :  { %vm43_vm0 = vcmask 261120   ;;  %v314_v6 = vmov 32.0   ;;  %s455_s1 = inlined_call_operand.vmem [shape: f32[16,32], index: 1, kind: input, shape index: {}]   ;;  %s456_s5 = inlined_call_operand.vmem [shape: bf16[32,32], index: 5, kind: input, shape index: {}]   ;;  %s457_s4 = inlined_call_operand.vmem [shape: bf16[32,32], index: 4, kind: input, shape index: {}]   ;;  %s458_s3 = inlined_call_operand.vmem [shape: bf16[16,32], index: 3, kind: input, shape index: {}]   ;;  %s459_s2 = inlined_call_operand.vmem [shape: bf16[16,32], index: 2, kind: input, shape index: {}]   ;;  %s460_s0 = inlined_call_operand.<no memory space> [shape: f32[1], index: 0, kind: input, shape index: {}]   ;;  %s461_s7 = inlined_call_operand.vmem [shape: f32[1,32], index: 7, kind: input, shape index: {}]   ;;  %s462_s6 = inlined_call_operand.vmem [shape: f32[1,32], index: 6, kind: input, shape index: {}]   ;;  %s463_s8 = inlined_call_operand.vmem [shape: f32[1,32], index: 8, kind: input, shape index: {}]   ;;  %s464_s9 = inlined_call_operand.vmem [shape: f32[1,32], index: 9, kind: input, shape index: {}]   ;;  %s465_s10 = inlined_call_operand.vmem [shape: f32[1,32], index: 10, kind: input, shape index: {}]   ;;  %s466_s11 = inlined_call_operand.vmem [shape: f32[16,32], index: 11, kind: output, shape index: {}]  }
   0x1   :  { %v378_v0 = vld [vmem:[%s455_s1] sm:$0xff]  ;;  %v385_v2 = vld [vmem:[%s455_s1 + $0x8] sm:$0xff]  ;;  %304 = vrcp.f32 %v314_v6  ;;  %v117_v13 = vstv %s460_s0 }
   0x2   :  { %v44_v1 = vsel %vm43_vm0, %v378_v0, 0.0  ;;  %v47_v3 = vsel %vm43_vm0, %v385_v2, 0.0  ;;  %v289_v4 = vld [vmem:[%s456_s5 + $0x8] sm:$0xff]  ;;  %v295_v7 = vld [vmem:[%s458_s3] sm:$0xff]  }
   0x3   :  { %45 = vadd.xlane.f32.xlu0 %v44_v1  ;;  %v287_v5 = vld [vmem:[%s457_s4 + $0x8] sm:$0xff]  ;;  %159 = vmatpush.bf16.msra.mxu0 %v289_v4  ;;  %v291_v8 = vld [vmem:[%s459_s2] sm:$0xff]   ;;  %v296_v9 = vunpack.c.l.bf16 %v295_v7  ;;  %v297_v10 = vunpack.c.h.bf16 %v295_v7 }
   0x4   :  { %188 = vmatpush.bf16.msra.mxu1 %v287_v5  ;;  %v292_v11 = vunpack.c.l.bf16 %v291_v8  ;;  %v293_v12 = vunpack.c.h.bf16 %v291_v8  ;;  %v288_v14 = vld [vmem:[%s456_s5] sm:$0xff] }
   0x5   :  { %v286_v15 = vld [vmem:[%s457_s4] sm:$0xff]  ;;  %v125_v16 = vmul.f32 %v296_v9, %v117_v13  ;;  %v126_v17 = vmul.f32 %v297_v10, %v117_v13  ;;  %vm123_vm1 = vcmp.gt.f32.partialorder %v296_v9, 0.0  ;;  %vm124_vm2 = vcmp.gt.f32.partialorder %v297_v10, 0.0 }
   0x6   :  { %v118_v18 = vmul.f32 %v292_v11, %v117_v13  ;;  %v119_v19 = vmul.f32 %v293_v12, %v117_v13  ;;  %vm115_vm3 = vcmp.gt.f32.partialorder %v292_v11, 0.0  ;;  %vm116_vm4 = vcmp.gt.f32.partialorder %v293_v12, 0.0  ;;  %v299_v59 = vld [vmem:[%s462_s6] ss:$0 sm:$0xff] }
   0x7   :  { %v305_v20 = vpop.eup %304  ;;  %160 = vmatpush.bf16.msra.mxu0 %v288_v14  ;;  %v127_v21 = vsel %vm123_vm1, %v296_v9, %v125_v16  ;;  %v128_v22 = vsel %vm124_vm2, %v297_v10, %v126_v17  ;;  %v300_v60 = vld [vmem:[%s461_s7] ss:$0 sm:$0xff] }
   0x8   :  { %189 = vmatpush.bf16.msra.mxu1 %v286_v15  ;;  %v120_v23 = vsel %vm115_vm3, %v292_v11, %v118_v18  ;;  %v129_v24 = vpack.c.bf16 %v128_v22, %v127_v21  ;;  %v121_v25 = vsel %vm116_vm4, %v293_v12, %v119_v19  ;;  %v51_v27 = vmul.f32 32.0, %v305_v20  ;;  %v301_v1 = vld [vmem:[%s463_s8] ss:$0 sm:$0xff] }
   0x9   :  { %v122_v26 = vpack.c.bf16 %v121_v25, %v120_v23  ;;  %vm55_vm5 = vweird.f32 %v305_v20 }
   0xa   :  { %276 = vmatmul.msk.bf16.vlgmr.msra.gmra.mxu0 %vm43_vm0, %v129_v24  ;;  %v52_v28 = vsub.f32 1.0, %v51_v27 }
   0xb   :  { %48 = vadd.xlane.f32.xlu0 %v47_v3  ;;  %285 = vmatmul.msk.bf16.vlgmr.msra.gmra.mxu1 %vm43_vm0, %v122_v26 }
   0xc   :  { %v53_v29 = vmul.f32 %v305_v20, %v52_v28 }
   0xe   :  { %v54_v30 = vadd.f32 %v305_v20, %v53_v29 }
  0x10   :  { %v412_v31 = vsel %vm55_vm5, %v305_v20, %v54_v30 }
  0x76   :  { %v46_v32 = vpop.xlane.xlu0 %45 }
  0x77   :  { %v57_v33 = vmul.f32 %v412_v31, %v46_v32 }
  0x79   :  { %v59_v34 = vsub.f32 %v378_v0, %v57_v33 }
  0x7b   :  { %v61_v35 = vmul.f32 %v59_v34, %v59_v34 }
  0x7d   :  { %v63_v36 = vsel %vm43_vm0, %v61_v35, 0.0 }
  0x7e   :  { %64 = vadd.xlane.f32.xlu1 %v63_v36  ;;  %v49_v37 = vpop.xlane.xlu0 %48 }
  0x7f   :  { %v58_v38 = vmul.f32 %v412_v31, %v49_v37 }
  0x81   :  { %v60_v39 = vsub.f32 %v385_v2, %v58_v38 }
  0x83   :  { %v62_v40 = vmul.f32 %v60_v39, %v60_v39 }
  0x85   :  { %v66_v41 = vsel %vm43_vm0, %v62_v40, 0.0 }
  0x86   :  { %67 = vadd.xlane.f32.xlu1 %v66_v41 }
  0x87   :  { %v162_v53 = vpop.f32.mrf.mxu0 }
  0x88   :  { %v191_v54 = vpop.f32.mrf.mxu1 }
  0x89   :  { %v192_v58 = vadd.f32 %v191_v54, %v162_v53 }
  0x8b   :  { %v200_v4 = vadd.f32 %v299_v59, %v192_v58 }
  0x8f   :  { %v164_v9 = vpop.f32.mrf.mxu0 }
  0x90   :  { %v193_v10 = vpop.f32.mrf.mxu1 }
  0x91   :  { %v194_v13 = vadd.f32 %v193_v10, %v164_v9 }
  0x93   :  { %v201_v17 = vadd.f32 %v299_v59, %v194_v13 }
  0xf1   :  { %v65_v42 = vpop.xlane.xlu1 %64 }
  0xf2   :  { %v69_v43 = vmul.f32 %v65_v42, %v412_v31 }
  0xf4   :  { %v71_v44 = vadd.f32 1e-05, %v69_v43 }
  0xf6   :  { %306 = vrsqrt.f32 %v71_v44  ;;  %vm79_vm7 = vweird.f32 %v71_v44 }
  0xf9   :  { %v68_v45 = vpop.xlane.xlu1 %67 }
  0xfa   :  { %v70_v46 = vmul.f32 %v68_v45, %v412_v31 }
  0xfc   :  { %v307_v47 = vpop.eup %306  ;;  %v72_v48 = vadd.f32 1e-05, %v70_v46  ;;  %v302_v46 = vld [vmem:[%s464_s9] ss:$0 sm:$0xff] }
  0xfd   :  { %v74_v49 = vmul.f32 %v307_v47, %v71_v44  ;;  %vm80_vm6 = vweird.f32 %v307_v47 }
  0xfe   :  { %308 = vrsqrt.f32 %v72_v48  ;;  %vm81_vm8 = vmor %vm79_vm7, %vm80_vm6  ;;  %vm89_vm10 = vweird.f32 %v72_v48 }
  0xff   :  { %v75_v50 = vmul.f32 %v307_v47, %v74_v49 }
 0x101   :  { %v76_v51 = vmul.f32 0.5, %v75_v50 }
 0x103   :  { %v77_v52 = vsub.f32 1.5, %v76_v51 }
 0x104   :  { %v309_v55 = vpop.eup %308 }
 0x105   :  { %v78_v56 = vmul.f32 %v307_v47, %v77_v52  ;;  %v84_v57 = vmul.f32 %v309_v55, %v72_v48  ;;  %vm90_vm9 = vweird.f32 %v309_v55 }
 0x106   :  { %vm91_vm11 = vmor %vm89_vm10, %vm90_vm9 }
 0x107   :  { %v85_v61 = vmul.f32 %v309_v55, %v84_v57  ;;  %v82_v62 = vsel %vm81_vm8, %v307_v47, %v78_v56 }
 0x108   :  { %v93_v63 = vmul.f32 %v82_v62, %v59_v34 }
 0x109   :  { %v86_v3 = vmul.f32 0.5, %v85_v61 }
 0x10a   :  { %v99_v5 = vmul.f32 %v300_v60, %v93_v63 }
 0x10b   :  { %v87_v6 = vsub.f32 1.5, %v86_v3 }
 0x10c   :  { %v105_v7 = vadd.f32 %v301_v1, %v99_v5 }
 0x10d   :  { %v88_v8 = vmul.f32 %v309_v55, %v87_v6 }
 0x10e   :  { %v202_v11 = vadd.f32 %v200_v4, %v105_v7 }
 0x10f   :  { %v92_v12 = vsel %vm91_vm11, %v309_v55, %v88_v8 }
 0x110   :  { %v204_v14 = vsel %vm43_vm0, %v202_v11, 0.0  ;;  %v94_v15 = vmul.f32 %v92_v12, %v60_v39 }
 0x111   :  { %205 = vadd.xlane.f32.xlu2 %v204_v14 }
 0x112   :  { %v100_v16 = vmul.f32 %v300_v60, %v94_v15 }
 0x114   :  { %v106_v18 = vadd.f32 %v301_v1, %v100_v16 }
 0x116   :  { %v203_v19 = vadd.f32 %v201_v17, %v106_v18 }
 0x118   :  { %v207_v20 = vsel %vm43_vm0, %v203_v19, 0.0 }
 0x119   :  { %208 = vadd.xlane.f32.xlu2 %v207_v20 }
 0x184   :  { %v206_v21 = vpop.xlane.xlu2 %205 }
 0x185   :  { %v210_v22 = vmul.f32 %v206_v21, %v412_v31 }
 0x187   :  { %v212_v23 = vsub.f32 %v202_v11, %v210_v22 }
 0x189   :  { %v214_v24 = vmul.f32 %v212_v23, %v212_v23 }
 0x18b   :  { %v216_v25 = vsel %vm43_vm0, %v214_v24, 0.0 }
 0x18c   :  { %217 = vadd.xlane.f32.xlu0 %v216_v25  ;;  %v209_v26 = vpop.xlane.xlu2 %208 }
 0x18d   :  { %v211_v27 = vmul.f32 %v209_v26, %v412_v31 }
 0x18f   :  { %v213_v28 = vsub.f32 %v203_v19, %v211_v27 }
 0x191   :  { %v215_v29 = vmul.f32 %v213_v28, %v213_v28 }
 0x193   :  { %v219_v30 = vsel %vm43_vm0, %v215_v29, 0.0 }
 0x194   :  { %220 = vadd.xlane.f32.xlu1 %v219_v30 }
 0x1ff   :  { %v218_v32 = vpop.xlane.xlu0 %217 }
 0x200   :  { %v222_v33 = vmul.f32 %v218_v32, %v412_v31 }
 0x202   :  { %v224_v34 = vadd.f32 1e-05, %v222_v33 }
 0x204   :  { %310 = vrsqrt.f32 %v224_v34  ;;  %vm232_vm13 = vweird.f32 %v224_v34 }
 0x207   :  { %v221_v35 = vpop.xlane.xlu1 %220 }
 0x208   :  { %v223_v36 = vmul.f32 %v221_v35, %v412_v31  ;;  %v303_v31 = vld [vmem:[%s465_s10] ss:$0 sm:$0xff] }
 0x20a   :  { %v311_v37 = vpop.eup %310  ;;  %v225_v38 = vadd.f32 1e-05, %v223_v36 }
 0x20b   :  { %v227_v39 = vmul.f32 %v311_v37, %v224_v34  ;;  %vm233_vm12 = vweird.f32 %v311_v37 }
 0x20c   :  { %312 = vrsqrt.f32 %v225_v38  ;;  %vm234_vm14 = vmor %vm232_vm13, %vm233_vm12  ;;  %vm242_vm1 = vweird.f32 %v225_v38 }
 0x20d   :  { %v228_v40 = vmul.f32 %v311_v37, %v227_v39 }
 0x20f   :  { %v229_v41 = vmul.f32 0.5, %v228_v40 }
 0x211   :  { %v230_v42 = vsub.f32 1.5, %v229_v41 }
 0x212   :  { %v313_v43 = vpop.eup %312 }
 0x213   :  { %v231_v44 = vmul.f32 %v311_v37, %v230_v42  ;;  %v237_v45 = vmul.f32 %v313_v43, %v225_v38  ;;  %vm243_vm15 = vweird.f32 %v313_v43 }
 0x214   :  { %vm244_vm2 = vmor %vm242_vm1, %vm243_vm15 }
 0x215   :  { %v235_v47 = vsel %vm234_vm14, %v311_v37, %v231_v44  ;;  %v238_v48 = vmul.f32 %v313_v43, %v237_v45 }
 0x216   :  { %v246_v49 = vmul.f32 %v235_v47, %v212_v23 }
 0x217   :  { %v239_v50 = vmul.f32 0.5, %v238_v48 }
 0x218   :  { %v252_v51 = vmul.f32 %v302_v46, %v246_v49 }
 0x219   :  { %v240_v52 = vsub.f32 1.5, %v239_v50 }
 0x21a   :  { %v258_v53 = vadd.f32 %v303_v31, %v252_v51 }
 0x21b   :  { %v241_v54 = vmul.f32 %v313_v43, %v240_v52 }
 0x21c   :  { %v260_v55 = vadd.f32 %v258_v53, %v378_v0 }
 0x21d   :  { %v245_v56 = vsel %vm244_vm2, %v313_v43, %v241_v54 }
 0x21e   :  { %262 = vst.msk [vmem:[%s466_s11] sm:$0xff] %vm43_vm0, %v260_v55  ;;  %v247_v57 = vmul.f32 %v245_v56, %v213_v28 }
 0x220   :  { %v253_v58 = vmul.f32 %v302_v46, %v247_v57 }
 0x222   :  { %v259_v59 = vadd.f32 %v303_v31, %v253_v58 }
 0x224   :  { %v261_v60 = vadd.f32 %v259_v59, %v385_v2 }
 0x226   :  { %263 = vst.msk [vmem:[%s466_s11 + $0x8] sm:$0xff] %vm43_vm0, %v261_v60 }

// kernel: rnn_projection_forward.4
= control target key start
LH: loop header
LB: loop body
LE: loop exit
PB: predicated region body
PF: predicated region fallthrough
CT: control target
= control target key end

     0   :  { %vm55_vm0 = vcmask 254976   ;;  %v1771_v1 = vmov 0.0   ;;  %vm84_vm1 = vcmask 261120   ;;  %s1773_s29 = smov 64   ;;  %s1774_s30 = smov 96   ;;  %s2233_s2 = inlined_call_operand.vmem [shape: bf16[32,128], index: 2, kind: input, shape index: {}]   ;;  %s2234_s3 = inlined_call_operand.vmem [shape: bf16[32,128], index: 3, kind: input, shape index: {}]   ;;  %s2235_s0 = inlined_call_operand.vmem [shape: bf16[8,2,128], index: 0, kind: input, shape index: {}]   ;;  %s2236_s1 = inlined_call_operand.vmem [shape: bf16[8,2,128], index: 1, kind: input, shape index: {}]   ;;  %s2237_s5 = inlined_call_operand.vmem [shape: bf16[8,2,32], index: 5, kind: output, shape index: {1}]   ;;  %s2238_s4 = inlined_call_operand.vmem [shape: bf16[8,2,32], index: 4, kind: output, shape index: {0}]  }
   0x1   :  { %v1808_v0 = vld [vmem:[%s2233_s2 + $0x8] sm:$0xff]  ;;  %56 = vst.msk [vmem:[#allocation2] sm:$0x3] %vm55_vm0, %v1771_v1  ;;  %v1821_v3 = vld [vmem:[%s2233_s2] sm:$0xff]  ;;  %s1772_s2 = smov 32  }
   0x2   :  { %v1814_v2 = vld [vmem:[%s2234_s3 + $0x8] sm:$0xff]  ;;  %57 = vst.msk [vmem:[#allocation3] sm:$0x3] %vm55_vm0, %v1771_v1  ;;  %94 = vmatpush.bf16.msra.mxu0 %v1808_v0  ;;  %v1828_v4 = vld [vmem:[%s2234_s3] sm:$0xff]  ;;  %288 = vmatpush.bf16.msra.mxu2 %v1808_v0 }
   0x3   :  { %58 = vst.msk [vmem:[#allocation4] sm:$0x3] %vm55_vm0, %v1771_v1  ;;  %198 = vmatpush.bf16.msra.mxu1 %v1814_v2  ;;  %378 = vmatpush.bf16.msra.mxu3 %v1814_v2  ;;  %v68_v11 = vld [vmem:[%s2235_s0] sm:$0x1]  ;;  %v1569_v13 = vld [vmem:[%s2236_s1 + $0x7] sm:$0x1] }
   0x4   :  { %59 = vst.msk [vmem:[#allocation5] sm:$0x3] %vm55_vm0, %v1771_v1  ;;  %v69_v12 = vunpack.c.l.bf16 %v68_v11  ;;  %v174_v16 = vunpack.c.l.bf16 %v1569_v13 }
   0x6   :  { %95 = vmatpush.bf16.msra.mxu0 %v1821_v3  ;;  %289 = vmatpush.bf16.msra.mxu2 %v1821_v3 }
   0x7   :  { %199 = vmatpush.bf16.msra.mxu1 %v1828_v4  ;;  %379 = vmatpush.bf16.msra.mxu3 %v1828_v4 }
   0x8   :  { %v70_v5 = vld [vmem:[#allocation2] sm:$0x3] }
   0x9   :  { %v71_v6 = vpack.c.bf16 %v70_v5, %v70_v5  ;;  %v102_v7 = vld [vmem:[#allocation3] sm:$0x3] }
   0xa   :  { %468 = vmatpush.bf16.msrb.mxu0 %v1808_v0  ;;  %v175_v8 = vld [vmem:[#allocation4] sm:$0x3]  ;;  %124 = vrot.lane.b32.xlu1 %v102_v7, %s1772_s2 }
   0xb   :  { %558 = vmatpush.bf16.msrb.mxu1 %v1814_v2  ;;  %648 = vmatpush.bf16.msrb.mxu2 %v1808_v0  ;;  %v176_v9 = vpack.c.bf16 %v175_v8, %v175_v8  ;;  %v206_v10 = vld [vmem:[#allocation5] sm:$0x3] }
   0xc   :  { %1567 = vmatmul.msk.bf16.vlgmr.msra.gmra.mxu0 %vm84_vm1, %v71_v6  ;;  %738 = vmatpush.bf16.msrb.mxu3 %v1814_v2 }
   0xd   :  { %228 = vrot.lane.b32.xlu2 %v206_v10, %s1772_s2  ;;  %1578 = vmatmul.msk.bf16.vlgmr.msra.gmra.mxu1 %vm84_vm1, %v176_v9 }
   0xe   :  { %469 = vmatpush.bf16.msrb.mxu0 %v1821_v3 }
   0xf   :  { %559 = vmatpush.bf16.msrb.mxu1 %v1828_v4  ;;  %649 = vmatpush.bf16.msrb.mxu2 %v1821_v3 }
  0x10   :  { %739 = vmatpush.bf16.msrb.mxu3 %v1828_v4 }
  0x12   :  { %828 = vmatpush.bf16.msra.mxu0 %v1808_v0 }
  0x13   :  { %918 = vmatpush.bf16.msra.mxu1 %v1814_v2 }
  0x16   :  { %829 = vmatpush.bf16.msra.mxu0 %v1821_v3 }
  0x17   :  { %919 = vmatpush.bf16.msra.mxu1 %v1828_v4 }
  0x67   :  { %v229_v53 = vpop.permute.xlu2 %228 }
  0x7c   :  { %v125_v57 = vpop.permute.xlu1 %124 }
  0x89   :  { %v97_v14 = vpop.f32.mrf.mxu0 }
  0x8a   :  { %v101_v15 = vadd.f32 %v97_v14, %v69_v12  ;;  %v201_v17 = vpop.f32.mrf.mxu1 }
  0x8b   :  { %v205_v18 = vadd.f32 %v201_v17, %v174_v16 }
  0x8c   :  { %1643 = vtanh.f32 %v101_v15  ;;  %v1568_v23 = vmul.f32 -1.442695, %v101_v15 }
  0x8d   :  { %1645 = vtanh.f32 %v205_v18  ;;  %v1579_v24 = vmul.f32 -1.442695, %v205_v18 }
  0x8e   :  { %1647 = vpow2.f32 %v1568_v23 }
  0x8f   :  { %1649 = vpow2.f32 %v1579_v24 }
  0x91   :  { %v99_v19 = vpop.f32.mrf.mxu0 }
  0x92   :  { %v1644_v20 = vpop.eup %1643  ;;  %v203_v21 = vpop.f32.mrf.mxu1  ;;  %v1581_v19 = vld [vmem:[%s2235_s0 + $0x1] sm:$0x1] }
  0x93   :  { %129 = vrot.lane.b32.xlu0 %v1644_v20, %s1773_s29  ;;  %v1646_v22 = vpop.eup %1645  ;;  %v276_v20 = vunpack.c.l.bf16 %v1581_v19 }
  0x94   :  { %v1648_v25 = vpop.eup %1647 }
  0x95   :  { %v106_v26 = vadd.f32 1.0, %v1648_v25  ;;  %v1650_v27 = vpop.eup %1649 }
  0x96   :  { %v210_v28 = vadd.f32 1.0, %v1650_v27 }
  0x97   :  { %1651 = vrcp.f32 %v106_v26  ;;  %v118_v37 = vand.u32 2147483648, %v106_v26  ;;  %vm112_vm3 = vweird.f32 %v106_v26  ;;  %v116_v38 = vand.u32 2147483647, %v106_v26 }
  0x98   :  { %1653 = vrcp.f32 %v210_v28  ;;  %vm216_vm6 = vweird.f32 %v210_v28  ;;  %v222_v43 = vand.u32 2147483648, %v210_v28  ;;  %v220_v46 = vand.u32 2147483647, %v210_v28 }
  0x99   :  { %v119_v41 = vor.u32 1.1754944e-38, %v118_v37  ;;  %vm117_vm5 = vcmp.eq.f32.partialorder %v116_v38, 8.507059e+37 }
  0x9a   :  { %v223_v48 = vor.u32 1.1754944e-38, %v222_v43  ;;  %vm221_vm9 = vcmp.eq.f32.partialorder %v220_v46, 8.507059e+37 }
  0x9b   :  { %233 = vrot.lane.b32.xlu0 %v1646_v22, %s1773_s29 }
  0x9d   :  { %v1652_v29 = vpop.eup %1651 }
  0x9e   :  { %v108_v30 = vmul.f32 %v1652_v29, %v106_v26  ;;  %v1654_v32 = vpop.eup %1653  ;;  %vm113_vm2 = vweird.f32 %v1652_v29  ;;  %v1585_v26 = vld [vmem:[%s2236_s1 + $0x6] sm:$0x1] }
  0x9f   :  { %v212_v34 = vmul.f32 %v1654_v32, %v210_v28  ;;  %vm114_vm4 = vmor %vm112_vm3, %vm113_vm2  ;;  %vm217_vm7 = vweird.f32 %v1654_v32  ;;  %v366_v27 = vunpack.c.l.bf16 %v1585_v26 }
  0xa0   :  { %v109_v31 = vsub.f32 1.0, %v108_v30  ;;  %vm218_vm8 = vmor %vm216_vm6, %vm217_vm7 }
  0xa1   :  { %v213_v36 = vsub.f32 1.0, %v212_v34 }
  0xa2   :  { %v110_v33 = vmul.f32 %v1652_v29, %v109_v31 }
  0xa3   :  { %v214_v40 = vmul.f32 %v1654_v32, %v213_v36 }
  0xa4   :  { %v111_v35 = vadd.f32 %v1652_v29, %v110_v33 }
  0xa5   :  { %v215_v45 = vadd.f32 %v1654_v32, %v214_v40 }
  0xa6   :  { %v115_v39 = vsel %vm114_vm4, %v1652_v29, %v111_v35 }
  0xa7   :  { %v120_v42 = vsel %vm117_vm5, %v119_v41, %v115_v39  ;;  %v219_v49 = vsel %vm218_vm8, %v1654_v32, %v215_v45 }
  0xa8   :  { %v224_v50 = vsel %vm221_vm9, %v223_v48, %v219_v49  ;;  %v127_v59 = vmul.f32 %v125_v57, %v120_v42 }
  0xa9   :  { %v231_v54 = vmul.f32 %v229_v53, %v224_v50 }
 0x105   :  { %v130_v44 = vpop.permute.xlu0 %129 }
 0x106   :  { %v132_v47 = vmul.f32 %v130_v44, %v120_v42 }
 0x108   :  { %134 = vrot.lane.b32.xlu1 %v132_v47, %s1772_s2 }
 0x10d   :  { %v234_v51 = vpop.permute.xlu0 %233 }
 0x10e   :  { %v236_v52 = vmul.f32 %v234_v51, %v224_v50 }
 0x110   :  { %238 = vrot.lane.b32.xlu2 %v236_v52, %s1772_s2 }
 0x16a   :  { %v239_v55 = vpop.permute.xlu2 %238 }
 0x16b   :  { %v241_v56 = vadd.f32 %v239_v55, %v231_v54 }
 0x16d   :  { %1655 = vtanh.f32 %v241_v56 }
 0x173   :  { %v1656_v58 = vpop.eup %1655 }
 0x174   :  { %244 = vrot.lane.b32.xlu1 %v1656_v58, %s1773_s29 }
 0x17a   :  { %v135_v60 = vpop.permute.xlu1 %134 }
 0x17b   :  { %v137_v61 = vadd.f32 %v135_v60, %v127_v59 }
 0x17d   :  { %1657 = vtanh.f32 %v137_v61 }
 0x183   :  { %v1658_v62 = vpop.eup %1657 }
 0x184   :  { %140 = vrot.lane.b32.xlu0 %v1658_v62, %s1773_s29 }
 0x1e6   :  { %v245_v6 = vpop.permute.xlu1 %244 }
 0x1e7   :  { %v1869_v7 = vmul.f32 %v245_v6, %v224_v50 }
 0x1f6   :  { %v141_v63 = vpop.permute.xlu0 %140 }
 0x1f7   :  { %v1865_v1 = vmul.f32 %v141_v63, %v120_v42 }
 0x1f9   :  { %145 = vst [vmem:[#allocation1] ss:$4 sm:$0xff] %v1865_v1 }
 0x200   :  { %v146_v5 = vld.sshfl [vmem:[#allocation1] sm:$0xff pattern:$0x73625140] }
 0x201   :  { %153 = vst [vmem:[#allocation1] ss:$4 sm:$0xff] %v137_v61  ;;  %147 = vrot.lane.b32.xlu2 %v146_v5, %s1772_s2 }
 0x208   :  { %v154_v8 = vld.sshfl [vmem:[#allocation1] sm:$0xff pattern:$0x73625140] }
 0x209   :  { %249 = vst [vmem:[#allocation1] ss:$4 sm:$0xff] %v1869_v7  ;;  %155 = vrot.lane.b32.xlu1 %v154_v8, %s1774_s30 }
 0x210   :  { %v250_v9 = vld.sshfl [vmem:[#allocation1] sm:$0xff pattern:$0x73625140] }
 0x211   :  { %256 = vst [vmem:[#allocation1] ss:$4 sm:$0xff] %v241_v56  ;;  %251 = vrot.lane.b32.xlu0 %v250_v9, %s1772_s2 }
 0x218   :  { %v257_v10 = vld.sshfl [vmem:[#allocation1] sm:$0xff pattern:$0x73625140] }
 0x219   :  { %258 = vrot.lane.b32.xlu0 %v257_v10, %s1774_s30 }
 0x25b   :  { %v148_v11 = vpop.permute.xlu2 %147 }
 0x25c   :  { %151 = vst.msk [vmem:[#allocation2] sm:$0x3] %vm55_vm0, %v148_v11 }
 0x263   :  { %v277_v12 = vld [vmem:[#allocation2] sm:$0x3] }
 0x264   :  { %v278_v13 = vpack.c.bf16 %v277_v12, %v277_v12 }
 0x266   :  { %1582 = vmatmul.msk.bf16.vlgmr.msra.gmra.mxu2 %vm84_vm1, %v278_v13 }
 0x267   :  { %1008 = vmatpush.bf16.msra.mxu2 %v1808_v0 }
 0x26b   :  { %1009 = vmatpush.bf16.msra.mxu2 %v1821_v3 }
 0x27b   :  { %v156_v14 = vpop.permute.xlu1 %155 }
 0x27c   :  { %158 = vst.msk [vmem:[#allocation3] sm:$0x3] %vm55_vm0, %v156_v14 }
 0x283   :  { %v252_v15 = vpop.permute.xlu0 %251  ;;  %v296_v25 = vld [vmem:[#allocation3] sm:$0x3] }
 0x284   :  { %254 = vst.msk [vmem:[#allocation4] sm:$0x3] %vm55_vm0, %v252_v15 }
 0x28b   :  { %v259_v16 = vpop.permute.xlu0 %258  ;;  %v367_v17 = vld [vmem:[#allocation4] sm:$0x3] }
 0x28c   :  { %261 = vst.msk [vmem:[#allocation5] sm:$0x3] %vm55_vm0, %v259_v16  ;;  %v368_v18 = vpack.c.bf16 %v367_v17, %v367_v17 }
 0x28e   :  { %1586 = vmatmul.msk.bf16.vlgmr.msra.gmra.mxu3 %vm84_vm1, %v368_v18 }
 0x28f   :  { %1098 = vmatpush.bf16.msra.mxu3 %v1814_v2 }
 0x293   :  { %1099 = vmatpush.bf16.msra.mxu3 %v1828_v4  ;;  %v386_v33 = vld [vmem:[#allocation5] sm:$0x3] }
 0x2e9   :  { %v291_v21 = vpop.f32.mrf.mxu2 }
 0x2ea   :  { %v295_v22 = vadd.f32 %v291_v21, %v276_v20 }
 0x2ec   :  { %1659 = vtanh.f32 %v295_v22  ;;  %v1583_v32 = vmul.f32 -1.442695, %v295_v22 }
 0x2f1   :  { %v293_v23 = vpop.f32.mrf.mxu2 }
 0x2f2   :  { %v1660_v24 = vpop.eup %1659 }
 0x2f3   :  { %323 = vrot.lane.b32.xlu2 %v1660_v24, %s1773_s29 }
 0x2fb   :  { %318 = vrot.lane.b32.xlu2 %v296_v25, %s1772_s2 }
 0x311   :  { %v381_v28 = vpop.f32.mrf.mxu3 }
 0x312   :  { %v385_v29 = vadd.f32 %v381_v28, %v366_v27 }
 0x314   :  { %1661 = vtanh.f32 %v385_v29  ;;  %v1587_v48 = vmul.f32 -1.442695, %v385_v29 }
 0x315   :  { %1663 = vpow2.f32 %v1583_v32 }
 0x319   :  { %v383_v30 = vpop.f32.mrf.mxu3 }
 0x31a   :  { %v1662_v31 = vpop.eup %1661 }
 0x31b   :  { %413 = vrot.lane.b32.xlu1 %v1662_v31, %s1773_s29  ;;  %v1664_v34 = vpop.eup %1663  ;;  %v1589_v31 = vld [vmem:[%s2235_s0 + $0x2] sm:$0x1] }
 0x31c   :  { %v300_v35 = vadd.f32 1.0, %v1664_v34  ;;  %v456_v32 = vunpack.c.l.bf16 %v1589_v31 }
 0x31e   :  { %1665 = vrcp.f32 %v300_v35  ;;  %v312_v41 = vand.u32 2147483648, %v300_v35  ;;  %vm306_vm11 = vweird.f32 %v300_v35  ;;  %v310_v42 = vand.u32 2147483647, %v300_v35 }
 0x31f   :  { %1667 = vpow2.f32 %v1587_v48 }
 0x320   :  { %v313_v44 = vor.u32 1.1754944e-38, %v312_v41  ;;  %vm311_vm13 = vcmp.eq.f32.partialorder %v310_v42, 8.507059e+37 }
 0x323   :  { %408 = vrot.lane.b32.xlu1 %v386_v33, %s1772_s2 }
 0x324   :  { %v1666_v36 = vpop.eup %1665 }
 0x325   :  { %v302_v37 = vmul.f32 %v1666_v36, %v300_v35  ;;  %vm307_vm10 = vweird.f32 %v1666_v36  ;;  %v1668_v49 = vpop.eup %1667 }
 0x326   :  { %vm308_vm12 = vmor %vm306_vm11, %vm307_vm10  ;;  %v390_v50 = vadd.f32 1.0, %v1668_v49 }
 0x327   :  { %v303_v38 = vsub.f32 1.0, %v302_v37 }
 0x328   :  { %1669 = vrcp.f32 %v390_v50  ;;  %v402_v56 = vand.u32 2147483648, %v390_v50  ;;  %vm396_vm15 = vweird.f32 %v390_v50  ;;  %v400_v57 = vand.u32 2147483647, %v390_v50 }
 0x329   :  { %v304_v39 = vmul.f32 %v1666_v36, %v303_v38 }
 0x32a   :  { %v403_v59 = vor.u32 1.1754944e-38, %v402_v56  ;;  %vm401_vm3 = vcmp.eq.f32.partialorder %v400_v57, 8.507059e+37 }
 0x32b   :  { %v305_v40 = vadd.f32 %v1666_v36, %v304_v39  ;;  %v1593_v39 = vld [vmem:[%s2236_s1 + $0x5] sm:$0x1] }
 0x32d   :  { %v309_v43 = vsel %vm308_vm12, %v1666_v36, %v305_v40  ;;  %v546_v40 = vunpack.c.l.bf16 %v1593_v39 }
 0x32e   :  { %v314_v46 = vsel %vm311_vm13, %v313_v44, %v309_v43  ;;  %v1670_v51 = vpop.eup %1669 }
 0x32f   :  { %v392_v52 = vmul.f32 %v1670_v51, %v390_v50  ;;  %vm397_vm14 = vweird.f32 %v1670_v51 }
 0x330   :  { %vm398_vm2 = vmor %vm396_vm15, %vm397_vm14 }
 0x331   :  { %v393_v53 = vsub.f32 1.0, %v392_v52 }
 0x333   :  { %v394_v54 = vmul.f32 %v1670_v51, %v393_v53 }
 0x335   :  { %v395_v55 = vadd.f32 %v1670_v51, %v394_v54 }
 0x337   :  { %v399_v58 = vsel %vm398_vm2, %v1670_v51, %v395_v55 }
 0x338   :  { %v404_v61 = vsel %vm401_vm3, %v403_v59, %v399_v58 }
 0x34d   :  { %v324_v45 = vpop.permute.xlu2 %323 }
 0x34e   :  { %v326_v47 = vmul.f32 %v324_v45, %v314_v46 }
 0x350   :  { %328 = vrot.lane.b32.xlu0 %v326_v47, %s1772_s2 }
 0x355   :  { %v319_v63 = vpop.permute.xlu2 %318 }
 0x356   :  { %v321_v5 = vmul.f32 %v319_v63, %v314_v46 }
 0x38d   :  { %v414_v60 = vpop.permute.xlu1 %413 }
 0x38e   :  { %v416_v62 = vmul.f32 %v414_v60, %v404_v61 }
 0x390   :  { %418 = vrot.lane.b32.xlu2 %v416_v62, %s1772_s2 }
 0x395   :  { %v409_v10 = vpop.permute.xlu1 %408 }
 0x396   :  { %v411_v11 = vmul.f32 %v409_v10, %v404_v61 }
 0x3c2   :  { %v329_v6 = vpop.permute.xlu0 %328 }
 0x3c3   :  { %v331_v8 = vadd.f32 %v329_v6, %v321_v5 }
 0x3c5   :  { %1671 = vtanh.f32 %v331_v8 }
 0x3cb   :  { %v1672_v9 = vpop.eup %1671 }
 0x3cc   :  { %334 = vrot.lane.b32.xlu0 %v1672_v9, %s1773_s29 }
 0x3ea   :  { %v419_v12 = vpop.permute.xlu2 %418 }
 0x3eb   :  { %v421_v13 = vadd.f32 %v419_v12, %v411_v11 }
 0x3ed   :  { %1673 = vtanh.f32 %v421_v13 }
 0x3f3   :  { %v1674_v14 = vpop.eup %1673 }
 0x3f4   :  { %424 = vrot.lane.b32.xlu1 %v1674_v14, %s1773_s29 }
 0x43e   :  { %v335_v15 = vpop.permute.xlu0 %334 }
 0x43f   :  { %v1899_v16 = vmul.f32 %v335_v15, %v314_v46 }
 0x441   :  { %339 = vst [vmem:[#allocation1] ss:$4 sm:$0xff] %v1899_v16 }
 0x448   :  { %v340_v17 = vld.sshfl [vmem:[#allocation1] sm:$0xff pattern:$0x73625140] }
 0x449   :  { %346 = vst [vmem:[#allocation1] ss:$4 sm:$0xff] %v331_v8  ;;  %341 = vrot.lane.b32.xlu2 %v340_v17, %s1772_s2 }
 0x450   :  { %v347_v18 = vld.sshfl [vmem:[#allocation1] sm:$0xff pattern:$0x73625140] }
 0x451   :  { %348 = vrot.lane.b32.xlu1 %v347_v18, %s1774_s30 }
 0x466   :  { %v425_v19 = vpop.permute.xlu1 %424 }
 0x467   :  { %v1904_v20 = vmul.f32 %v425_v19, %v404_v61 }
 0x469   :  { %429 = vst [vmem:[#allocation1] ss:$4 sm:$0xff] %v1904_v20 }
 0x470   :  { %v430_v21 = vld.sshfl [vmem:[#allocation1] sm:$0xff pattern:$0x73625140] }
 0x471   :  { %436 = vst [vmem:[#allocation1] ss:$4 sm:$0xff] %v421_v13  ;;  %431 = vrot.lane.b32.xlu0 %v430_v21, %s1772_s2 }
 0x478   :  { %v437_v22 = vld.sshfl [vmem:[#allocation1] sm:$0xff pattern:$0x73625140] }
 0x479   :  { %438 = vrot.lane.b32.xlu0 %v437_v22, %s1774_s30 }
 0x4a3   :  { %v342_v23 = vpop.permute.xlu2 %341 }
 0x4a4   :  { %344 = vst.msk [vmem:[#allocation2] sm:$0x3] %vm55_vm0, %v342_v23 }
 0x4ab   :  { %v457_v24 = vld [vmem:[#allocation2] sm:$0x3] }
 0x4ac   :  { %v458_v25 = vpack.c.bf16 %v457_v24, %v457_v24 }
 0x4ae   :  { %1590 = vmatmul.msk.bf16.vlgmr.msrb.gmra.mxu0 %vm84_vm1, %v458_v25 }
 0x4af   :  { %1188 = vmatpush.bf16.msrb.mxu0 %v1808_v0 }
 0x4b3   :  { %1189 = vmatpush.bf16.msrb.mxu0 %v1821_v3 }
 0x4c3   :  { %v349_v26 = vpop.permute.xlu1 %348 }
 0x4c4   :  { %351 = vst.msk [vmem:[#allocation3] sm:$0x3] %vm55_vm0, %v349_v26 }
 0x4cb   :  { %v476_v37 = vld [vmem:[#allocation3] sm:$0x3] }
 0x4e3   :  { %v432_v27 = vpop.permute.xlu0 %431 }
 0x4e4   :  { %434 = vst.msk [vmem:[#allocation4] sm:$0x3] %vm55_vm0, %v432_v27 }
 0x4eb   :  { %v439_v28 = vpop.permute.xlu0 %438  ;;  %v547_v29 = vld [vmem:[#allocation4] sm:$0x3] }
 0x4ec   :  { %441 = vst.msk [vmem:[#allocation5] sm:$0x3] %vm55_vm0, %v439_v28  ;;  %v548_v30 = vpack.c.bf16 %v547_v29, %v547_v29 }
 0x4ee   :  { %1594 = vmatmul.msk.bf16.vlgmr.msrb.gmra.mxu1 %vm84_vm1, %v548_v30 }
 0x4ef   :  { %1278 = vmatpush.bf16.msrb.mxu1 %v1814_v2 }
 0x4f3   :  { %1279 = vmatpush.bf16.msrb.mxu1 %v1828_v4  ;;  %v566_v48 = vld [vmem:[#allocation5] sm:$0x3] }
 0x52b   :  { %v471_v33 = vpop.f32.mrf.mxu0 }
 0x52c   :  { %v475_v34 = vadd.f32 %v471_v33, %v456_v32 }
 0x52e   :  { %1675 = vtanh.f32 %v475_v34  ;;  %v1591_v38 = vmul.f32 -1.442695, %v475_v34 }
 0x530   :  { %1677 = vpow2.f32 %v1591_v38 }
 0x533   :  { %v473_v35 = vpop.f32.mrf.mxu0 }
 0x534   :  { %v1676_v36 = vpop.eup %1675 }
 0x535   :  { %503 = vrot.lane.b32.xlu2 %v1676_v36, %s1773_s29 }
 0x536   :  { %v1678_v42 = vpop.eup %1677 }
 0x537   :  { %v480_v44 = vadd.f32 1.0, %v1678_v42 }
 0x539   :  { %v492_v53 = vand.u32 2147483648, %v480_v44  ;;  %vm486_vm5 = vweird.f32 %v480_v44  ;;  %v490_v54 = vand.u32 2147483647, %v480_v44 }
 0x53b   :  { %v493_v56 = vor.u32 1.1754944e-38, %v492_v53  ;;  %vm491_vm7 = vcmp.eq.f32.partialorder %v490_v54, 8.507059e+37  ;;  %v1601_v53 = vld [vmem:[%s2236_s1 + $0x4] sm:$0x1] }
 0x53c   :  { %v726_v54 = vunpack.c.l.bf16 %v1601_v53  ;;  %v1605_v53 = vld [vmem:[%s2235_s0 + $0x4] sm:$0x1] }
 0x53d   :  { %498 = vrot.lane.b32.xlu2 %v476_v37, %s1772_s2 }
 0x56b   :  { %v561_v41 = vpop.f32.mrf.mxu1 }
 0x56c   :  { %v565_v43 = vadd.f32 %v561_v41, %v546_v40 }
 0x56e   :  { %1679 = vtanh.f32 %v565_v43  ;;  %v1595_v60 = vmul.f32 -1.442695, %v565_v43 }
 0x56f   :  { %1681 = vrcp.f32 %v480_v44 }
 0x570   :  { %1683 = vpow2.f32 %v1595_v60 }
 0x573   :  { %v563_v45 = vpop.f32.mrf.mxu1 }
 0x574   :  { %v1680_v46 = vpop.eup %1679 }
 0x575   :  { %593 = vrot.lane.b32.xlu1 %v1680_v46, %s1773_s29  ;;  %v1682_v47 = vpop.eup %1681 }
 0x576   :  { %v482_v49 = vmul.f32 %v1682_v47, %v480_v44  ;;  %vm487_vm4 = vweird.f32 %v1682_v47  ;;  %v1684_v61 = vpop.eup %1683 }
 0x577   :  { %vm488_vm6 = vmor %vm486_vm5, %vm487_vm4  ;;  %v570_v62 = vadd.f32 1.0, %v1684_v61 }
 0x578   :  { %v483_v50 = vsub.f32 1.0, %v482_v49 }
 0x579   :  { %1685 = vrcp.f32 %v570_v62  ;;  %v582_v10 = vand.u32 2147483648, %v570_v62  ;;  %vm576_vm9 = vweird.f32 %v570_v62  ;;  %v580_v11 = vand.u32 2147483647, %v570_v62 }
 0x57a   :  { %v484_v51 = vmul.f32 %v1682_v47, %v483_v50 }
 0x57b   :  { %v583_v13 = vor.u32 1.1754944e-38, %v582_v10  ;;  %vm581_vm11 = vcmp.eq.f32.partialorder %v580_v11, 8.507059e+37 }
 0x57c   :  { %v485_v52 = vadd.f32 %v1682_v47, %v484_v51 }
 0x57d   :  { %588 = vrot.lane.b32.xlu1 %v566_v48, %s1772_s2 }
 0x57e   :  { %v489_v55 = vsel %vm488_vm6, %v1682_v47, %v485_v52 }
 0x57f   :  { %v494_v58 = vsel %vm491_vm7, %v493_v56, %v489_v55  ;;  %v1686_v63 = vpop.eup %1685 }
 0x580   :  { %v572_v5 = vmul.f32 %v1686_v63, %v570_v62  ;;  %vm577_vm8 = vweird.f32 %v1686_v63 }
 0x581   :  { %vm578_vm10 = vmor %vm576_vm9, %vm577_vm8 }
 0x582   :  { %v573_v6 = vsub.f32 1.0, %v572_v5 }
 0x584   :  { %v574_v8 = vmul.f32 %v1686_v63, %v573_v6 }
 0x586   :  { %v575_v9 = vadd.f32 %v1686_v63, %v574_v8 }
 0x588   :  { %v579_v12 = vsel %vm578_vm10, %v1686_v63, %v575_v9 }
 0x589   :  { %v584_v15 = vsel %vm581_vm11, %v583_v13, %v579_v12 }
 0x58f   :  { %v504_v57 = vpop.permute.xlu2 %503 }
 0x590   :  { %v506_v59 = vmul.f32 %v504_v57, %v494_v58 }
 0x592   :  { %508 = vrot.lane.b32.xlu0 %v506_v59, %s1772_s2 }
 0x597   :  { %v499_v18 = vpop.permute.xlu2 %498 }
 0x598   :  { %v501_v19 = vmul.f32 %v499_v18, %v494_v58 }
 0x5e7   :  { %v594_v14 = vpop.permute.xlu1 %593 }
 0x5e8   :  { %v596_v17 = vmul.f32 %v594_v14, %v584_v15 }
 0x5ea   :  { %598 = vrot.lane.b32.xlu2 %v596_v17, %s1772_s2 }
 0x5ef   :  { %v589_v24 = vpop.permute.xlu1 %588 }
 0x5f0   :  { %v591_v25 = vmul.f32 %v589_v24, %v584_v15 }
 0x604   :  { %v509_v21 = vpop.permute.xlu0 %508 }
 0x605   :  { %v511_v22 = vadd.f32 %v509_v21, %v501_v19 }
 0x607   :  { %1687 = vtanh.f32 %v511_v22 }
 0x60d   :  { %v1688_v23 = vpop.eup %1687 }
 0x60e   :  { %514 = vrot.lane.b32.xlu0 %v1688_v23, %s1773_s29 }
 0x644   :  { %v599_v26 = vpop.permute.xlu2 %598 }
 0x645   :  { %v601_v27 = vadd.f32 %v599_v26, %v591_v25 }
 0x647   :  { %1689 = vtanh.f32 %v601_v27 }
 0x64d   :  { %v1690_v28 = vpop.eup %1689 }
 0x64e   :  { %604 = vrot.lane.b32.xlu1 %v1690_v28, %s1773_s29 }
 0x680   :  { %v515_v29 = vpop.permute.xlu0 %514 }
 0x681   :  { %v1933_v30 = vmul.f32 %v515_v29, %v494_v58 }
 0x683   :  { %519 = vst [vmem:[#allocation1] ss:$4 sm:$0xff] %v1933_v30 }
 0x68a   :  { %v520_v31 = vld.sshfl [vmem:[#allocation1] sm:$0xff pattern:$0x73625140] }
 0x68b   :  { %526 = vst [vmem:[#allocation1] ss:$4 sm:$0xff] %v511_v22  ;;  %521 = vrot.lane.b32.xlu2 %v520_v31, %s1772_s2 }
 0x692   :  { %v527_v32 = vld.sshfl [vmem:[#allocation1] sm:$0xff pattern:$0x73625140] }
 0x693   :  { %528 = vrot.lane.b32.xlu1 %v527_v32, %s1774_s30 }
 0x6c0   :  { %v605_v33 = vpop.permute.xlu1 %604 }
 0x6c1   :  { %v1938_v34 = vmul.f32 %v605_v33, %v584_v15 }
 0x6c3   :  { %609 = vst [vmem:[#allocation1] ss:$4 sm:$0xff] %v1938_v34 }
 0x6ca   :  { %v610_v35 = vld.sshfl [vmem:[#allocation1] sm:$0xff pattern:$0x73625140] }
 0x6cb   :  { %616 = vst [vmem:[#allocation1] ss:$4 sm:$0xff] %v601_v27  ;;  %611 = vrot.lane.b32.xlu0 %v610_v35, %s1772_s2 }
 0x6d2   :  { %v617_v36 = vld.sshfl [vmem:[#allocation1] sm:$0xff pattern:$0x73625140] }
 0x6d3   :  { %618 = vrot.lane.b32.xlu0 %v617_v36, %s1774_s30 }
 0x6e5   :  { %v522_v37 = vpop.permute.xlu2 %521 }
 0x6e6   :  { %524 = vst.msk [vmem:[#allocation2] sm:$0x3] %vm55_vm0, %v522_v37 }
 0x6ed   :  { %v637_v38 = vld [vmem:[#allocation2] sm:$0x3] }
 0x6ee   :  { %v638_v39 = vpack.c.bf16 %v637_v38, %v637_v38 }
 0x6f0   :  { %1598 = vmatmul.msk.bf16.vlgmr.msrb.gmra.mxu2 %vm84_vm1, %v638_v39 }
 0x6f1   :  { %1368 = vmatpush.bf16.msrb.mxu2 %v1808_v0  ;;  %v1597_v0 = vld [vmem:[%s2235_s0 + $0x3] sm:$0x1] }
 0x6f5   :  { %1369 = vmatpush.bf16.msrb.mxu2 %v1821_v3  ;;  %v636_v3 = vunpack.c.l.bf16 %v1597_v0 }
 0x705   :  { %v529_v40 = vpop.permute.xlu1 %528 }
 0x706   :  { %531 = vst.msk [vmem:[#allocation3] sm:$0x3] %vm55_vm0, %v529_v40 }
 0x70d   :  { %v656_v49 = vld [vmem:[#allocation3] sm:$0x3] }
 0x73d   :  { %v612_v41 = vpop.permute.xlu0 %611 }
 0x73e   :  { %614 = vst.msk [vmem:[#allocation4] sm:$0x3] %vm55_vm0, %v612_v41 }
 0x745   :  { %v619_v42 = vpop.permute.xlu0 %618  ;;  %v727_v43 = vld [vmem:[#allocation4] sm:$0x3] }
 0x746   :  { %621 = vst.msk [vmem:[#allocation5] sm:$0x3] %vm55_vm0, %v619_v42  ;;  %v728_v44 = vpack.c.bf16 %v727_v43, %v727_v43 }
 0x748   :  { %1602 = vmatmul.msk.bf16.vlgmr.msrb.gmra.mxu3 %vm84_vm1, %v728_v44 }
 0x749   :  { %1457 = vmatpush.bf16.msrb.mxu3 %v1814_v2 }
 0x74d   :  { %1458 = vmatpush.bf16.msrb.mxu3 %v1828_v4  ;;  %v746_v11 = vld [vmem:[#allocation5] sm:$0x3] }
 0x773   :  { %v651_v45 = vpop.f32.mrf.mxu2 }
 0x774   :  { %v655_v46 = vadd.f32 %v651_v45, %v636_v3 }
 0x776   :  { %1691 = vtanh.f32 %v655_v46  ;;  %v1599_v50 = vmul.f32 -1.442695, %v655_v46 }
 0x778   :  { %1693 = vpow2.f32 %v1599_v50 }
 0x77b   :  { %v653_v47 = vpop.f32.mrf.mxu2 }
 0x77c   :  { %v1692_v48 = vpop.eup %1691 }
 0x77d   :  { %683 = vrot.lane.b32.xlu2 %v1692_v48, %s1773_s29 }
 0x77e   :  { %v1694_v2 = vpop.eup %1693 }
 0x77f   :  { %v660_v51 = vadd.f32 1.0, %v1694_v2 }
 0x781   :  { %1695 = vrcp.f32 %v660_v51  ;;  %v672_v60 = vand.u32 2147483648, %v660_v51  ;;  %vm666_vm13 = vweird.f32 %v660_v51  ;;  %v670_v61 = vand.u32 2147483647, %v660_v51 }
 0x783   :  { %v673_v6 = vor.u32 1.1754944e-38, %v672_v60  ;;  %vm671_vm15 = vcmp.eq.f32.partialorder %v670_v61, 8.507059e+37 }
 0x785   :  { %678 = vrot.lane.b32.xlu2 %v656_v49, %s1772_s2 }
 0x787   :  { %v1696_v4 = vpop.eup %1695 }
 0x788   :  { %v662_v52 = vmul.f32 %v1696_v4, %v660_v51  ;;  %vm667_vm12 = vweird.f32 %v1696_v4 }
 0x789   :  { %vm668_vm14 = vmor %vm666_vm13, %vm667_vm12 }
 0x78a   :  { %v663_v55 = vsub.f32 1.0, %v662_v52 }
 0x78c   :  { %v664_v58 = vmul.f32 %v1696_v4, %v663_v55 }
 0x78e   :  { %v665_v59 = vadd.f32 %v1696_v4, %v664_v58 }
 0x790   :  { %v669_v5 = vsel %vm668_vm14, %v1696_v4, %v665_v59 }
 0x791   :  { %v674_v9 = vsel %vm671_vm15, %v673_v6, %v669_v5 }
 0x7cb   :  { %v741_v56 = vpop.f32.mrf.mxu3 }
 0x7cc   :  { %v745_v57 = vadd.f32 %v741_v56, %v726_v54  ;;  %v816_v54 = vunpack.c.l.bf16 %v1605_v53 }
 0x7ce   :  { %1697 = vtanh.f32 %v745_v57  ;;  %v1603_v12 = vmul.f32 -1.442695, %v745_v57 }
 0x7d0   :  { %1699 = vpow2.f32 %v1603_v12 }
 0x7d3   :  { %v743_v62 = vpop.f32.mrf.mxu3 }
 0x7d4   :  { %v1698_v63 = vpop.eup %1697 }
 0x7d5   :  { %773 = vrot.lane.b32.xlu1 %v1698_v63, %s1773_s29 }
 0x7d6   :  { %v1700_v13 = vpop.eup %1699 }
 0x7d7   :  { %v684_v8 = vpop.permute.xlu2 %683  ;;  %v750_v14 = vadd.f32 1.0, %v1700_v13 }
 0x7d8   :  { %v686_v10 = vmul.f32 %v684_v8, %v674_v9 }
 0x7d9   :  { %1701 = vrcp.f32 %v750_v14  ;;  %v762_v22 = vand.u32 2147483648, %v750_v14  ;;  %vm756_vm3 = vweird.f32 %v750_v14  ;;  %v760_v23 = vand.u32 2147483647, %v750_v14 }
 0x7da   :  { %688 = vrot.lane.b32.xlu0 %v686_v10, %s1772_s2 }
 0x7db   :  { %v763_v25 = vor.u32 1.1754944e-38, %v762_v22  ;;  %vm761_vm5 = vcmp.eq.f32.partialorder %v760_v23, 8.507059e+37 }
 0x7dd   :  { %768 = vrot.lane.b32.xlu1 %v746_v11, %s1772_s2 }
 0x7df   :  { %v1702_v15 = vpop.eup %1701  ;;  %v679_v28 = vpop.permute.xlu2 %678 }
 0x7e0   :  { %v752_v17 = vmul.f32 %v1702_v15, %v750_v14  ;;  %vm757_vm2 = vweird.f32 %v1702_v15  ;;  %v681_v31 = vmul.f32 %v679_v28, %v674_v9 }
 0x7e1   :  { %vm758_vm4 = vmor %vm756_vm3, %vm757_vm2 }
 0x7e2   :  { %v753_v18 = vsub.f32 1.0, %v752_v17 }
 0x7e4   :  { %v754_v19 = vmul.f32 %v1702_v15, %v753_v18  ;;  %v1609_v18 = vld [vmem:[%s2236_s1 + $0x3] sm:$0x1] }
 0x7e6   :  { %v755_v21 = vadd.f32 %v1702_v15, %v754_v19  ;;  %v906_v19 = vunpack.c.l.bf16 %v1609_v18 }
 0x7e8   :  { %v759_v24 = vsel %vm758_vm4, %v1702_v15, %v755_v21 }
 0x7e9   :  { %v764_v27 = vsel %vm761_vm5, %v763_v25, %v759_v24 }
 0x847   :  { %v774_v26 = vpop.permute.xlu1 %773 }
 0x848   :  { %v776_v29 = vmul.f32 %v774_v26, %v764_v27 }
 0x84a   :  { %778 = vrot.lane.b32.xlu2 %v776_v29, %s1772_s2 }
 0x84c   :  { %v689_v32 = vpop.permute.xlu0 %688 }
 0x84d   :  { %v691_v33 = vadd.f32 %v689_v32, %v681_v31 }
 0x84f   :  { %1703 = vtanh.f32 %v691_v33  ;;  %v769_v36 = vpop.permute.xlu1 %768 }
 0x850   :  { %v771_v37 = vmul.f32 %v769_v36, %v764_v27 }
 0x855   :  { %v1704_v35 = vpop.eup %1703 }
 0x856   :  { %694 = vrot.lane.b32.xlu0 %v1704_v35, %s1773_s29 }
 0x8a4   :  { %v779_v38 = vpop.permute.xlu2 %778 }
 0x8a5   :  { %v781_v39 = vadd.f32 %v779_v38, %v771_v37 }
 0x8a7   :  { %1705 = vtanh.f32 %v781_v39 }
 0x8ad   :  { %v1706_v40 = vpop.eup %1705 }
 0x8ae   :  { %784 = vrot.lane.b32.xlu1 %v1706_v40, %s1773_s29 }
 0x8c8   :  { %v695_v41 = vpop.permute.xlu0 %694 }
 0x8c9   :  { %v1967_v42 = vmul.f32 %v695_v41, %v674_v9 }
 0x8cb   :  { %699 = vst [vmem:[#allocation1] ss:$4 sm:$0xff] %v1967_v42 }
 0x8d2   :  { %v700_v43 = vld.sshfl [vmem:[#allocation1] sm:$0xff pattern:$0x73625140] }
 0x8d3   :  { %701 = vrot.lane.b32.xlu2 %v700_v43, %s1772_s2  ;;  %706 = vst [vmem:[#allocation1] ss:$4 sm:$0xff] %v691_v33 }
 0x8da   :  { %v707_v44 = vld.sshfl [vmem:[#allocation1] sm:$0xff pattern:$0x73625140] }
 0x8db   :  { %708 = vrot.lane.b32.xlu1 %v707_v44, %s1774_s30 }
 0x920   :  { %v785_v0 = vpop.permute.xlu1 %784 }
 0x921   :  { %v1972_v3 = vmul.f32 %v785_v0, %v764_v27 }
 0x923   :  { %789 = vst [vmem:[#allocation1] ss:$4 sm:$0xff] %v1972_v3 }
 0x92a   :  { %v790_v45 = vld.sshfl [vmem:[#allocation1] sm:$0xff pattern:$0x73625140] }
 0x92b   :  { %791 = vrot.lane.b32.xlu0 %v790_v45, %s1772_s2  ;;  %796 = vst [vmem:[#allocation1] ss:$4 sm:$0xff] %v781_v39 }
 0x92d   :  { %v702_v46 = vpop.permute.xlu2 %701 }
 0x92e   :  { %704 = vst.msk [vmem:[#allocation2] sm:$0x3] %vm55_vm0, %v702_v46 }
 0x932   :  { %v797_v47 = vld.sshfl [vmem:[#allocation1] sm:$0xff pattern:$0x73625140] }
 0x933   :  { %798 = vrot.lane.b32.xlu0 %v797_v47, %s1774_s30 }
 0x935   :  { %v817_v48 = vld [vmem:[#allocation2] sm:$0x3] }
 0x936   :  { %v818_v49 = vpack.c.bf16 %v817_v48, %v817_v48 }
 0x938   :  { %1606 = vmatmul.msk.bf16.vlgmr.msra.gmra.mxu0 %vm84_vm1, %v818_v49 }
 0x94d   :  { %v709_v50 = vpop.permute.xlu1 %708 }
 0x94e   :  { %711 = vst.msk [vmem:[#allocation3] sm:$0x3] %vm55_vm0, %v709_v50 }
 0x955   :  { %v836_v59 = vld [vmem:[#allocation3] sm:$0x3] }
 0x99d   :  { %v792_v2 = vpop.permute.xlu0 %791 }
 0x99e   :  { %794 = vst.msk [vmem:[#allocation4] sm:$0x3] %vm55_vm0, %v792_v2 }
 0x9a5   :  { %v799_v51 = vpop.permute.xlu0 %798  ;;  %v907_v4 = vld [vmem:[#allocation4] sm:$0x3] }
 0x9a6   :  { %801 = vst.msk [vmem:[#allocation5] sm:$0x3] %vm55_vm0, %v799_v51  ;;  %v908_v52 = vpack.c.bf16 %v907_v4, %v907_v4 }
 0x9a8   :  { %1610 = vmatmul.msk.bf16.vlgmr.msra.gmra.mxu1 %vm84_vm1, %v908_v52 }
 0x9ad   :  { %v926_v25 = vld [vmem:[#allocation5] sm:$0x3] }
 0x9b5   :  { %v831_v55 = vpop.f32.mrf.mxu0 }
 0x9b6   :  { %v835_v56 = vadd.f32 %v831_v55, %v816_v54 }
 0x9b8   :  { %1707 = vtanh.f32 %v835_v56  ;;  %v1607_v60 = vmul.f32 -1.442695, %v835_v56 }
 0x9ba   :  { %1709 = vpow2.f32 %v1607_v60 }
 0x9bd   :  { %v833_v57 = vpop.f32.mrf.mxu0 }
 0x9be   :  { %v1708_v58 = vpop.eup %1707 }
 0x9bf   :  { %863 = vrot.lane.b32.xlu2 %v1708_v58, %s1773_s29 }
 0x9c0   :  { %v1710_v61 = vpop.eup %1709 }
 0x9c1   :  { %v840_v62 = vadd.f32 1.0, %v1710_v61 }
 0x9c3   :  { %1711 = vrcp.f32 %v840_v62  ;;  %v852_v10 = vand.u32 2147483648, %v840_v62  ;;  %vm846_vm7 = vweird.f32 %v840_v62  ;;  %v850_v11 = vand.u32 2147483647, %v840_v62 }
 0x9c5   :  { %v853_v13 = vor.u32 1.1754944e-38, %v852_v10  ;;  %vm851_vm9 = vcmp.eq.f32.partialorder %v850_v11, 8.507059e+37 }
 0x9c7   :  { %858 = vrot.lane.b32.xlu2 %v836_v59, %s1772_s2 }
 0x9c9   :  { %v1712_v63 = vpop.eup %1711 }
 0x9ca   :  { %v842_v5 = vmul.f32 %v1712_v63, %v840_v62  ;;  %vm847_vm6 = vweird.f32 %v1712_v63 }
 0x9cb   :  { %vm848_vm8 = vmor %vm846_vm7, %vm847_vm6 }
 0x9cc   :  { %v843_v6 = vsub.f32 1.0, %v842_v5  ;;  %v1613_v5 = vld [vmem:[%s2235_s0 + $0x5] sm:$0x1] }
 0x9ce   :  { %v844_v8 = vmul.f32 %v1712_v63, %v843_v6  ;;  %v996_v6 = vunpack.c.l.bf16 %v1613_v5 }
 0x9d0   :  { %v845_v9 = vadd.f32 %v1712_v63, %v844_v8 }
 0x9d2   :  { %v849_v12 = vsel %vm848_vm8, %v1712_v63, %v845_v9 }
 0x9d3   :  { %v854_v15 = vsel %vm851_vm9, %v853_v13, %v849_v12 }
 0xa19   :  { %v864_v14 = vpop.permute.xlu2 %863 }
 0xa1a   :  { %v866_v17 = vmul.f32 %v864_v14, %v854_v15 }
 0xa1c   :  { %868 = vrot.lane.b32.xlu0 %v866_v17, %s1772_s2 }
 0xa21   :  { %v859_v29 = vpop.permute.xlu2 %858 }
 0xa22   :  { %v861_v32 = vmul.f32 %v859_v29, %v854_v15 }
 0xa25   :  { %v921_v21 = vpop.f32.mrf.mxu1 }
 0xa26   :  { %v925_v22 = vadd.f32 %v921_v21, %v906_v19 }
 0xa28   :  { %1713 = vtanh.f32 %v925_v22  ;;  %v1611_v26 = vmul.f32 -1.442695, %v925_v22 }
 0xa2a   :  { %1715 = vpow2.f32 %v1611_v26 }
 0xa2d   :  { %v923_v23 = vpop.f32.mrf.mxu1 }
 0xa2e   :  { %v1714_v24 = vpop.eup %1713 }
 0xa2f   :  { %953 = vrot.lane.b32.xlu1 %v1714_v24, %s1773_s29 }
 0xa30   :  { %v1716_v27 = vpop.eup %1715 }
 0xa31   :  { %v930_v28 = vadd.f32 1.0, %v1716_v27 }
 0xa33   :  { %1717 = vrcp.f32 %v930_v28  ;;  %v942_v41 = vand.u32 2147483648, %v930_v28  ;;  %vm936_vm11 = vweird.f32 %v930_v28  ;;  %v940_v43 = vand.u32 2147483647, %v930_v28 }
 0xa35   :  { %v943_v0 = vor.u32 1.1754944e-38, %v942_v41  ;;  %vm941_vm13 = vcmp.eq.f32.partialorder %v940_v43, 8.507059e+37 }
 0xa37   :  { %948 = vrot.lane.b32.xlu1 %v926_v25, %s1772_s2 }
 0xa39   :  { %v1718_v31 = vpop.eup %1717 }
 0xa3a   :  { %v932_v35 = vmul.f32 %v1718_v31, %v930_v28  ;;  %vm937_vm10 = vweird.f32 %v1718_v31 }
 0xa3b   :  { %vm938_vm12 = vmor %vm936_vm11, %vm937_vm10 }
 0xa3c   :  { %v933_v37 = vsub.f32 1.0, %v932_v35  ;;  %v1617_v35 = vld [vmem:[%s2236_s1 + $0x2] sm:$0x1] }
 0xa3e   :  { %v934_v38 = vmul.f32 %v1718_v31, %v933_v37 }
 0xa40   :  { %v935_v40 = vadd.f32 %v1718_v31, %v934_v38 }
 0xa42   :  { %v939_v44 = vsel %vm938_vm12, %v1718_v31, %v935_v40 }
 0xa43   :  { %v944_v46 = vsel %vm941_vm13, %v943_v0, %v939_v44 }
 0xa8e   :  { %v869_v33 = vpop.permute.xlu0 %868 }
 0xa8f   :  { %v871_v36 = vadd.f32 %v869_v33, %v861_v32 }
 0xa91   :  { %1719 = vtanh.f32 %v871_v36 }
 0xa97   :  { %v1720_v39 = vpop.eup %1719 }
 0xa98   :  { %874 = vrot.lane.b32.xlu0 %v1720_v39, %s1773_s29 }
 0xaa1   :  { %v954_v45 = vpop.permute.xlu1 %953 }
 0xaa2   :  { %v956_v47 = vmul.f32 %v954_v45, %v944_v46 }
 0xaa4   :  { %958 = vrot.lane.b32.xlu2 %v956_v47, %s1772_s2 }
 0xaa9   :  { %v949_v48 = vpop.permute.xlu1 %948 }
 0xaaa   :  { %v951_v49 = vmul.f32 %v949_v48, %v944_v46 }
 0xafe   :  { %v959_v50 = vpop.permute.xlu2 %958 }
 0xaff   :  { %v961_v2 = vadd.f32 %v959_v50, %v951_v49 }
 0xb01   :  { %1721 = vtanh.f32 %v961_v2 }
 0xb07   :  { %v1722_v51 = vpop.eup %1721 }
 0xb08   :  { %964 = vrot.lane.b32.xlu1 %v1722_v51, %s1773_s29 }
 0xb0a   :  { %v875_v4 = vpop.permute.xlu0 %874 }
 0xb0b   :  { %v1997_v52 = vmul.f32 %v875_v4, %v854_v15 }
 0xb0d   :  { %879 = vst [vmem:[#allocation1] ss:$4 sm:$0xff] %v1997_v52 }
 0xb14   :  { %v880_v53 = vld.sshfl [vmem:[#allocation1] sm:$0xff pattern:$0x73625140] }
 0xb15   :  { %881 = vrot.lane.b32.xlu2 %v880_v53, %s1772_s2  ;;  %886 = vst [vmem:[#allocation1] ss:$4 sm:$0xff] %v871_v36  ;;  %v1086_v36 = vunpack.c.l.bf16 %v1617_v35 }
 0xb1c   :  { %v887_v54 = vld.sshfl [vmem:[#allocation1] sm:$0xff pattern:$0x73625140] }
 0xb1d   :  { %888 = vrot.lane.b32.xlu1 %v887_v54, %s1774_s30 }
 0xb6f   :  { %v882_v55 = vpop.permute.xlu2 %881 }
 0xb70   :  { %884 = vst.msk [vmem:[#allocation2] sm:$0x3] %vm55_vm0, %v882_v55 }
 0xb77   :  { %v997_v56 = vld [vmem:[#allocation2] sm:$0x3] }
 0xb78   :  { %v998_v57 = vpack.c.bf16 %v997_v56, %v997_v56 }
 0xb7a   :  { %v965_v58 = vpop.permute.xlu1 %964  ;;  %1614 = vmatmul.msk.bf16.vlgmr.msra.gmra.mxu2 %vm84_vm1, %v998_v57 }
 0xb7b   :  { %v2004_v59 = vmul.f32 %v965_v58, %v944_v46 }
 0xb7d   :  { %969 = vst [vmem:[#allocation1] ss:$4 sm:$0xff] %v2004_v59 }
 0xb84   :  { %v970_v60 = vld.sshfl [vmem:[#allocation1] sm:$0xff pattern:$0x73625140] }
 0xb85   :  { %971 = vrot.lane.b32.xlu0 %v970_v60, %s1772_s2  ;;  %976 = vst [vmem:[#allocation1] ss:$4 sm:$0xff] %v961_v2 }
 0xb8c   :  { %v977_v61 = vld.sshfl [vmem:[#allocation1] sm:$0xff pattern:$0x73625140] }
 0xb8d   :  { %978 = vrot.lane.b32.xlu0 %v977_v61, %s1774_s30 }
 0xb8f   :  { %v889_v62 = vpop.permute.xlu1 %888 }
 0xb90   :  { %891 = vst.msk [vmem:[#allocation3] sm:$0x3] %vm55_vm0, %v889_v62 }
 0xb97   :  { %v1016_v15 = vld [vmem:[#allocation3] sm:$0x3] }
 0xbf7   :  { %v972_v63 = vpop.permute.xlu0 %971 }
 0xbf8   :  { %974 = vst.msk [vmem:[#allocation4] sm:$0x3] %vm55_vm0, %v972_v63 }
 0xbfd   :  { %v1011_v8 = vpop.f32.mrf.mxu2 }
 0xbfe   :  { %v1015_v9 = vadd.f32 %v1011_v8, %v996_v6 }
 0xbff   :  { %v979_v10 = vpop.permute.xlu0 %978  ;;  %v1087_v11 = vld [vmem:[#allocation4] sm:$0x3] }
 0xc00   :  { %1723 = vtanh.f32 %v1015_v9  ;;  %981 = vst.msk [vmem:[#allocation5] sm:$0x3] %vm55_vm0, %v979_v10  ;;  %v1088_v12 = vpack.c.bf16 %v1087_v11, %v1087_v11  ;;  %v1615_v17 = vmul.f32 -1.442695, %v1015_v9 }
 0xc02   :  { %1618 = vmatmul.msk.bf16.vlgmr.msra.gmra.mxu3 %vm84_vm1, %v1088_v12  ;;  %1725 = vpow2.f32 %v1615_v17 }
 0xc05   :  { %v1013_v13 = vpop.f32.mrf.mxu2 }
 0xc06   :  { %v1724_v14 = vpop.eup %1723 }
 0xc07   :  { %1043 = vrot.lane.b32.xlu2 %v1724_v14, %s1773_s29  ;;  %v1106_v41 = vld [vmem:[#allocation5] sm:$0x3] }
 0xc08   :  { %v1726_v18 = vpop.eup %1725 }
 0xc09   :  { %v1020_v19 = vadd.f32 1.0, %v1726_v18 }
 0xc0b   :  { %1727 = vrcp.f32 %v1020_v19  ;;  %v1032_v26 = vand.u32 2147483648, %v1020_v19  ;;  %vm1026_vm15 = vweird.f32 %v1020_v19  ;;  %v1030_v27 = vand.u32 2147483647, %v1020_v19 }
 0xc0d   :  { %v1033_v29 = vor.u32 1.1754944e-38, %v1032_v26  ;;  %vm1031_vm3 = vcmp.eq.f32.partialorder %v1030_v27, 8.507059e+37 }
 0xc0f   :  { %1038 = vrot.lane.b32.xlu2 %v1016_v15, %s1772_s2 }
 0xc11   :  { %v1728_v21 = vpop.eup %1727 }
 0xc12   :  { %v1022_v22 = vmul.f32 %v1728_v21, %v1020_v19  ;;  %vm1027_vm14 = vweird.f32 %v1728_v21 }
 0xc13   :  { %vm1028_vm2 = vmor %vm1026_vm15, %vm1027_vm14 }
 0xc14   :  { %v1023_v23 = vsub.f32 1.0, %v1022_v22 }
 0xc16   :  { %v1024_v24 = vmul.f32 %v1728_v21, %v1023_v23  ;;  %v1621_v23 = vld [vmem:[%s2235_s0 + $0x6] sm:$0x1] }
 0xc18   :  { %v1025_v25 = vadd.f32 %v1728_v21, %v1024_v24  ;;  %v1176_v24 = vunpack.c.l.bf16 %v1621_v23 }
 0xc1a   :  { %v1029_v28 = vsel %vm1028_vm2, %v1728_v21, %v1025_v25 }
 0xc1b   :  { %v1034_v32 = vsel %vm1031_vm3, %v1033_v29, %v1029_v28 }
 0xc61   :  { %v1044_v31 = vpop.permute.xlu2 %1043 }
 0xc62   :  { %v1046_v33 = vmul.f32 %v1044_v31, %v1034_v32 }
 0xc64   :  { %1048 = vrot.lane.b32.xlu0 %v1046_v33, %s1772_s2 }
 0xc69   :  { %v1039_v43 = vpop.permute.xlu2 %1038 }
 0xc6a   :  { %v1041_v0 = vmul.f32 %v1039_v43, %v1034_v32 }
 0xc85   :  { %v1101_v37 = vpop.f32.mrf.mxu3 }
 0xc86   :  { %v1105_v38 = vadd.f32 %v1101_v37, %v1086_v36 }
 0xc88   :  { %1729 = vtanh.f32 %v1105_v38  ;;  %v1619_v44 = vmul.f32 -1.442695, %v1105_v38 }
 0xc8a   :  { %1731 = vpow2.f32 %v1619_v44 }
 0xc8d   :  { %v1103_v39 = vpop.f32.mrf.mxu3 }
 0xc8e   :  { %v1730_v40 = vpop.eup %1729 }
 0xc8f   :  { %1133 = vrot.lane.b32.xlu1 %v1730_v40, %s1773_s29 }
 0xc90   :  { %v1732_v47 = vpop.eup %1731 }
 0xc91   :  { %v1110_v49 = vadd.f32 1.0, %v1732_v47 }
 0xc93   :  { %v1122_v54 = vand.u32 2147483648, %v1110_v49  ;;  %vm1116_vm5 = vweird.f32 %v1110_v49  ;;  %v1120_v55 = vand.u32 2147483647, %v1110_v49 }
 0xc95   :  { %v1123_v57 = vor.u32 1.1754944e-38, %v1122_v54  ;;  %vm1121_vm7 = vcmp.eq.f32.partialorder %v1120_v55, 8.507059e+37 }
 0xc97   :  { %1128 = vrot.lane.b32.xlu1 %v1106_v41, %s1772_s2 }
 0xcd6   :  { %v1049_v45 = vpop.permute.xlu0 %1048 }
 0xcd7   :  { %v1051_v46 = vadd.f32 %v1049_v45, %v1041_v0 }
 0xcd9   :  { %1733 = vtanh.f32 %v1051_v46 }
 0xcda   :  { %1735 = vrcp.f32 %v1110_v49 }
 0xcdf   :  { %v1734_v48 = vpop.eup %1733 }
 0xce0   :  { %1054 = vrot.lane.b32.xlu0 %v1734_v48, %s1773_s29  ;;  %v1736_v50 = vpop.eup %1735 }
 0xce1   :  { %v1112_v2 = vmul.f32 %v1736_v50, %v1110_v49  ;;  %vm1117_vm4 = vweird.f32 %v1736_v50 }
 0xce2   :  { %vm1118_vm6 = vmor %vm1116_vm5, %vm1117_vm4 }
 0xce3   :  { %v1113_v51 = vsub.f32 1.0, %v1112_v2  ;;  %v1625_v2 = vld [vmem:[%s2236_s1 + $0x1] sm:$0x1] }
 0xce5   :  { %v1114_v4 = vmul.f32 %v1736_v50, %v1113_v51  ;;  %v1266_v51 = vunpack.c.l.bf16 %v1625_v2 }
 0xce7   :  { %v1115_v53 = vadd.f32 %v1736_v50, %v1114_v4 }
 0xce9   :  { %v1119_v56 = vsel %vm1118_vm6, %v1736_v50, %v1115_v53 }
 0xcea   :  { %v1124_v60 = vsel %vm1121_vm7, %v1123_v57, %v1119_v56 }
 0xd01   :  { %v1134_v58 = vpop.permute.xlu1 %1133 }
 0xd02   :  { %v1136_v61 = vmul.f32 %v1134_v58, %v1124_v60 }
 0xd04   :  { %1138 = vrot.lane.b32.xlu2 %v1136_v61, %s1772_s2 }
 0xd09   :  { %v1129_v5 = vpop.permute.xlu1 %1128 }
 0xd0a   :  { %v1131_v8 = vmul.f32 %v1129_v5, %v1124_v60 }
 0xd52   :  { %v1055_v62 = vpop.permute.xlu0 %1054 }
 0xd53   :  { %v2026_v63 = vmul.f32 %v1055_v62, %v1034_v32 }
 0xd55   :  { %1059 = vst [vmem:[#allocation1] ss:$4 sm:$0xff] %v2026_v63 }
 0xd5c   :  { %v1060_v6 = vld.sshfl [vmem:[#allocation1] sm:$0xff pattern:$0x73625140] }
 0xd5d   :  { %1061 = vrot.lane.b32.xlu2 %v1060_v6, %s1772_s2  ;;  %1066 = vst [vmem:[#allocation1] ss:$4 sm:$0xff] %v1051_v46 }
 0xd5e   :  { %v1139_v9 = vpop.permute.xlu2 %1138 }
 0xd5f   :  { %v1141_v10 = vadd.f32 %v1139_v9, %v1131_v8 }
 0xd61   :  { %1737 = vtanh.f32 %v1141_v10 }
 0xd64   :  { %v1067_v12 = vld.sshfl [vmem:[#allocation1] sm:$0xff pattern:$0x73625140] }
 0xd67   :  { %v1738_v11 = vpop.eup %1737 }
 0xd68   :  { %1144 = vrot.lane.b32.xlu1 %v1738_v11, %s1773_s29 }
 0xd70   :  { %1068 = vrot.lane.b32.xlu1 %v1067_v12, %s1774_s30 }
 0xdb7   :  { %v1062_v13 = vpop.permute.xlu2 %1061 }
 0xdb8   :  { %1064 = vst.msk [vmem:[#allocation2] sm:$0x3] %vm55_vm0, %v1062_v13 }
 0xdbf   :  { %v1177_v14 = vld [vmem:[#allocation2] sm:$0x3] }
 0xdc0   :  { %v1178_v15 = vpack.c.bf16 %v1177_v14, %v1177_v14 }
 0xdc2   :  { %1622 = vmatmul.msk.bf16.vlgmr.msrb.gmra.mxu0 %vm84_vm1, %v1178_v15 }
 0xdda   :  { %v1145_v17 = vpop.permute.xlu1 %1144 }
 0xddb   :  { %v2034_v18 = vmul.f32 %v1145_v17, %v1124_v60 }
 0xddd   :  { %1149 = vst [vmem:[#allocation1] ss:$4 sm:$0xff] %v2034_v18 }
 0xde2   :  { %v1069_v19 = vpop.permute.xlu1 %1068 }
 0xde3   :  { %1071 = vst.msk [vmem:[#allocation3] sm:$0x3] %vm55_vm0, %v1069_v19 }
 0xde4   :  { %v1150_v21 = vld.sshfl [vmem:[#allocation1] sm:$0xff pattern:$0x73625140] }
 0xde5   :  { %1151 = vrot.lane.b32.xlu0 %v1150_v21, %s1772_s2  ;;  %1156 = vst [vmem:[#allocation1] ss:$4 sm:$0xff] %v1141_v10 }
 0xdea   :  { %v1196_v29 = vld [vmem:[#allocation3] sm:$0x3] }
 0xdec   :  { %v1157_v22 = vld.sshfl [vmem:[#allocation1] sm:$0xff pattern:$0x73625140] }
 0xded   :  { %1158 = vrot.lane.b32.xlu0 %v1157_v22, %s1774_s30 }
 0xe3f   :  { %v1191_v25 = vpop.f32.mrf.mxu0 }
 0xe40   :  { %v1195_v26 = vadd.f32 %v1191_v25, %v1176_v24 }
 0xe42   :  { %1739 = vtanh.f32 %v1195_v26  ;;  %v1623_v36 = vmul.f32 -1.442695, %v1195_v26 }
 0xe44   :  { %1741 = vpow2.f32 %v1623_v36 }
 0xe47   :  { %v1193_v27 = vpop.f32.mrf.mxu0 }
 0xe48   :  { %v1740_v28 = vpop.eup %1739 }
 0xe49   :  { %1223 = vrot.lane.b32.xlu2 %v1740_v28, %s1773_s29 }
 0xe4a   :  { %v1742_v37 = vpop.eup %1741 }
 0xe4b   :  { %v1200_v38 = vadd.f32 1.0, %v1742_v37 }
 0xe4d   :  { %1743 = vrcp.f32 %v1200_v38  ;;  %v1212_v0 = vand.u32 2147483648, %v1200_v38  ;;  %vm1206_vm9 = vweird.f32 %v1200_v38  ;;  %v1210_v45 = vand.u32 2147483647, %v1200_v38 }
 0xe4f   :  { %v1213_v47 = vor.u32 1.1754944e-38, %v1212_v0  ;;  %vm1211_vm11 = vcmp.eq.f32.partialorder %v1210_v45, 8.507059e+37 }
 0xe51   :  { %1218 = vrot.lane.b32.xlu2 %v1196_v29, %s1772_s2 }
 0xe53   :  { %v1744_v39 = vpop.eup %1743 }
 0xe54   :  { %v1202_v40 = vmul.f32 %v1744_v39, %v1200_v38  ;;  %vm1207_vm8 = vweird.f32 %v1744_v39 }
 0xe55   :  { %vm1208_vm10 = vmor %vm1206_vm9, %vm1207_vm8 }
 0xe56   :  { %v1203_v41 = vsub.f32 1.0, %v1202_v40 }
 0xe57   :  { %v1152_v31 = vpop.permute.xlu0 %1151 }
 0xe58   :  { %1154 = vst.msk [vmem:[#allocation4] sm:$0x3] %vm55_vm0, %v1152_v31  ;;  %v1204_v43 = vmul.f32 %v1744_v39, %v1203_v41 }
 0xe5a   :  { %v1205_v44 = vadd.f32 %v1744_v39, %v1204_v43 }
 0xe5c   :  { %v1209_v46 = vsel %vm1208_vm10, %v1744_v39, %v1205_v44  ;;  %v1629_v44 = vld [vmem:[%s2235_s0 + $0x7] sm:$0x1]  ;;  %vm170_vm10 = vcmask 253952  }
 0xe5d   :  { %v1214_v49 = vsel %vm1211_vm11, %v1213_v47, %v1209_v46  ;;  %v1356_v0 = vunpack.c.l.bf16 %v1629_v44 }
 0xe5f   :  { %v1159_v32 = vpop.permute.xlu0 %1158  ;;  %v1267_v33 = vld [vmem:[#allocation4] sm:$0x3] }
 0xe60   :  { %1161 = vst.msk [vmem:[#allocation5] sm:$0x3] %vm55_vm0, %v1159_v32  ;;  %v1268_v35 = vpack.c.bf16 %v1267_v33, %v1267_v33 }
 0xe62   :  { %1626 = vmatmul.msk.bf16.vlgmr.msrb.gmra.mxu1 %vm84_vm1, %v1268_v35 }
 0xe67   :  { %v1286_v56 = vld [vmem:[#allocation5] sm:$0x3] }
 0xea3   :  { %v1224_v48 = vpop.permute.xlu2 %1223 }
 0xea4   :  { %v1226_v50 = vmul.f32 %v1224_v48, %v1214_v49 }
 0xea6   :  { %1228 = vrot.lane.b32.xlu0 %v1226_v50, %s1772_s2 }
 0xeab   :  { %v1219_v57 = vpop.permute.xlu2 %1218 }
 0xeac   :  { %v1221_v58 = vmul.f32 %v1219_v57, %v1214_v49 }
 0xedf   :  { %v1281_v4 = vpop.f32.mrf.mxu1 }
 0xee0   :  { %v1285_v53 = vadd.f32 %v1281_v4, %v1266_v51 }
 0xee2   :  { %1745 = vtanh.f32 %v1285_v53  ;;  %v1627_v5 = vmul.f32 -1.442695, %v1285_v53 }
 0xee7   :  { %v1283_v54 = vpop.f32.mrf.mxu1 }
 0xee8   :  { %v1746_v55 = vpop.eup %1745 }
 0xee9   :  { %1313 = vrot.lane.b32.xlu1 %v1746_v55, %s1773_s29 }
 0xef1   :  { %1308 = vrot.lane.b32.xlu1 %v1286_v56, %s1772_s2 }
 0xf18   :  { %v1229_v60 = vpop.permute.xlu0 %1228 }
 0xf19   :  { %v1231_v61 = vadd.f32 %v1229_v60, %v1221_v58 }
 0xf1b   :  { %1747 = vtanh.f32 %v1231_v61 }
 0xf1c   :  { %1749 = vpow2.f32 %v1627_v5 }
 0xf21   :  { %v1748_v62 = vpop.eup %1747 }
 0xf22   :  { %1234 = vrot.lane.b32.xlu0 %v1748_v62, %s1773_s29  ;;  %v1750_v6 = vpop.eup %1749 }
 0xf23   :  { %v1290_v8 = vadd.f32 1.0, %v1750_v6 }
 0xf25   :  { %1751 = vrcp.f32 %v1290_v8  ;;  %v1302_v14 = vand.u32 2147483648, %v1290_v8  ;;  %vm1296_vm13 = vweird.f32 %v1290_v8  ;;  %v1300_v15 = vand.u32 2147483647, %v1290_v8 }
 0xf27   :  { %v1303_v19 = vor.u32 1.1754944e-38, %v1302_v14  ;;  %vm1301_vm15 = vcmp.eq.f32.partialorder %v1300_v15, 8.507059e+37 }
 0xf2b   :  { %v1752_v9 = vpop.eup %1751 }
 0xf2c   :  { %v1292_v10 = vmul.f32 %v1752_v9, %v1290_v8  ;;  %vm1297_vm12 = vweird.f32 %v1752_v9 }
 0xf2d   :  { %vm1298_vm14 = vmor %vm1296_vm13, %vm1297_vm12 }
 0xf2e   :  { %v1293_v11 = vsub.f32 1.0, %v1292_v10 }
 0xf30   :  { %v1294_v12 = vmul.f32 %v1752_v9, %v1293_v11 }
 0xf32   :  { %v1295_v13 = vadd.f32 %v1752_v9, %v1294_v12  ;;  %v1444_v12 = vld [vmem:[%s2236_s1] sm:$0x1] }
 0xf34   :  { %v1299_v17 = vsel %vm1298_vm14, %v1752_v9, %v1295_v13  ;;  %v1445_v13 = vunpack.c.l.bf16 %v1444_v12 }
 0xf35   :  { %v1304_v22 = vsel %vm1301_vm15, %v1303_v19, %v1299_v17 }
 0xf5b   :  { %v1314_v21 = vpop.permute.xlu1 %1313 }
 0xf5c   :  { %v1316_v23 = vmul.f32 %v1314_v21, %v1304_v22 }
 0xf5e   :  { %1318 = vrot.lane.b32.xlu2 %v1316_v23, %s1772_s2 }
 0xf63   :  { %v1309_v27 = vpop.permute.xlu1 %1308 }
 0xf64   :  { %v1311_v28 = vmul.f32 %v1309_v27, %v1304_v22 }
 0xf94   :  { %v1235_v24 = vpop.permute.xlu0 %1234 }
 0xf95   :  { %v2056_v25 = vmul.f32 %v1235_v24, %v1214_v49 }
 0xf97   :  { %1239 = vst [vmem:[#allocation1] ss:$4 sm:$0xff] %v2056_v25 }
 0xf9e   :  { %v1240_v26 = vld.sshfl [vmem:[#allocation1] sm:$0xff pattern:$0x73625140] }
 0xf9f   :  { %1241 = vrot.lane.b32.xlu2 %v1240_v26, %s1772_s2  ;;  %1246 = vst [vmem:[#allocation1] ss:$4 sm:$0xff] %v1231_v61 }
 0xfa6   :  { %v1247_v33 = vld.sshfl [vmem:[#allocation1] sm:$0xff pattern:$0x73625140] }
 0xfb8   :  { %v1319_v29 = vpop.permute.xlu2 %1318 }
 0xfb9   :  { %v1321_v31 = vadd.f32 %v1319_v29, %v1311_v28  ;;  %v262_v28 = vpack.c.bf16 %v1869_v7, %v1869_v7 }
 0xfbb   :  { %1753 = vtanh.f32 %v1321_v31  ;;  %v264_v29 = vrot.slane %v262_v28, 3 }
 0xfc1   :  { %v1754_v32 = vpop.eup %1753 }
 0xfc2   :  { %1324 = vrot.lane.b32.xlu1 %v1754_v32, %s1773_s29 }
 0xfca   :  { %1248 = vrot.lane.b32.xlu1 %v1247_v33, %s1774_s30 }
 0xff9   :  { %v1242_v35 = vpop.permute.xlu2 %1241 }
 0xffa   :  { %1244 = vst.msk [vmem:[#allocation2] sm:$0x3] %vm55_vm0, %v1242_v35  ;;  %v802_v35 = vpack.c.bf16 %v1972_v3, %v1972_v3 }
 0xffc   :  { %v804_v7 = vrot.slane %v802_v35, 3 }
0x1001   :  { %v1357_v36 = vld [vmem:[#allocation2] sm:$0x3] }
0x1002   :  { %v1358_v37 = vpack.c.bf16 %v1357_v36, %v1357_v36 }
0x1004   :  { %1630 = vmatmul.msk.bf16.vlgmr.msrb.gmra.mxu2 %vm84_vm1, %v1358_v37  ;;  %v1072_v37 = vpack.c.bf16 %v2026_v63, %v2026_v63 }
0x1034   :  { %v1325_v38 = vpop.permute.xlu1 %1324 }
0x1035   :  { %v2064_v39 = vmul.f32 %v1325_v38, %v1304_v22 }
0x1037   :  { %1329 = vst [vmem:[#allocation1] ss:$4 sm:$0xff] %v2064_v39 }
0x103c   :  { %v1249_v40 = vpop.permute.xlu1 %1248 }
0x103d   :  { %1251 = vst.msk [vmem:[#allocation3] sm:$0x3] %vm55_vm0, %v1249_v40  ;;  %v1342_v40 = vpack.c.bf16 %v2064_v39, %v2064_v39 }
0x103e   :  { %v1330_v41 = vld.sshfl [vmem:[#allocation1] sm:$0xff pattern:$0x73625140] }
0x103f   :  { %1331 = vrot.lane.b32.xlu0 %v1330_v41, %s1772_s2  ;;  %1336 = vst [vmem:[#allocation1] ss:$4 sm:$0xff] %v1321_v31  ;;  %v532_v31 = vpack.c.bf16 %v1933_v30, %v1933_v30  ;;  %v1074_v30 = vrot.slane %v1072_v37, 3  ;;  %v1344_v3 = vrot.slane %v1342_v40, 3 }
0x1041   :  { %v534_v33 = vrot.slane %v532_v31, 3 }
0x1044   :  { %v1376_v49 = vld [vmem:[#allocation3] sm:$0x3] }
0x1046   :  { %v1337_v43 = vld.sshfl [vmem:[#allocation1] sm:$0xff pattern:$0x73625140] }
0x1047   :  { %1338 = vrot.lane.b32.xlu0 %v1337_v43, %s1774_s30 }
0x1087   :  { %v1371_v45 = vpop.f32.mrf.mxu2 }
0x1088   :  { %v1375_v46 = vadd.f32 %v1371_v45, %v1356_v0 }
0x108a   :  { %1755 = vtanh.f32 %v1375_v46  ;;  %v1631_v53 = vmul.f32 -1.442695, %v1375_v46 }
0x108c   :  { %1757 = vpow2.f32 %v1631_v53 }
0x108f   :  { %v1373_v47 = vpop.f32.mrf.mxu2 }
0x1090   :  { %v1756_v48 = vpop.eup %1755 }
0x1091   :  { %1403 = vrot.lane.b32.xlu2 %v1756_v48, %s1773_s29 }
0x1092   :  { %v1758_v54 = vpop.eup %1757 }
0x1093   :  { %v1380_v55 = vadd.f32 1.0, %v1758_v54 }
0x1095   :  { %1759 = vrcp.f32 %v1380_v55  ;;  %v1392_v62 = vand.u32 2147483648, %v1380_v55  ;;  %vm1386_vm3 = vweird.f32 %v1380_v55  ;;  %v1390_v5 = vand.u32 2147483647, %v1380_v55 }
0x1097   :  { %v1393_v8 = vor.u32 1.1754944e-38, %v1392_v62  ;;  %vm1391_vm5 = vcmp.eq.f32.partialorder %v1390_v5, 8.507059e+37 }
0x1099   :  { %1398 = vrot.lane.b32.xlu2 %v1376_v49, %s1772_s2 }
0x109b   :  { %v1760_v56 = vpop.eup %1759 }
0x109c   :  { %v1382_v57 = vmul.f32 %v1760_v56, %v1380_v55  ;;  %vm1387_vm2 = vweird.f32 %v1760_v56  ;;  %v159_v55 = vpack.c.bf16 %v1865_v1, %v1865_v1  ;;  %v982_v1 = vpack.c.bf16 %v2004_v59, %v2004_v59 }
0x109d   :  { %vm1388_vm4 = vmor %vm1386_vm3, %vm1387_vm2 }
0x109e   :  { %v1383_v58 = vsub.f32 1.0, %v1382_v57  ;;  %v442_v57 = vpack.c.bf16 %v1904_v20, %v1904_v20  ;;  %v984_v20 = vrot.slane %v982_v1, 3 }
0x10a0   :  { %v1384_v60 = vmul.f32 %v1760_v56, %v1383_v58 }
0x10a2   :  { %v1385_v61 = vadd.f32 %v1760_v56, %v1384_v60  ;;  %v444_v60 = vrot.slane %v442_v57, 3 }
0x10a4   :  { %v1389_v6 = vsel %vm1388_vm4, %v1760_v56, %v1385_v61  ;;  %v161_v56 = vrot.slane %v159_v55, 3  ;;  %v712_v61 = vpack.c.bf16 %v1967_v42, %v1967_v42 }
0x10a5   :  { %v2078_v10 = vsel %vm1391_vm5, %v1393_v8, %v1389_v6 }
0x10a6   :  { %v714_v5 = vrot.slane %v712_v61, 3 }
0x10b1   :  { %v1332_v50 = vpop.permute.xlu0 %1331 }
0x10b2   :  { %1334 = vst.msk [vmem:[#allocation4] sm:$0x3] %vm55_vm0, %v1332_v50 }
0x10b9   :  { %v1339_v2 = vpop.permute.xlu0 %1338  ;;  %v1446_v51 = vld [vmem:[#allocation4] sm:$0x3] }
0x10ba   :  { %1341 = vst.msk [vmem:[#allocation5] sm:$0x3] %vm55_vm0, %v1339_v2  ;;  %v1447_v4 = vpack.c.bf16 %v1446_v51, %v1446_v51 }
0x10bc   :  { %1633 = vmatmul.msk.bf16.vlgmr.msrb.gmra.mxu3 %vm84_vm1, %v1447_v4  ;;  %vm162_vm1 = vcmask 1040384  }
0x10bd   :  { %v267_v32 = vsel %vm162_vm1, %v262_v28, %v264_v29  ;;  %v537_v36 = vsel %vm162_vm1, %v532_v31, %v534_v33  ;;  %v807_v38 = vsel %vm162_vm1, %v802_v35, %v804_v7  ;;  %v1077_v41 = vsel %vm162_vm1, %v1072_v37, %v1074_v30 }
0x10be   :  { %v1347_v44 = vsel %vm162_vm1, %v1342_v40, %v1344_v3  ;;  %v165_v58 = vsel %vm162_vm1, %v159_v55, %v161_v56  ;;  %v447_v62 = vsel %vm162_vm1, %v442_v57, %v444_v60  ;;  %v717_v6 = vsel %vm162_vm1, %v712_v61, %v714_v5 }
0x10bf   :  { %v987_v42 = vsel %vm162_vm1, %v982_v1, %v984_v20 }
0x10c1   :  { %v1465_v21 = vld [vmem:[#allocation5] sm:$0x3] }
0x10eb   :  { %v1404_v9 = vpop.permute.xlu2 %1403 }
0x10ec   :  { %v1406_v11 = vmul.f32 %v1404_v9, %v2078_v10  ;;  %v1252_v9 = vpack.c.bf16 %v2056_v25, %v2056_v25 }
0x10ee   :  { %1408 = vrot.lane.b32.xlu0 %v1406_v11, %s1772_s2 }
0x10f3   :  { %v1399_v22 = vpop.permute.xlu2 %1398 }
0x10f4   :  { %v1401_v23 = vmul.f32 %v1399_v22, %v2078_v10 }
0x113f   :  { %v1460_v14 = vpop.f32.mrf.mxu3 }
0x1140   :  { %v1464_v15 = vadd.f32 %v1460_v14, %v1445_v13  ;;  %v1254_v13 = vrot.slane %v1252_v9, 3 }
0x1142   :  { %1761 = vtanh.f32 %v1464_v15  ;;  %v1634_v43 = vmul.f32 -1.442695, %v1464_v15  ;;  %v1257_v25 = vsel %vm162_vm1, %v1252_v9, %v1254_v13 }
0x1147   :  { %v1462_v17 = vpop.f32.mrf.mxu3 }
0x1148   :  { %v1762_v19 = vpop.eup %1761 }
0x1149   :  { %1492 = vrot.lane.b32.xlu1 %v1762_v19, %s1773_s29 }
0x1151   :  { %1487 = vrot.lane.b32.xlu1 %v1465_v21, %s1772_s2 }
0x1160   :  { %v1409_v24 = vpop.permute.xlu0 %1408 }
0x1161   :  { %v2088_v26 = vadd.f32 %v1409_v24, %v1401_v23 }
0x1163   :  { %1763 = vtanh.f32 %v2088_v26 }
0x1164   :  { %1765 = vpow2.f32 %v1634_v43 }
0x1169   :  { %v1764_v27 = vpop.eup %1763 }
0x116a   :  { %1414 = vrot.lane.b32.xlu0 %v1764_v27, %s1773_s29  ;;  %v1766_v63 = vpop.eup %1765 }
0x116b   :  { %v1469_v0 = vadd.f32 1.0, %v1766_v63 }
0x116d   :  { %1767 = vrcp.f32 %v1469_v0  ;;  %v1481_v39 = vand.u32 2147483648, %v1469_v0  ;;  %vm1475_vm7 = vweird.f32 %v1469_v0  ;;  %v1479_v50 = vand.u32 2147483647, %v1469_v0 }
0x116f   :  { %v1482_v51 = vor.u32 1.1754944e-38, %v1481_v39  ;;  %vm1480_vm9 = vcmp.eq.f32.partialorder %v1479_v50, 8.507059e+37 }
0x1172   :  { %269 = vrot.lane.b32.xlu0 %v267_v32, %s1772_s2  ;;  %v352_v32 = vpack.c.bf16 %v1899_v16, %v1899_v16 }
0x1173   :  { %v1768_v45 = vpop.eup %1767 }
0x1174   :  { %v1471_v46 = vmul.f32 %v1768_v45, %v1469_v0  ;;  %vm1476_vm6 = vweird.f32 %v1768_v45  ;;  %v354_v33 = vrot.slane %v352_v32, 3 }
0x1175   :  { %vm1477_vm8 = vmor %vm1475_vm7, %vm1476_vm6 }
0x1176   :  { %v1472_v47 = vsub.f32 1.0, %v1471_v46  ;;  %v357_v7 = vsel %vm162_vm1, %v352_v32, %v354_v33 }
0x1178   :  { %v1473_v48 = vmul.f32 %v1768_v45, %v1472_v47 }
0x117a   :  { %539 = vrot.lane.b32.xlu0 %v537_v36, %s1772_s2  ;;  %v1474_v49 = vadd.f32 %v1768_v45, %v1473_v48  ;;  %v622_v36 = vpack.c.bf16 %v1938_v34, %v1938_v34 }
0x117c   :  { %v1478_v2 = vsel %vm1477_vm8, %v1768_v45, %v1474_v49  ;;  %v624_v16 = vrot.slane %v622_v36, 3 }
0x117d   :  { %v2112_v53 = vsel %vm1480_vm9, %v1482_v51, %v1478_v2 }
0x117e   :  { %v627_v34 = vsel %vm162_vm1, %v622_v36, %v624_v16 }
0x1182   :  { %809 = vrot.lane.b32.xlu0 %v807_v38, %s1772_s2  ;;  %v892_v38 = vpack.c.bf16 %v1997_v52, %v1997_v52 }
0x1184   :  { %v894_v30 = vrot.slane %v892_v38, 3 }
0x1186   :  { %v897_v52 = vsel %vm162_vm1, %v892_v38, %v894_v30 }
0x118a   :  { %1079 = vrot.lane.b32.xlu0 %v1077_v41, %s1772_s2  ;;  %v1162_v41 = vpack.c.bf16 %v2034_v18, %v2034_v18 }
0x118c   :  { %v1164_v3 = vrot.slane %v1162_v41, 3 }
0x1192   :  { %1349 = vrot.lane.b32.xlu0 %v1347_v44, %s1772_s2  ;;  %v1167_v44 = vsel %vm162_vm1, %v1162_v41, %v1164_v3 }
0x11bb   :  { %v1493_v4 = vpop.permute.xlu1 %1492 }
0x11bc   :  { %v1495_v54 = vmul.f32 %v1493_v4, %v2112_v53 }
0x11be   :  { %1497 = vrot.lane.b32.xlu2 %v1495_v54, %s1772_s2 }
0x11c3   :  { %v1488_v24 = vpop.permute.xlu1 %1487 }
0x11c6   :  { %167 = vrot.lane.b32.xlu2 %v165_v58, %s1772_s2 }
0x11ce   :  { %449 = vrot.lane.b32.xlu2 %v447_v62, %s1772_s2 }
0x11d6   :  { %719 = vrot.lane.b32.xlu2 %v717_v6, %s1772_s2 }
0x11dc   :  { %v1415_v8 = vpop.permute.xlu0 %1414 }
0x11dd   :  { %v1417_v11 = vmul.f32 %v1415_v8, %v2078_v10 }
0x11de   :  { %989 = vrot.lane.b32.xlu2 %v987_v42, %s1772_s2 }
0x11df   :  { %v1432_v12 = vpack.c.bf16 %v1417_v11, %v1417_v11  ;;  %1419 = vst [vmem:[#allocation1] ss:$4 sm:$0xff] %v1417_v11 }
0x11e1   :  { %v1434_v14 = vrot.slane %v1432_v12, 3 }
0x11e3   :  { %v1437_v59 = vsel %vm162_vm1, %v1432_v12, %v1434_v14 }
0x11e4   :  { %1439 = vrot.lane.b32.xlu0 %v1437_v59, %s1772_s2  ;;  %v270_v15 = vpop.permute.xlu0 %269 }
0x11e5   :  { %1580 = vst.msk [vmem:[%s2237_s5 + $0x7] sm:$0x1] %vm170_vm10, %v270_v15 }
0x11e6   :  { %1259 = vrot.lane.b32.xlu2 %v1257_v25, %s1772_s2  ;;  %v1420_v10 = vld.sshfl [vmem:[#allocation1] sm:$0xff pattern:$0x73625140] }
0x11e7   :  { %1426 = vst [vmem:[#allocation1] ss:$4 sm:$0xff] %v2088_v26  ;;  %v1490_v26 = vmul.f32 %v1488_v24, %v2112_v53 }
0x11ec   :  { %v540_v17 = vpop.permute.xlu0 %539 }
0x11ed   :  { %1592 = vst.msk [vmem:[%s2238_s4 + $0x2] sm:$0x1] %vm170_vm10, %v540_v17 }
0x11ee   :  { %v1427_v19 = vld.sshfl [vmem:[#allocation1] sm:$0xff pattern:$0x73625140] }
0x11ef   :  { %1428 = vrot.lane.b32.xlu2 %v1427_v19, %s1774_s30 }
0x11f4   :  { %v810_v21 = vpop.permute.xlu0 %809 }
0x11f5   :  { %1604 = vst.msk [vmem:[%s2237_s5 + $0x4] sm:$0x1] %vm170_vm10, %v810_v21 }
0x11fc   :  { %v1080_v22 = vpop.permute.xlu0 %1079 }
0x11fd   :  { %1616 = vst.msk [vmem:[%s2238_s4 + $0x5] sm:$0x1] %vm170_vm10, %v1080_v22 }
0x1204   :  { %v1350_v23 = vpop.permute.xlu0 %1349 }
0x1205   :  { %1628 = vst.msk [vmem:[%s2237_s5 + $0x1] sm:$0x1] %vm170_vm10, %v1350_v23 }
0x1218   :  { %v1498_v27 = vpop.permute.xlu2 %1497 }
0x1219   :  { %v1500_v28 = vadd.f32 %v1498_v27, %v1490_v26 }
0x121b   :  { %1769 = vtanh.f32 %v1500_v28 }
0x1220   :  { %v168_v29 = vpop.permute.xlu2 %167 }
0x1221   :  { %v1770_v31 = vpop.eup %1769  ;;  %171 = vst.msk [vmem:[%s2238_s4] sm:$0x1] %vm170_vm10, %v168_v29 }
0x1222   :  { %1503 = vrot.lane.b32.xlu1 %v1770_v31, %s1773_s29 }
0x1228   :  { %v450_v35 = vpop.permute.xlu2 %449 }
0x1229   :  { %1588 = vst.msk [vmem:[%s2237_s5 + $0x6] sm:$0x1] %vm170_vm10, %v450_v35 }
0x122a   :  { %359 = vrot.lane.b32.xlu1 %v357_v7, %s1772_s2 }
0x1230   :  { %v720_v37 = vpop.permute.xlu2 %719 }
0x1231   :  { %1600 = vst.msk [vmem:[%s2238_s4 + $0x3] sm:$0x1] %vm170_vm10, %v720_v37 }
0x1232   :  { %629 = vrot.lane.b32.xlu1 %v627_v34, %s1772_s2 }
0x1238   :  { %v990_v40 = vpop.permute.xlu2 %989 }
0x1239   :  { %1612 = vst.msk [vmem:[%s2237_s5 + $0x3] sm:$0x1] %vm170_vm10, %v990_v40 }
0x123a   :  { %899 = vrot.lane.b32.xlu1 %v897_v52, %s1772_s2 }
0x1240   :  { %v1260_v43 = vpop.permute.xlu2 %1259 }
0x1241   :  { %1624 = vst.msk [vmem:[%s2238_s4 + $0x6] sm:$0x1] %vm170_vm10, %v1260_v43 }
0x1242   :  { %1169 = vrot.lane.b32.xlu1 %v1167_v44, %s1772_s2 }
0x1249   :  { %v1429_v18 = vpop.permute.xlu2 %1428 }
0x124a   :  { %1431 = vst.msk [vmem:[#allocation3] sm:$0x3] %vm55_vm0, %v1429_v18  ;;  %1421 = vrot.lane.b32.xlu1 %v1420_v10, %s1772_s2 }
0x1256   :  { %v1440_v63 = vpop.permute.xlu0 %1439 }
0x1257   :  { %1632 = vst.msk [vmem:[%s2238_s4 + $0x7] sm:$0x1] %vm170_vm10, %v1440_v63 }
0x1294   :  { %v1504_v0 = vpop.permute.xlu1 %1503 }
0x1295   :  { %v1506_v45 = vmul.f32 %v1504_v0, %v2112_v53 }
0x1297   :  { %v1521_v46 = vpack.c.bf16 %v1506_v45, %v1506_v45  ;;  %1508 = vst [vmem:[#allocation1] ss:$4 sm:$0xff] %v1506_v45 }
0x1299   :  { %v1523_v47 = vrot.slane %v1521_v46, 3 }
0x129b   :  { %v1526_v48 = vsel %vm162_vm1, %v1521_v46, %v1523_v47 }
0x129c   :  { %v360_v49 = vpop.permute.xlu1 %359  ;;  %1528 = vrot.lane.b32.xlu0 %v1526_v48, %s1772_s2 }
0x129d   :  { %1584 = vst.msk [vmem:[%s2238_s4 + $0x1] sm:$0x1] %vm170_vm10, %v360_v49 }
0x129e   :  { %v1509_v39 = vld.sshfl [vmem:[#allocation1] sm:$0xff pattern:$0x73625140] }
0x129f   :  { %1510 = vrot.lane.b32.xlu1 %v1509_v39, %s1772_s2  ;;  %1515 = vst [vmem:[#allocation1] ss:$4 sm:$0xff] %v1500_v28 }
0x12a4   :  { %v630_v50 = vpop.permute.xlu1 %629 }
0x12a5   :  { %1596 = vst.msk [vmem:[%s2237_s5 + $0x5] sm:$0x1] %vm170_vm10, %v630_v50 }
0x12a6   :  { %v1516_v2 = vld.sshfl [vmem:[#allocation1] sm:$0xff pattern:$0x73625140] }
0x12a7   :  { %1517 = vrot.lane.b32.xlu2 %v1516_v2, %s1774_s30 }
0x12ac   :  { %v900_v51 = vpop.permute.xlu1 %899 }
0x12ad   :  { %1608 = vst.msk [vmem:[%s2238_s4 + $0x4] sm:$0x1] %vm170_vm10, %v900_v51 }
0x12b4   :  { %v1170_v4 = vpop.permute.xlu1 %1169 }
0x12b5   :  { %1620 = vst.msk [vmem:[%s2237_s5 + $0x2] sm:$0x1] %vm170_vm10, %v1170_v4 }
0x12bc   :  { %v1422_v53 = vpop.permute.xlu1 %1421 }
0x12bd   :  { %1424 = vst.msk [vmem:[#allocation2] sm:$0x3] %vm55_vm0, %v1422_v53 }
0x1301   :  { %v1518_v54 = vpop.permute.xlu2 %1517 }
0x1302   :  { %1520 = vst.msk [vmem:[#allocation5] sm:$0x3] %vm55_vm0, %v1518_v54 }
0x130e   :  { %v1529_v55 = vpop.permute.xlu0 %1528 }
0x130f   :  { %1531 = vst.msk [vmem:[%s2237_s5] sm:$0x1] %vm170_vm10, %v1529_v55 }
0x1311   :  { %v1511_v56 = vpop.permute.xlu1 %1510 }
0x1312   :  { %1513 = vst.msk [vmem:[#allocation4] sm:$0x3] %vm55_vm0, %v1511_v56 }

</bundles_post_ra>
